<compile_context>
chip_gen: v6e
topology: v6e:2x2x1
jax: 0.10.0
libtpu: 0.0.40
codegen_flags: <defaults>
</compile_context>

<pallas_src>
import functools

import jax
import jax.numpy as jnp
from jax.experimental import pallas as pl
from jax.experimental.pallas import tpu as pltpu


# ----------------------------------------------------------------------------
# Fused kernel: one grid step = one ResidualBlock of one batch sample.
# ----------------------------------------------------------------------------
def _nresnet_kernel(x_ref, w_ref, g_ref, bt_ref, o_ref, *, act, eps):
    _, H, W, C = x_ref.shape
    HW = H * W
    inv_hw = 1.0 / HW
    k = pl.program_id(1)          # residual-block index (inner, "arbitrary")

    # First block of this sample: seed the resident output block (the
    # residual stream) with the input activation.
    @pl.when(k == 0)
    def _():
        o_ref[...] = x_ref[...]

    def conv3x3(t, ci):
        """ReflectionPad2d(1) + Conv2d(C, C, 3) of t:(H, W, C) f32 -> (H*W, C) f32.

        Single bf16 cast, reflection pad built as a value (no unaligned VMEM
        stores), im2col via lane concat, one MXU matmul with K = 9*C.
        Requires H >= 2 and W >= 2 (PyTorch reflection pad constraint).
        """
        tb = t.astype(jnp.bfloat16)                                   # one cast
        pb = jnp.concatenate([tb[:, 1:2, :], tb, tb[:, W - 2:W - 1, :]], axis=1)
        pb = jnp.concatenate([pb[1:2], pb, pb[H - 2:H - 1]], axis=0)  # (H+2, W+2, C)
        cols = []
        for dh in range(3):
            for dw in range(3):
                cols.append(pb[dh:dh + H, dw:dw + W, :].reshape(HW, C))
        col = jnp.concatenate(cols, axis=-1)                          # (HW, 9C) bf16
        # NOTE: conv bias is intentionally omitted (cancelled by InstanceNorm).
        return jnp.dot(col, w_ref[0, ci], preferred_element_type=jnp.float32)

    def inorm(y, ci):
        """InstanceNorm2d(affine=True), single pass, gamma folded into scale."""
        mean = jnp.sum(y, axis=0, keepdims=True) * inv_hw
        var = jnp.sum(y * y, axis=0, keepdims=True) * inv_hw - mean * mean
        var = jnp.maximum(var, 0.0)
        scale = g_ref[0, ci] * jax.lax.rsqrt(var + eps)
        return y * scale + (bt_ref[0, ci] - mean * scale)

    # conv -> norm -> activation
    y = inorm(conv3x3(o_ref[0], 0), 0)
    if act == "swish":
        y = y * jax.nn.sigmoid(y)
    elif act == "relu":
        y = jnp.maximum(y, 0.0)
    # act == "none": second branch of ResidualBlock has no activation anyway.

    # conv -> norm, then residual add into the resident output block.
    y = inorm(conv3x3(y.reshape(H, W, C), 1), 1)
    o_ref[0] = o_ref[0] + y.reshape(H, W, C)


# ----------------------------------------------------------------------------
# Wrapper: one pallas_call for the whole network (grid = (batch, num_blocks)).
# ----------------------------------------------------------------------------
def nresnet_pallas(x_nchw, w, g, bt, *, act="relu", eps=1e-5):
    """x_nchw: (N, C, H, W) f32; w: (B, 2, 9*C, C) bf16; g/bt: (B, 2, 1, C) f32."""
    N, C, H, W = x_nchw.shape
    B = w.shape[0]
    x_nhwc = jnp.transpose(x_nchw, (0, 2, 3, 1))          # single layout change in

    out = pl.pallas_call(
        functools.partial(_nresnet_kernel, act=act, eps=eps),
        out_shape=jax.ShapeDtypeStruct((N, H, W, C), jnp.float32),
        grid_spec=pltpu.PrefetchScalarGridSpec(
            num_scalar_prefetch=0,
            grid=(N, B),
            in_specs=[
                # Activation block: resident across the block axis.
                pl.BlockSpec((1, H, W, C), lambda n, k: (n, 0, 0, 0)),
                # Per-block weights / affine params: streamed one block at a
                # time (pipelined behind compute), indexed by the block axis.
                pl.BlockSpec((1, 2, 9 * C, C), lambda n, k: (k, 0, 0, 0)),
                pl.BlockSpec((1, 2, 1, C), lambda n, k: (k, 0, 0, 0)),
                pl.BlockSpec((1, 2, 1, C), lambda n, k: (k, 0, 0, 0)),
            ],
            # Output block revisited across k -> acts as the residual stream
            # accumulator; written back to HBM only when the sample changes.
            out_specs=pl.BlockSpec((1, H, W, C), lambda n, k: (n, 0, 0, 0)),
        ),
        compiler_params=pltpu.CompilerParams(
            dimension_semantics=("parallel", "arbitrary"),
            vmem_limit_bytes=32 * 1024 * 1024),
    )(x_nhwc, w, g, bt)
    return jnp.transpose(out, (0, 3, 1, 2))               # single layout change out


def _pack_params(params):
    """Pack per-block PyTorch-layout params into kernel-friendly stacked arrays."""
    C = params[0]["w1"].shape[0]

    def im2col_w(w):   # OIHW (Cout, Cin, 3, 3) -> (9*Cin, Cout), row = tap*Cin + ci
        return jnp.transpose(w, (2, 3, 1, 0)).reshape(9 * C, C)

    w = jnp.stack([jnp.stack([im2col_w(p["w1"]), im2col_w(p["w2"])]) for p in params])
    w = w.astype(jnp.bfloat16)                                        # (B, 2, 9C, C)
    g = jnp.stack([jnp.stack([p["g1"], p["g2"]]) for p in params])[:, :, None, :]
    bt = jnp.stack([jnp.stack([p["bt1"], p["bt2"]]) for p in params])[:, :, None, :]
    # Conv biases (b1, b2) are deliberately NOT packed: they are exactly
    # cancelled by the InstanceNorm mean subtraction.
    return w, g, bt


@functools.partial(jax.jit, static_argnames=("act",))
def nresnet_forward(params, x, act="relu"):
    w, g, bt = _pack_params(params)
    return nresnet_pallas(x, w, g, bt, act=act)


# ----------------------------------------------------------------------------
# Deterministic synthetic parameters (shapes from ResidualBlock.__init__).
# ----------------------------------------------------------------------------
def init_params(key, num_blocks, C):
    params = []
    s = (C * 9) ** -0.5
    for _ in range(num_blocks):
        key, *ks = jax.random.split(key, 9)
        params.append(dict(
            w1=s * jax.random.normal(ks[0], (C, C, 3, 3), jnp.float32),
            b1=0.05 * jax.random.normal(ks[1], (C,), jnp.float32),
            g1=1.0 + 0.1 * jax.random.normal(ks[2], (C,), jnp.float32),
            bt1=0.1 * jax.random.normal(ks[3], (C,), jnp.float32),
            w2=s * jax.random.normal(ks[4], (C, C, 3, 3), jnp.float32),
            b2=0.05 * jax.random.normal(ks[5], (C,), jnp.float32),
            g2=1.0 + 0.1 * jax.random.normal(ks[6], (C,), jnp.float32),
            bt2=0.1 * jax.random.normal(ks[7], (C,), jnp.float32),
        ))
    return params


# ----------------------------------------------------------------------------
# Pure-JAX reference (same math as the PyTorch module, incl. conv bias).
# ----------------------------------------------------------------------------
@functools.partial(jax.jit, static_argnames=("act",))
def _ref_forward(params, x, act="relu"):
    hi = jax.lax.Precision.HIGHEST

    def conv_ref(h, w, b):
        hp = jnp.pad(h, ((0, 0), (0, 0), (1, 1), (1, 1)), mode="reflect")
        out = jax.lax.conv_general_dilated(
            hp, w, (1, 1), "VALID",
            dimension_numbers=("NCHW", "OIHW", "NCHW"), precision=hi)
        return out + b.reshape(1, -1, 1, 1)

    def inorm_ref(h, g, bt, eps=1e-5):
        mean = h.mean(axis=(2, 3), keepdims=True)
        var = ((h - mean) ** 2).mean(axis=(2, 3), keepdims=True)
        return (h - mean) * jax.lax.rsqrt(var + eps) * g.reshape(1, -1, 1, 1) \
               + bt.reshape(1, -1, 1, 1)

    h = x
    for p in params:
        y = inorm_ref(conv_ref(h, p["w1"], p["b1"]), p["g1"], p["bt1"])
        if act == "swish":
            y = y * jax.nn.sigmoid(y)
        elif act == "relu":
            y = jnp.maximum(y, 0.0)
        y = inorm_ref(conv_ref(y, p["w2"], p["b2"]), p["g2"], p["bt2"])
        h = h + y
    return h


if __name__ == "__main__":
    NUM_BLOCKS, C = 2, 32       # nResNet(num_residual_blocks=2, out_features=32)
    N, H, W = 2, 16, 16         # even N -> both v7x TensorCores used

    key = jax.random.PRNGKey(0)
    key, xkey = jax.random.split(key)
    x = jax.random.normal(xkey, (N, C, H, W), jnp.float32)
    params = init_params(key, NUM_BLOCKS, C)

    for act in ("relu", "swish"):           # validate both activation variants
        out = jax.block_until_ready(nresnet_forward(params, x, act=act))
        ref = jax.block_until_ready(_ref_forward(params, x, act=act))
        assert out.shape == (N, C, H, W), out.shape
        assert bool(jnp.all(jnp.isfinite(out)))
        max_err = float(jnp.max(jnp.abs(out - ref)))
        # bf16 MXU operands (f32 accumulation) vs f32-HIGHEST reference.
        assert bool(jnp.allclose(out, ref, rtol=5e-2, atol=5e-2)), (act, max_err)

    print("KERNEL_OK")
</pallas_src>

<mosaic_0001>
module attributes {stable_mosaic.version = 11 : i64} {
  func.func @_nresnet_kernel(%arg0: i32, %arg1: i32, %arg2: memref<1x16x16x32xf32, #tpu.memory_space<vmem>>, %arg3: memref<1x2x288x32xbf16, #tpu.memory_space<vmem>>, %arg4: memref<1x2x1x32xf32, #tpu.memory_space<vmem>>, %arg5: memref<1x2x1x32xf32, #tpu.memory_space<vmem>>, %arg6: memref<1x16x16x32xf32, #tpu.memory_space<vmem>>) attributes {dimension_semantics = [#tpu.dimension_semantics<parallel>, #tpu.dimension_semantics<arbitrary>], iteration_bounds = array<i64: 2, 2>, scalar_prefetch = 0 : i64, scratch_operands = 0 : i64, tpu.core_type = #tpu.core_type<tc>, window_params = [{transform_indices = @transform_0, window_bounds = array<i64: 1, 16, 16, 32>}, {transform_indices = @transform_1, window_bounds = array<i64: 1, 2, 288, 32>}, {transform_indices = @transform_2, window_bounds = array<i64: 1, 2, 1, 32>}, {transform_indices = @transform_3, window_bounds = array<i64: 1, 2, 1, 32>}, {transform_indices = @transform_4, window_bounds = array<i64: 1, 16, 16, 32>}]} {
    %c0_i32 = arith.constant 0 : i32
    %0 = arith.cmpi eq, %arg1, %c0_i32 : i32
    %1 = arith.extui %0 : i1 to i32
    %c0_i32_0 = arith.constant 0 : i32
    %2 = arith.cmpi ne, %1, %c0_i32_0 : i32
    scf.if %2 {
      %c0_49 = arith.constant 0 : index
      %c0_50 = arith.constant 0 : index
      %c0_51 = arith.constant 0 : index
      %c0_52 = arith.constant 0 : index
      %127 = vector.load %arg2[%c0_49, %c0_50, %c0_51, %c0_52] : memref<1x16x16x32xf32, #tpu.memory_space<vmem>>, vector<1x16x16x32xf32>
      %c0_53 = arith.constant 0 : index
      %c0_54 = arith.constant 0 : index
      %c0_55 = arith.constant 0 : index
      %c0_56 = arith.constant 0 : index
      %128 = vector.load %arg6[%c0_53, %c0_54, %c0_55, %c0_56] : memref<1x16x16x32xf32, #tpu.memory_space<vmem>>, vector<1x16x16x32xf32>
      tpu.vector_store %arg6[%c0_53, %c0_54, %c0_55, %c0_56], %127 {strides = array<i32>} : memref<1x16x16x32xf32, #tpu.memory_space<vmem>>, vector<1x16x16x32xf32>,
    } else {
    }
    %c0 = arith.constant 0 : index
    %c0_1 = arith.constant 0 : index
    %c0_2 = arith.constant 0 : index
    %c0_3 = arith.constant 0 : index
    %3 = vector.load %arg6[%c0, %c0_1, %c0_2, %c0_3] : memref<1x16x16x32xf32, #tpu.memory_space<vmem>>, vector<1x16x16x32xf32>
    %4 = vector.shape_cast %3 : vector<1x16x16x32xf32> to vector<16x16x32xf32>
    %5 = arith.truncf %4 : vector<16x16x32xf32> to vector<16x16x32xbf16>
    %6 = vector.extract_strided_slice %5 {offsets = [0, 1, 0], sizes = [16, 1, 32], strides = [1, 1, 1]} : vector<16x16x32xbf16> to vector<16x1x32xbf16>
    %7 = vector.extract_strided_slice %5 {offsets = [0, 14, 0], sizes = [16, 1, 32], strides = [1, 1, 1]} : vector<16x16x32xbf16> to vector<16x1x32xbf16>
    %8 = tpu.concatenate %6, %5, %7 in 1 : vector<16x1x32xbf16>, vector<16x16x32xbf16>, vector<16x1x32xbf16> -> vector<16x18x32xbf16>
    %9 = vector.extract_strided_slice %8 {offsets = [1, 0, 0], sizes = [1, 18, 32], strides = [1, 1, 1]} : vector<16x18x32xbf16> to vector<1x18x32xbf16>
    %10 = vector.extract_strided_slice %8 {offsets = [14, 0, 0], sizes = [1, 18, 32], strides = [1, 1, 1]} : vector<16x18x32xbf16> to vector<1x18x32xbf16>
    %11 = tpu.concatenate %9, %8, %10 in 0 : vector<1x18x32xbf16>, vector<16x18x32xbf16>, vector<1x18x32xbf16> -> vector<18x18x32xbf16>
    %12 = vector.extract_strided_slice %11 {offsets = [0, 0, 0], sizes = [16, 16, 32], strides = [1, 1, 1]} : vector<18x18x32xbf16> to vector<16x16x32xbf16>
    %13 = vector.shape_cast %12 : vector<16x16x32xbf16> to vector<256x32xbf16>
    %14 = vector.extract_strided_slice %11 {offsets = [0, 1, 0], sizes = [16, 16, 32], strides = [1, 1, 1]} : vector<18x18x32xbf16> to vector<16x16x32xbf16>
    %15 = vector.shape_cast %14 : vector<16x16x32xbf16> to vector<256x32xbf16>
    %16 = vector.extract_strided_slice %11 {offsets = [0, 2, 0], sizes = [16, 16, 32], strides = [1, 1, 1]} : vector<18x18x32xbf16> to vector<16x16x32xbf16>
    %17 = vector.shape_cast %16 : vector<16x16x32xbf16> to vector<256x32xbf16>
    %18 = vector.extract_strided_slice %11 {offsets = [1, 0, 0], sizes = [16, 16, 32], strides = [1, 1, 1]} : vector<18x18x32xbf16> to vector<16x16x32xbf16>
    %19 = vector.shape_cast %18 : vector<16x16x32xbf16> to vector<256x32xbf16>
    %20 = vector.extract_strided_slice %11 {offsets = [1, 1, 0], sizes = [16, 16, 32], strides = [1, 1, 1]} : vector<18x18x32xbf16> to vector<16x16x32xbf16>
    %21 = vector.shape_cast %20 : vector<16x16x32xbf16> to vector<256x32xbf16>
    %22 = vector.extract_strided_slice %11 {offsets = [1, 2, 0], sizes = [16, 16, 32], strides = [1, 1, 1]} : vector<18x18x32xbf16> to vector<16x16x32xbf16>
    %23 = vector.shape_cast %22 : vector<16x16x32xbf16> to vector<256x32xbf16>
    %24 = vector.extract_strided_slice %11 {offsets = [2, 0, 0], sizes = [16, 16, 32], strides = [1, 1, 1]} : vector<18x18x32xbf16> to vector<16x16x32xbf16>
    %25 = vector.shape_cast %24 : vector<16x16x32xbf16> to vector<256x32xbf16>
    %26 = vector.extract_strided_slice %11 {offsets = [2, 1, 0], sizes = [16, 16, 32], strides = [1, 1, 1]} : vector<18x18x32xbf16> to vector<16x16x32xbf16>
    %27 = vector.shape_cast %26 : vector<16x16x32xbf16> to vector<256x32xbf16>
    %28 = vector.extract_strided_slice %11 {offsets = [2, 2, 0], sizes = [16, 16, 32], strides = [1, 1, 1]} : vector<18x18x32xbf16> to vector<16x16x32xbf16>
    %29 = vector.shape_cast %28 : vector<16x16x32xbf16> to vector<256x32xbf16>
    %30 = tpu.concatenate %13, %15, %17, %19, %21, %23, %25, %27, %29 in 1 : vector<256x32xbf16>, vector<256x32xbf16>, vector<256x32xbf16>, vector<256x32xbf16>, vector<256x32xbf16>, vector<256x32xbf16>, vector<256x32xbf16>, vector<256x32xbf16>, vector<256x32xbf16> -> vector<256x288xbf16>
    %c0_4 = arith.constant 0 : index
    %c0_5 = arith.constant 0 : index
    %c0_6 = arith.constant 0 : index
    %c0_7 = arith.constant 0 : index
    %31 = vector.load %arg3[%c0_4, %c0_5, %c0_6, %c0_7] : memref<1x2x288x32xbf16, #tpu.memory_space<vmem>>, vector<1x1x288x32xbf16>
    %32 = vector.shape_cast %31 : vector<1x1x288x32xbf16> to vector<288x32xbf16>
    %cst = arith.constant dense<0.000000e+00> : vector<256x32xf32>
    %33 = tpu.matmul %30, %32, %cst {dimension_numbers = #tpu.dot_dimension_numbers<[1], [0], [0], [1], [0, 0, 1, 1], [], []>} : vector<256x288xbf16>, vector<288x32xbf16>, vector<256x32xf32> -> vector<256x32xf32>
    %cst_8 = arith.constant dense<0.000000e+00> : vector<32xf32>
    %34 = vector.multi_reduction <add>, %33, %cst_8 [0] : vector<256x32xf32> to vector<32xf32>
    %35 = vector.shape_cast %34 : vector<32xf32> to vector<1x32xf32>
    %cst_9 = arith.constant 3.906250e-03 : f32
    %36 = vector.broadcast %cst_9 : f32 to vector<1x32xf32>
    %37 = arith.mulf %35, %36 : vector<1x32xf32>
    %38 = arith.mulf %33, %33 : vector<256x32xf32>
    %cst_10 = arith.constant dense<0.000000e+00> : vector<32xf32>
    %39 = vector.multi_reduction <add>, %38, %cst_10 [0] : vector<256x32xf32> to vector<32xf32>
    %40 = vector.shape_cast %39 : vector<32xf32> to vector<1x32xf32>
    %cst_11 = arith.constant 3.906250e-03 : f32
    %41 = vector.broadcast %cst_11 : f32 to vector<1x32xf32>
    %42 = arith.mulf %40, %41 : vector<1x32xf32>
    %43 = arith.mulf %37, %37 : vector<1x32xf32>
    %44 = arith.subf %42, %43 : vector<1x32xf32>
    %cst_12 = arith.constant 0.000000e+00 : f32
    %45 = vector.broadcast %cst_12 : f32 to vector<1x32xf32>
    %46 = arith.maximumf %44, %45 : vector<1x32xf32>
    %c0_13 = arith.constant 0 : index
    %c0_14 = arith.constant 0 : index
    %c0_15 = arith.constant 0 : index
    %c0_16 = arith.constant 0 : index
    %47 = vector.load %arg4[%c0_13, %c0_14, %c0_15, %c0_16] : memref<1x2x1x32xf32, #tpu.memory_space<vmem>>, vector<1x1x1x32xf32>
    %48 = vector.shape_cast %47 : vector<1x1x1x32xf32> to vector<1x32xf32>
    %cst_17 = arith.constant 9.99999974E-6 : f32
    %49 = vector.broadcast %cst_17 : f32 to vector<1x32xf32>
    %50 = arith.addf %46, %49 : vector<1x32xf32>
    %51 = math.rsqrt %50 : vector<1x32xf32>
    %52 = arith.mulf %48, %51 : vector<1x32xf32>
    %53 = vector.broadcast %52 : vector<1x32xf32> to vector<256x32xf32>
    %54 = arith.mulf %33, %53 : vector<256x32xf32>
    %c0_18 = arith.constant 0 : index
    %c0_19 = arith.constant 0 : index
    %c0_20 = arith.constant 0 : index
    %c0_21 = arith.constant 0 : index
    %55 = vector.load %arg5[%c0_18, %c0_19, %c0_20, %c0_21] : memref<1x2x1x32xf32, #tpu.memory_space<vmem>>, vector<1x1x1x32xf32>
    %56 = vector.shape_cast %55 : vector<1x1x1x32xf32> to vector<1x32xf32>
    %57 = arith.mulf %37, %52 : vector<1x32xf32>
    %58 = arith.subf %56, %57 : vector<1x32xf32>
    %59 = vector.broadcast %58 : vector<1x32xf32> to vector<256x32xf32>
    %60 = arith.addf %54, %59 : vector<256x32xf32>
    %cst_22 = arith.constant 0.000000e+00 : f32
    %61 = vector.broadcast %cst_22 : f32 to vector<256x32xf32>
    %62 = arith.maximumf %60, %61 : vector<256x32xf32>
    %63 = vector.shape_cast %62 : vector<256x32xf32> to vector<16x16x32xf32>
    %64 = arith.truncf %63 : vector<16x16x32xf32> to vector<16x16x32xbf16>
    %65 = vector.extract_strided_slice %64 {offsets = [0, 1, 0], sizes = [16, 1, 32], strides = [1, 1, 1]} : vector<16x16x32xbf16> to vector<16x1x32xbf16>
    %66 = vector.extract_strided_slice %64 {offsets = [0, 14, 0], sizes = [16, 1, 32], strides = [1, 1, 1]} : vector<16x16x32xbf16> to vector<16x1x32xbf16>
    %67 = tpu.concatenate %65, %64, %66 in 1 : vector<16x1x32xbf16>, vector<16x16x32xbf16>, vector<16x1x32xbf16> -> vector<16x18x32xbf16>
    %68 = vector.extract_strided_slice %67 {offsets = [1, 0, 0], sizes = [1, 18, 32], strides = [1, 1, 1]} : vector<16x18x32xbf16> to vector<1x18x32xbf16>
    %69 = vector.extract_strided_slice %67 {offsets = [14, 0, 0], sizes = [1, 18, 32], strides = [1, 1, 1]} : vector<16x18x32xbf16> to vector<1x18x32xbf16>
    %70 = tpu.concatenate %68, %67, %69 in 0 : vector<1x18x32xbf16>, vector<16x18x32xbf16>, vector<1x18x32xbf16> -> vector<18x18x32xbf16>
    %71 = vector.extract_strided_slice %70 {offsets = [0, 0, 0], sizes = [16, 16, 32], strides = [1, 1, 1]} : vector<18x18x32xbf16> to vector<16x16x32xbf16>
    %72 = vector.shape_cast %71 : vector<16x16x32xbf16> to vector<256x32xbf16>
    %73 = vector.extract_strided_slice %70 {offsets = [0, 1, 0], sizes = [16, 16, 32], strides = [1, 1, 1]} : vector<18x18x32xbf16> to vector<16x16x32xbf16>
    %74 = vector.shape_cast %73 : vector<16x16x32xbf16> to vector<256x32xbf16>
    %75 = vector.extract_strided_slice %70 {offsets = [0, 2, 0], sizes = [16, 16, 32], strides = [1, 1, 1]} : vector<18x18x32xbf16> to vector<16x16x32xbf16>
    %76 = vector.shape_cast %75 : vector<16x16x32xbf16> to vector<256x32xbf16>
    %77 = vector.extract_strided_slice %70 {offsets = [1, 0, 0], sizes = [16, 16, 32], strides = [1, 1, 1]} : vector<18x18x32xbf16> to vector<16x16x32xbf16>
    %78 = vector.shape_cast %77 : vector<16x16x32xbf16> to vector<256x32xbf16>
    %79 = vector.extract_strided_slice %70 {offsets = [1, 1, 0], sizes = [16, 16, 32], strides = [1, 1, 1]} : vector<18x18x32xbf16> to vector<16x16x32xbf16>
    %80 = vector.shape_cast %79 : vector<16x16x32xbf16> to vector<256x32xbf16>
    %81 = vector.extract_strided_slice %70 {offsets = [1, 2, 0], sizes = [16, 16, 32], strides = [1, 1, 1]} : vector<18x18x32xbf16> to vector<16x16x32xbf16>
    %82 = vector.shape_cast %81 : vector<16x16x32xbf16> to vector<256x32xbf16>
    %83 = vector.extract_strided_slice %70 {offsets = [2, 0, 0], sizes = [16, 16, 32], strides = [1, 1, 1]} : vector<18x18x32xbf16> to vector<16x16x32xbf16>
    %84 = vector.shape_cast %83 : vector<16x16x32xbf16> to vector<256x32xbf16>
    %85 = vector.extract_strided_slice %70 {offsets = [2, 1, 0], sizes = [16, 16, 32], strides = [1, 1, 1]} : vector<18x18x32xbf16> to vector<16x16x32xbf16>
    %86 = vector.shape_cast %85 : vector<16x16x32xbf16> to vector<256x32xbf16>
    %87 = vector.extract_strided_slice %70 {offsets = [2, 2, 0], sizes = [16, 16, 32], strides = [1, 1, 1]} : vector<18x18x32xbf16> to vector<16x16x32xbf16>
    %88 = vector.shape_cast %87 : vector<16x16x32xbf16> to vector<256x32xbf16>
    %89 = tpu.concatenate %72, %74, %76, %78, %80, %82, %84, %86, %88 in 1 : vector<256x32xbf16>, vector<256x32xbf16>, vector<256x32xbf16>, vector<256x32xbf16>, vector<256x32xbf16>, vector<256x32xbf16>, vector<256x32xbf16>, vector<256x32xbf16>, vector<256x32xbf16> -> vector<256x288xbf16>
    %c0_23 = arith.constant 0 : index
    %c1 = arith.constant 1 : index
    %c0_24 = arith.constant 0 : index
    %c0_25 = arith.constant 0 : index
    %90 = vector.load %arg3[%c0_23, %c1, %c0_24, %c0_25] : memref<1x2x288x32xbf16, #tpu.memory_space<vmem>>, vector<1x1x288x32xbf16>
    %91 = vector.shape_cast %90 : vector<1x1x288x32xbf16> to vector<288x32xbf16>
    %cst_26 = arith.constant dense<0.000000e+00> : vector<256x32xf32>
    %92 = tpu.matmul %89, %91, %cst_26 {dimension_numbers = #tpu.dot_dimension_numbers<[1], [0], [0], [1], [0, 0, 1, 1], [], []>} : vector<256x288xbf16>, vector<288x32xbf16>, vector<256x32xf32> -> vector<256x32xf32>
    %cst_27 = arith.constant dense<0.000000e+00> : vector<32xf32>
    %93 = vector.multi_reduction <add>, %92, %cst_27 [0] : vector<256x32xf32> to vector<32xf32>
    %94 = vector.shape_cast %93 : vector<32xf32> to vector<1x32xf32>
    %cst_28 = arith.constant 3.906250e-03 : f32
    %95 = vector.broadcast %cst_28 : f32 to vector<1x32xf32>
    %96 = arith.mulf %94, %95 : vector<1x32xf32>
    %97 = arith.mulf %92, %92 : vector<256x32xf32>
    %cst_29 = arith.constant dense<0.000000e+00> : vector<32xf32>
    %98 = vector.multi_reduction <add>, %97, %cst_29 [0] : vector<256x32xf32> to vector<32xf32>
    %99 = vector.shape_cast %98 : vector<32xf32> to vector<1x32xf32>
    %cst_30 = arith.constant 3.906250e-03 : f32
    %100 = vector.broadcast %cst_30 : f32 to vector<1x32xf32>
    %101 = arith.mulf %99, %100 : vector<1x32xf32>
    %102 = arith.mulf %96, %96 : vector<1x32xf32>
    %103 = arith.subf %101, %102 : vector<1x32xf32>
    %cst_31 = arith.constant 0.000000e+00 : f32
    %104 = vector.broadcast %cst_31 : f32 to vector<1x32xf32>
    %105 = arith.maximumf %103, %104 : vector<1x32xf32>
    %c0_32 = arith.constant 0 : index
    %c1_33 = arith.constant 1 : index
    %c0_34 = arith.constant 0 : index
    %c0_35 = arith.constant 0 : index
    %106 = vector.load %arg4[%c0_32, %c1_33, %c0_34, %c0_35] : memref<1x2x1x32xf32, #tpu.memory_space<vmem>>, vector<1x1x1x32xf32>
    %107 = vector.shape_cast %106 : vector<1x1x1x32xf32> to vector<1x32xf32>
    %cst_36 = arith.constant 9.99999974E-6 : f32
    %108 = vector.broadcast %cst_36 : f32 to vector<1x32xf32>
    %109 = arith.addf %105, %108 : vector<1x32xf32>
    %110 = math.rsqrt %109 : vector<1x32xf32>
    %111 = arith.mulf %107, %110 : vector<1x32xf32>
    %112 = vector.broadcast %111 : vector<1x32xf32> to vector<256x32xf32>
    %113 = arith.mulf %92, %112 : vector<256x32xf32>
    %c0_37 = arith.constant 0 : index
    %c1_38 = arith.constant 1 : index
    %c0_39 = arith.constant 0 : index
    %c0_40 = arith.constant 0 : index
    %114 = vector.load %arg5[%c0_37, %c1_38, %c0_39, %c0_40] : memref<1x2x1x32xf32, #tpu.memory_space<vmem>>, vector<1x1x1x32xf32>
    %115 = vector.shape_cast %114 : vector<1x1x1x32xf32> to vector<1x32xf32>
    %116 = arith.mulf %96, %111 : vector<1x32xf32>
    %117 = arith.subf %115, %116 : vector<1x32xf32>
    %118 = vector.broadcast %117 : vector<1x32xf32> to vector<256x32xf32>
    %119 = arith.addf %113, %118 : vector<256x32xf32>
    %c0_41 = arith.constant 0 : index
    %c0_42 = arith.constant 0 : index
    %c0_43 = arith.constant 0 : index
    %c0_44 = arith.constant 0 : index
    %120 = vector.load %arg6[%c0_41, %c0_42, %c0_43, %c0_44] : memref<1x16x16x32xf32, #tpu.memory_space<vmem>>, vector<1x16x16x32xf32>
    %121 = vector.shape_cast %120 : vector<1x16x16x32xf32> to vector<16x16x32xf32>
    %122 = vector.shape_cast %119 : vector<256x32xf32> to vector<16x16x32xf32>
    %123 = arith.addf %121, %122 : vector<16x16x32xf32>
    %c0_45 = arith.constant 0 : index
    %c0_46 = arith.constant 0 : index
    %c0_47 = arith.constant 0 : index
    %c0_48 = arith.constant 0 : index
    %124 = vector.load %arg6[%c0_45, %c0_46, %c0_47, %c0_48] : memref<1x16x16x32xf32, #tpu.memory_space<vmem>>, vector<1x16x16x32xf32>
    %125 = vector.shape_cast %124 : vector<1x16x16x32xf32> to vector<16x16x32xf32>
    %126 = vector.shape_cast %123 : vector<16x16x32xf32> to vector<1x16x16x32xf32>
    tpu.vector_store %arg6[%c0_45, %c0_46, %c0_47, %c0_48], %126 {strides = array<i32>} : memref<1x16x16x32xf32, #tpu.memory_space<vmem>>, vector<1x16x16x32xf32>,
    return
  }
  func.func @transform_0(%arg0: i32, %arg1: i32) -> (i32, i32, i32, i32) {
    %c0_i32 = arith.constant 0 : i32
    %c0_i32_0 = arith.constant 0 : i32
    %c0_i32_1 = arith.constant 0 : i32
    %c0_i32_2 = arith.constant 0 : i32
    return %arg0, %c0_i32, %c0_i32_0, %c0_i32_1 : i32, i32, i32, i32
  }
  func.func @transform_1(%arg0: i32, %arg1: i32) -> (i32, i32, i32, i32) {
    %c0_i32 = arith.constant 0 : i32
    %c0_i32_0 = arith.constant 0 : i32
    %c0_i32_1 = arith.constant 0 : i32
    %c0_i32_2 = arith.constant 0 : i32
    return %arg1, %c0_i32, %c0_i32_0, %c0_i32_1 : i32, i32, i32, i32
  }
  func.func @transform_2(%arg0: i32, %arg1: i32) -> (i32, i32, i32, i32) {
    %c0_i32 = arith.constant 0 : i32
    %c0_i32_0 = arith.constant 0 : i32
    %c0_i32_1 = arith.constant 0 : i32
    %c0_i32_2 = arith.constant 0 : i32
    return %arg1, %c0_i32, %c0_i32_0, %c0_i32_1 : i32, i32, i32, i32
  }
  func.func @transform_3(%arg0: i32, %arg1: i32) -> (i32, i32, i32, i32) {
    %c0_i32 = arith.constant 0 : i32
    %c0_i32_0 = arith.constant 0 : i32
    %c0_i32_1 = arith.constant 0 : i32
    %c0_i32_2 = arith.constant 0 : i32
    return %arg1, %c0_i32, %c0_i32_0, %c0_i32_1 : i32, i32, i32, i32
  }
  func.func @transform_4(%arg0: i32, %arg1: i32) -> (i32, i32, i32, i32) {
    %c0_i32 = arith.constant 0 : i32
    %c0_i32_0 = arith.constant 0 : i32
    %c0_i32_1 = arith.constant 0 : i32
    %c0_i32_2 = arith.constant 0 : i32
    return %arg0, %c0_i32, %c0_i32_0, %c0_i32_1 : i32, i32, i32, i32
  }
}

</mosaic_0001>

<bundles_post_ra>
// kernel: nresnet_forward.1
= control target key start
LH: loop header
LB: loop body
LE: loop exit
PB: predicated region body
PF: predicated region fallthrough
CT: control target
= control target key end

     0   :  { %9 = vsyncpa [#allocation3], 0  ;;  %s7586_s0 = inlined_call_operand.vmem [shape: f32[2,16,16,32], index: 0, kind: input, shape index: {}]   ;;  %s7587_s1 = inlined_call_operand.vmem [shape: bf16[2,2,288,32], index: 1, kind: input, shape index: {}]   ;;  %s7588_s2 = inlined_call_operand.vmem [shape: f32[2,2,1,32], index: 2, kind: input, shape index: {}]   ;;  %s7589_s3 = inlined_call_operand.vmem [shape: f32[2,2,1,32], index: 3, kind: input, shape index: {}]   ;;  %s7590_s4 = inlined_call_operand.hbm [shape: f32[2,16,16,32], index: 4, kind: output, shape index: {}]  }
   0x1   :  { %11 = vsyncpa [#allocation3 + $0x1], 0  ;;  %s4729_s15 = smov 0   ;;  %s4731_s16 = smov 0  }
   0x2   :  { %s4733_s17 = smov 0   ;;  %s4735_s18 = smov 0  }
   0x3   :  { %s4737_s19 = smov 0   ;;  %s4739_s20 = smov 0  }
   0x4   :  { %s4741_s21 = smov 0   ;;  %s4743_s22 = smov 0  }
   0x5 LB: > { %7609 = sst [smem:[#allocation5_spill]] %s4688_s20  ;;  %s3992_s23 = sadd.s32 4294967295, %s4696_s22   ;;  %s4696_s22 = sphi %s4743_s22, %s17_s22   ;;  %s4692_s21 = sphi %s4741_s21, %s7645_s21   ;;  %s4688_s20 = sphi %s4739_s20, %s7644_s20   ;;  %s4684_s19 = sphi %s4737_s19, %s7643_s19   ;;  %s4680_s18 = sphi %s4735_s18, %s7642_s18   ;;  %s4676_s17 = sphi %s4733_s17, %s7648_s17   ;;  %s4672_s16 = sphi %s4731_s16, %s7647_s16   ;;  %s4668_s15 = sphi %s4729_s15, %s7646_s15  }
   0x6   : > { %7610 = sst [smem:[#allocation6_spill]] %s4692_s21  ;;  %s3993_s24 = sadd.s32 4294967294, %s4696_s22  }
   0x7   : > { %s26_s25 = sadd.s32 1, %s4688_s20  ;;  %s29_s26 = sadd.s32 1, %s4692_s21 }
   0x8   : > { %p27_p0 = scmp.ge.s32.totalorder %s26_s25, 2  ;;  %p150_p1 = scmp.ne.s32.totalorder %s4676_s17, %s4672_s16 }
   0x9   : > { %p151_p2 = scmp.eq.s32.totalorder %s3992_s23, 3  ;;  %p156_p4 = scmp.ne.s32.totalorder %s4672_s16, %s4668_s15 }
   0xa   : > { %s7650_s25 = smov (%p27_p0, %s26_s25), 0  ;;  %s7652_s26 = smov (!%p27_p0, %s29_s26), %s4692_s21 }
   0xb   : > { %7611 = sst [smem:[#allocation7_spill]] %s7650_s25  ;;  %p4778_p3 = por %p151_p2, %p150_p1 }
   0xc   : > { %p31_p5 = scmp.ge.s32.totalorder %s7652_s26, 2  ;;  %p157_p6 = scmp.eq.s32.totalorder %s3993_s24, 3 }
   0xd   : > { %p3996_p7 = scmp.ge.s32.totalorder %s4696_s22, 1  ;;  %p205_p8 = scmp.lt.s32.totalorder %s4696_s22, 5 }
   0xe   : > { %s7654_s26 = smov (%p31_p5, %s7652_s26), 0  ;;  %p4788_p9 = por %p157_p6, %p156_p4 }
   0xf   : > { %7613 = sst [smem:[#allocation8_spill]] %s7654_s26  ;;  %p206_p10 = pnand %p3996_p7, %p205_p8 }
  0x10   : > { %s137_s29 = ssub.s32 %s4692_s21, %s7654_s26  ;;  %s140_s30 = sadd.s32 1, %s4676_s17 }
  0x11   : > { %p138_p11 = scmp.eq.s32.totalorder %s137_s29, 0  ;;  %209 = sbr.rel (%p206_p10) target bundleno = 1237 (0x4d5), region = 36 }
  0x13   : > { %s4796_s5 = scalar_select %p138_p11, %s4676_s17, %s140_s30  }
  0x16   : > { %s7592_s6 = sand.u32 1, %s4672_s16   ;;  %p244_p12 = scmp.lt.s32.totalorder %s4684_s19, 1 }
  0x17   : > { %s3997_s7 = sshll.u32 %s7592_s6, 8  ;;  %p249_p13 = scmp.lt.s32.totalorder %s4680_s18, 1 }
  0x18   : > { %s245_s8 = scalar_select %p244_p12, %s4684_s19, 1 }
  0x19   : > { %s250_s9 = scalar_select %p249_p13, %s4680_s18, 1 }
  0x1a   : > { %s4115_s10 = sshll.u32 %s245_s8, 8  ;;  %s4825_s11 = scalar_lea.vmem [#allocation2], %s3997_s7 }
  0x1b   : > { %s4808_s13 = scalar_lea.vmem %s7586_s0, %s4115_s10  ;;  %s4453_s14 = smul.u32 288, %s250_s9 }
  0x1c   : > { %s4001_s23 = sshll.u32 %s250_s9, 1  ;;  %p4003_p0 = scmp.ne.s32.totalorder %s4680_s18, 0 }
  0x1d   : > { %s4813_s30 = scalar_lea.vmem %s7587_s1, %s4453_s14  ;;  %s4818_s6 = scalar_lea.vmem %s7588_s2, %s4001_s23 }
  0x1e   : > { %s4823_s8 = scalar_lea.vmem %s7589_s3, %s4001_s23  ;;  %266 = sbr.rel (%p4003_p0) target bundleno = 52 (0x34), region = 40 }
  0x23   : > { %v267_v0 = vld [vmem:[%s4808_s13] sm:$0xff]  ;;  %vm299_vm0 = vcmask 261120   ;;  %v268_v1 = vld [vmem:[%s4808_s13 + $0x8] sm:$0xff]  ;;  %v269_v2 = vld [vmem:[%s4808_s13 + $0x10] sm:$0xff] }
  0x24   : > { %300 = vst.msk [vmem:[%s4825_s11] sm:$0xff] %vm299_vm0, %v267_v0  ;;  %301 = vst.msk [vmem:[%s4825_s11 + $0x8] sm:$0xff] %vm299_vm0, %v268_v1  ;;  %v270_v3 = vld [vmem:[%s4808_s13 + $0x18] sm:$0xff]  ;;  %v271_v4 = vld [vmem:[%s4808_s13 + $0x20] sm:$0xff] }
  0x25   : > { %302 = vst.msk [vmem:[%s4825_s11 + $0x10] sm:$0xff] %vm299_vm0, %v269_v2  ;;  %v272_v5 = vld [vmem:[%s4808_s13 + $0x28] sm:$0xff]  ;;  %303 = vst.msk [vmem:[%s4825_s11 + $0x18] sm:$0xff] %vm299_vm0, %v270_v3  ;;  %v273_v6 = vld [vmem:[%s4808_s13 + $0x30] sm:$0xff] }
  0x26   : > { %304 = vst.msk [vmem:[%s4825_s11 + $0x20] sm:$0xff] %vm299_vm0, %v271_v4  ;;  %305 = vst.msk [vmem:[%s4825_s11 + $0x28] sm:$0xff] %vm299_vm0, %v272_v5  ;;  %v274_v7 = vld [vmem:[%s4808_s13 + $0x38] sm:$0xff]  ;;  %v275_v8 = vld [vmem:[%s4808_s13 + $0x40] sm:$0xff] }
  0x27   : > { %306 = vst.msk [vmem:[%s4825_s11 + $0x30] sm:$0xff] %vm299_vm0, %v273_v6  ;;  %307 = vst.msk [vmem:[%s4825_s11 + $0x38] sm:$0xff] %vm299_vm0, %v274_v7  ;;  %v276_v9 = vld [vmem:[%s4808_s13 + $0x48] sm:$0xff]  ;;  %v277_v10 = vld [vmem:[%s4808_s13 + $0x50] sm:$0xff] }
  0x28   : > { %308 = vst.msk [vmem:[%s4825_s11 + $0x40] sm:$0xff] %vm299_vm0, %v275_v8  ;;  %v278_v11 = vld [vmem:[%s4808_s13 + $0x58] sm:$0xff]  ;;  %309 = vst.msk [vmem:[%s4825_s11 + $0x48] sm:$0xff] %vm299_vm0, %v276_v9  ;;  %v279_v12 = vld [vmem:[%s4808_s13 + $0x60] sm:$0xff] }
  0x29   : > { %310 = vst.msk [vmem:[%s4825_s11 + $0x50] sm:$0xff] %vm299_vm0, %v277_v10  ;;  %311 = vst.msk [vmem:[%s4825_s11 + $0x58] sm:$0xff] %vm299_vm0, %v278_v11  ;;  %v280_v13 = vld [vmem:[%s4808_s13 + $0x68] sm:$0xff]  ;;  %v281_v14 = vld [vmem:[%s4808_s13 + $0x70] sm:$0xff] }
  0x2a   : > { %312 = vst.msk [vmem:[%s4825_s11 + $0x60] sm:$0xff] %vm299_vm0, %v279_v12  ;;  %313 = vst.msk [vmem:[%s4825_s11 + $0x68] sm:$0xff] %vm299_vm0, %v280_v13  ;;  %v282_v15 = vld [vmem:[%s4808_s13 + $0x78] sm:$0xff]  ;;  %v283_v16 = vld [vmem:[%s4808_s13 + $0x80] sm:$0xff] }
  0x2b   : > { %314 = vst.msk [vmem:[%s4825_s11 + $0x70] sm:$0xff] %vm299_vm0, %v281_v14  ;;  %v284_v17 = vld [vmem:[%s4808_s13 + $0x88] sm:$0xff]  ;;  %315 = vst.msk [vmem:[%s4825_s11 + $0x78] sm:$0xff] %vm299_vm0, %v282_v15  ;;  %v285_v18 = vld [vmem:[%s4808_s13 + $0x90] sm:$0xff] }
  0x2c   : > { %316 = vst.msk [vmem:[%s4825_s11 + $0x80] sm:$0xff] %vm299_vm0, %v283_v16  ;;  %317 = vst.msk [vmem:[%s4825_s11 + $0x88] sm:$0xff] %vm299_vm0, %v284_v17  ;;  %v286_v19 = vld [vmem:[%s4808_s13 + $0x98] sm:$0xff]  ;;  %v287_v20 = vld [vmem:[%s4808_s13 + $0xa0] sm:$0xff] }
  0x2d   : > { %318 = vst.msk [vmem:[%s4825_s11 + $0x90] sm:$0xff] %vm299_vm0, %v285_v18  ;;  %319 = vst.msk [vmem:[%s4825_s11 + $0x98] sm:$0xff] %vm299_vm0, %v286_v19  ;;  %v288_v21 = vld [vmem:[%s4808_s13 + $0xa8] sm:$0xff]  ;;  %v289_v22 = vld [vmem:[%s4808_s13 + $0xb0] sm:$0xff] }
  0x2e   : > { %320 = vst.msk [vmem:[%s4825_s11 + $0xa0] sm:$0xff] %vm299_vm0, %v287_v20  ;;  %v290_v23 = vld [vmem:[%s4808_s13 + $0xb8] sm:$0xff]  ;;  %321 = vst.msk [vmem:[%s4825_s11 + $0xa8] sm:$0xff] %vm299_vm0, %v288_v21  ;;  %v291_v24 = vld [vmem:[%s4808_s13 + $0xc0] sm:$0xff] }
  0x2f   : > { %322 = vst.msk [vmem:[%s4825_s11 + $0xb0] sm:$0xff] %vm299_vm0, %v289_v22  ;;  %323 = vst.msk [vmem:[%s4825_s11 + $0xb8] sm:$0xff] %vm299_vm0, %v290_v23  ;;  %v292_v25 = vld [vmem:[%s4808_s13 + $0xc8] sm:$0xff]  ;;  %v293_v26 = vld [vmem:[%s4808_s13 + $0xd0] sm:$0xff] }
  0x30   : > { %324 = vst.msk [vmem:[%s4825_s11 + $0xc0] sm:$0xff] %vm299_vm0, %v291_v24  ;;  %325 = vst.msk [vmem:[%s4825_s11 + $0xc8] sm:$0xff] %vm299_vm0, %v292_v25  ;;  %v294_v27 = vld [vmem:[%s4808_s13 + $0xd8] sm:$0xff]  ;;  %v295_v28 = vld [vmem:[%s4808_s13 + $0xe0] sm:$0xff] }
  0x31   : > { %326 = vst.msk [vmem:[%s4825_s11 + $0xd0] sm:$0xff] %vm299_vm0, %v293_v26  ;;  %v296_v29 = vld [vmem:[%s4808_s13 + $0xe8] sm:$0xff]  ;;  %327 = vst.msk [vmem:[%s4825_s11 + $0xd8] sm:$0xff] %vm299_vm0, %v294_v27  ;;  %v297_v30 = vld [vmem:[%s4808_s13 + $0xf0] sm:$0xff] }
  0x32   : > { %328 = vst.msk [vmem:[%s4825_s11 + $0xe0] sm:$0xff] %vm299_vm0, %v295_v28  ;;  %329 = vst.msk [vmem:[%s4825_s11 + $0xe8] sm:$0xff] %vm299_vm0, %v296_v29  ;;  %v298_v31 = vld [vmem:[%s4808_s13 + $0xf8] sm:$0xff] }
  0x33   : > { %330 = vst.msk [vmem:[%s4825_s11 + $0xf0] sm:$0xff] %vm299_vm0, %v297_v30  ;;  %331 = vst.msk [vmem:[%s4825_s11 + $0xf8] sm:$0xff] %vm299_vm0, %v298_v31 }
  0x34 PF: > { %v336_v32 = vld [vmem:[%s4825_s11 + $0x20] sm:$0xff]  ;;  %v337_v33 = vld [vmem:[%s4825_s11 + $0x28] sm:$0xff]  ;;  %v334_v35 = vld [vmem:[%s4825_s11 + $0x10] sm:$0xff]  ;;  %vm572_vm1 = vcmask 1040384   ;;  %vm573_vm2 = vsmask.f32 256 }
  0x35   : > { %v366_v34 = vpack.c.bf16 %v337_v33, %v336_v32  ;;  %v335_v36 = vld [vmem:[%s4825_s11 + $0x18] sm:$0xff]  ;;  %v332_v38 = vld [vmem:[%s4825_s11] sm:$0xff]  ;;  %v333_v39 = vld [vmem:[%s4825_s11 + $0x8] sm:$0xff]  ;;  %v7615_v50 = vmov 0  ;;  %vm818_vm4 = vcmask 1046528   ;;  %s4698_s18 = smov 64  }
  0x36   : > { %v365_v37 = vpack.c.bf16 %v335_v36, %v334_v35  ;;  %v364_v42 = vpack.c.bf16 %v333_v39, %v332_v38  ;;  %v338_v43 = vld [vmem:[%s4825_s11 + $0x30] sm:$0xff]  ;;  %v339_v44 = vld [vmem:[%s4825_s11 + $0x38] sm:$0xff]  ;;  %vm4933_vm3 = vmand %vm572_vm1, %vm573_vm2  ;;  %vm1065_vm5 = vcmask 261120   ;;  %vm607_vm6 = vsmask.f32 7424  ;;  %s4699_s20 = smov 96  }
  0x37   : > { %v387_v40 = vshrl.u32 %v366_v34, 16  ;;  %v453_v41 = vshll.u32 %v366_v34, 16  ;;  %v7616_v50 = vsel %vm4933_vm3, 4294967295, %v7615_v50  ;;  %v4937_v53 = vpack.c.bf16 %v339_v44, %v338_v43  ;;  %v4530_v63 = vld [vmem:[%s4813_s30 + $0x78] sm:$0xff]   ;;  %v4532_v8 = vld [vmem:[%s4813_s30 + $0x70] sm:$0xff]   ;;  %v340_v18 = vld [vmem:[%s4825_s11 + $0x40] sm:$0xff] }
  0x38   : > { %v384_v45 = vshrl.u32 %v365_v37, 16  ;;  %v449_v46 = vshll.u32 %v365_v37, 16  ;;  %v381_v48 = vshrl.u32 %v364_v42, 16  ;;  %v445_v49 = vshll.u32 %v364_v42, 16  ;;  %7617 = vst [vmem:[#allocation9_spill] sm:$0xff] %v7616_v50  ;;  %v4531_v3 = vld [vmem:[%s4813_s30 + $0x38] sm:$0xff]   ;;  %4117 = vmatprep.subr.bf16.mxu0 %v4530_v63 }
  0x39   : > { %v452_v47 = vrot.slane %v387_v40, 7  ;;  %v390_v2 = vshrl.u32 %v4937_v53, 16  ;;  %v542_v12 = vrot.slane %v453_v41, 7  ;;  %4118 = vmatpush3.bf16.msra.mxu0 %v4531_v3  ;;  %v457_v15 = vshll.u32 %v4937_v53, 16  ;;  %v4533_v16 = vld [vmem:[%s4813_s30 + $0x30] sm:$0xff]   ;;  %v341_v19 = vld [vmem:[%s4825_s11 + $0x48] sm:$0xff] }
  0x3a   : > { %v448_v51 = vrot.slane %v384_v45, 7  ;;  %v541_v52 = vrot.slane %v449_v46, 7  ;;  %v444_v55 = vrot.slane %v381_v48, 7  ;;  %v540_v56 = vrot.slane %v445_v49, 7  ;;  %4119 = vmatprep.subr.bf16.mxu0 %v4532_v8  ;;  %v4534_v20 = vld [vmem:[%s4813_s30 + $0x68] sm:$0xff]   ;;  %s4700_s21 = smov 32  }
  0x3b   : > { %v455_v54 = vor.u32 %v453_v41, %v452_v47  ;;  %v456_v24 = vrot.slane %v390_v2, 7  ;;  %v593_v27 = vsel %vm4933_vm3, %v452_v47, %v542_v12  ;;  %v4535_v29 = vld [vmem:[%s4813_s30 + $0x28] sm:$0xff]   ;;  %v4536_v30 = vld [vmem:[%s4813_s30 + $0x60] sm:$0xff]   ;;  %v368_v32 = vpack.c.bf16 %v341_v19, %v340_v18  ;;  %v4538_v43 = vld [vmem:[%s4813_s30 + $0x58] sm:$0xff]   ;;  %s4116_s25 = sshll.u32 %s4684_s19, 12  ;;  %s3883_s26 = sshll.u32 %s4825_s11, 4  ;;  %s7507_s26 = int_to_ptr.vmem [resolvable:$true] %s3883_s26 }
  0x3c   : > { %v451_v57 = vor.u32 %v449_v46, %v448_v51  ;;  %v592_v58 = vsel %vm4933_vm3, %v448_v51, %v541_v52  ;;  %v447_v60 = vor.u32 %v445_v49, %v444_v55  ;;  %v591_v61 = vsel %vm4933_vm3, %v444_v55, %v540_v56  ;;  %v342_v44 = vld [vmem:[%s4825_s11 + $0x50] sm:$0xff]  ;;  %v343_v49 = vld [vmem:[%s4825_s11 + $0x58] sm:$0xff]  ;;  %v4542_v3 = vld [vmem:[%s4813_s30 + $0x48] sm:$0xff]   ;;  %s7503_s9 = scalar_lea.hbm %s7590_s4, %s4116_s25  ;;  %s7641_s19 = sand.u32 1, %s4672_s16  }
  0x3d   : > { %v4943_v59 = vsel %vm4933_vm3, %v387_v40, %v455_v54  ;;  %v820_v62 = vrot.slane %v592_v58, 1  ;;  %v823_v1 = vrot.slane %v591_v61, 1  ;;  %v616_v7 = vshll.u32 %v592_v58, 16  ;;  %4120 = vmatpush3.bf16.msra.mxu0 %v4533_v16  ;;  %v4537_v40 = vld [vmem:[%s4813_s30 + $0x20] sm:$0xff]   ;;  %v4539_v51 = vld [vmem:[%s4813_s30 + $0x18] sm:$0xff]   ;;  %v4540_v55 = vld [vmem:[%s4813_s30 + $0x50] sm:$0xff]  }
  0x3e   : > { %1007 = vrot.lane.b32.xlu0 %v4943_v59, %s4698_s18  ;;  %v4952_v0 = vsel %vm4933_vm3, %v384_v45, %v451_v57  ;;  %v4960_v4 = vsel %vm4933_vm3, %v381_v48, %v447_v60  ;;  %v628_v23 = vshll.u32 %v591_v61, 16  ;;  %v635_v28 = vshll.u32 %v4943_v59, 16  ;;  %4121 = vmatprep.subr.bf16.mxu0 %v4534_v20  ;;  %v346_v16 = vld [vmem:[%s4825_s11 + $0x70] sm:$0xff]  ;;  %v347_v20 = vld [vmem:[%s4825_s11 + $0x78] sm:$0xff]  ;;  %s7535_s10 = scalar_lea.sflag [#allocation3], %s7641_s19  ;;  %s4604_s12 = scalar_lea.vmem %s7507_s26, 4096 }
  0x3f   : > { %1005 = vrot.lane.b32.xlu1 %v4952_v0, %s4698_s18  ;;  %v819_v5 = vrot.slane %v4952_v0, 1  ;;  %v611_v6 = vshll.u32 %v4952_v0, 16  ;;  %v822_v9 = vrot.slane %v4960_v4, 1  ;;  %v609_v10 = vshrl.u32 %v4952_v0, 16  ;;  %p4605_p1 = scmp.ne.s32.totalorder %s7507_s26, %s4604_s12  ;;  %s4701_s13 = smov [#allocation2]  }
  0x40   : > { %v623_v11 = vshll.u32 %v4960_v4, 16  ;;  %v618_v21 = vrot.slane %v616_v7, 1  ;;  %v621_v22 = vshrl.u32 %v4960_v4, 16  ;;  %v459_v31 = vor.u32 %v457_v15, %v456_v24  ;;  %s4608_s14 = sshll.u32 %s4701_s13, 4  ;;  %s4609_s14 = int_to_ptr.vmem [resolvable:$false] %s4608_s14 }
  0x41   : > { %v821_v13 = vsel %vm818_vm4, %v819_v5, %v820_v62  ;;  %v613_v14 = vrot.slane %v611_v6, 1  ;;  %v824_v17 = vsel %vm818_vm4, %v822_v9, %v823_v1  ;;  %v630_v33 = vrot.slane %v628_v23, 1  ;;  %4122 = vmatpush3.bf16.msra.mxu0 %v4535_v29  ;;  %v4541_v1 = vld [vmem:[%s4813_s30 + $0x10] sm:$0xff]   ;;  %v4544_v5 = vld [vmem:[%s4813_s30 + $0x88] sm:$0xff]   ;;  %p4606_p2 = pnand %p4605_p1, %p4778_p3  ;;  %s4610_s23 = scalar_lea.vmem %s4609_s14, 8192 }
  0x42   : > { %4381 = vmatprep.mubr.msk.bf16.mxu1 %vm1065_vm5, %v821_v13  ;;  %973 = vrot.lane.b32.xlu0 %v824_v17, %s4700_s21  ;;  %v625_v26 = vrot.slane %v623_v11, 1  ;;  %v633_v34 = vshrl.u32 %v4943_v59, 16  ;;  %v640_v35 = vshll.u32 %v593_v27, 16  ;;  %v637_v38 = vrot.slane %v635_v28, 1  ;;  %v4543_v11 = vld [vmem:[%s4813_s30 + $0x8] sm:$0xff]   ;;  %p4611_p5 = scmp.lt.s32.totalorder %s7507_s26, %s4609_s14  ;;  %p4612_p6 = scmp.lt.s32.totalorder %s4610_s23, %s4604_s12 }
  0x43   : > { %941 = vrot.lane.b32.xlu1 %v4960_v4, %s4699_s20  ;;  %v614_v25 = vor.u32 %v613_v14, %v609_v10  ;;  %v543_v39 = vrot.slane %v457_v15, 7  ;;  %v4994_v41 = vsel %vm4933_vm3, %v390_v2, %v459_v31  ;;  %v393_v42 = vshrl.u32 %v368_v32, 16  ;;  %4123 = vmatprep.subr.bf16.mxu0 %v4536_v30  ;;  %v344_v10 = vld [vmem:[%s4825_s11 + $0x60] sm:$0xff]  ;;  %v345_v14 = vld [vmem:[%s4825_s11 + $0x68] sm:$0xff]  ;;  %p4607_p4 = pneg %p4606_p2 }
  0x44   : > { %v626_v37 = vor.u32 %v625_v26, %v621_v22  ;;  %v638_v46 = vor.u32 %v637_v38, %v633_v34  ;;  %v642_v47 = vrot.slane %v640_v35, 1  ;;  %v647_v48 = vshll.u32 %v4994_v41, 16  ;;  %4377 = vmatprep.subr.bf16.mxu1 %v4544_v5  ;;  %v4545_v15 = vld [vmem:[%s4813_s30 + $0x40] sm:$0xff]   ;;  %p4613_p7 = por %p4612_p6, %p4611_p5 }
  0x45   : > { %v4989_v36 = vsel %vm607_vm6, %v614_v25, %v618_v21  ;;  %4124 = vmatpush3.bf16.msra.mxu0 %v4537_v40  ;;  %v594_v52 = vsel %vm4933_vm3, %v456_v24, %v543_v39  ;;  %v460_v53 = vrot.slane %v393_v42, 7  ;;  %v461_v54 = vshll.u32 %v368_v32, 16  ;;  %4378 = vmatpush3.bf16.msra.mxu1 %v4544_v5  ;;  %v4546_v24 = vld [vmem:[%s4813_s30] sm:$0xff]   ;;  %v350_v39 = vld [vmem:[%s4825_s11 + $0x90] sm:$0xff]  ;;  %v351_v40 = vld [vmem:[%s4825_s11 + $0x98] sm:$0xff] }
  0x46   : > { %975 = vrot.lane.b32.xlu0 %v821_v13, %s4700_s21  ;;  %v5002_v45 = vsel %vm607_vm6, %v626_v37, %v630_v33  ;;  %4125 = vmatprep.subr.bf16.mxu0 %v4538_v43  ;;  %v825_v56 = vrot.slane %v4943_v59, 1  ;;  %v826_v57 = vrot.slane %v593_v27, 1  ;;  %v5015_v58 = vpack.c.bf16 %v343_v49, %v342_v44  ;;  %v4547_v25 = vld [vmem:[%s4813_s30 + $0x80] sm:$0xff]   ;;  %v349_v37 = vld [vmem:[%s4825_s11 + $0x88] sm:$0xff]  ;;  %p4614_p8 = pnand %p4613_p7, %p4607_p4 }
  0x47   : > { %911 = vrot.lane.b32.xlu1 %v821_v13, %s4698_s18  ;;  %v5018_v60 = vsel %vm607_vm6, %v638_v46, %v642_v47  ;;  %v645_v61 = vshrl.u32 %v4994_v41, 16  ;;  %v649_v62 = vrot.slane %v647_v48, 1  ;;  %v652_v63 = vshll.u32 %v594_v52, 16  ;;  %4379 = vmatprep.subr.bf16.mxu1 %v4547_v25  ;;  %v348_v34 = vld [vmem:[%s4825_s11 + $0x80] sm:$0xff] }
  0x48   : > { %v463_v2 = vor.u32 %v461_v54, %v460_v53  ;;  %v396_v6 = vshrl.u32 %v5015_v58, 16  ;;  %v827_v7 = vsel %vm818_vm4, %v825_v56, %v826_v57  ;;  %v544_v13 = vrot.slane %v461_v54, 7 }
  0x49   : > { %4126 = vmatpush3.bf16.msra.mxu0 %v4539_v51  ;;  %v650_v8 = vor.u32 %v649_v62, %v645_v61  ;;  %v654_v9 = vrot.slane %v652_v63, 1  ;;  %v465_v19 = vshll.u32 %v5015_v58, 16  ;;  %v828_v22 = vrot.slane %v4994_v41, 1  ;;  %4380 = vmatpush3.bf16.msra.mxu1 %v4547_v25  ;;  %v352_v63 = vld [vmem:[%s4825_s11 + $0xa0] sm:$0xff] }
  0x4a   : > { %881 = vrot.lane.b32.xlu0 %v4989_v36, %s4700_s21  ;;  %4127 = vmatprep.subr.bf16.mxu0 %v4540_v55  ;;  %v5034_v12 = vsel %vm4933_vm3, %v393_v42, %v463_v2  ;;  %v464_v18 = vrot.slane %v396_v6, 7  ;;  %v595_v26 = vsel %vm4933_vm3, %v460_v53, %v544_v13  ;;  %v370_v27 = vpack.c.bf16 %v345_v14, %v344_v10  ;;  %v355_v10 = vld [vmem:[%s4825_s11 + $0xb8] sm:$0xff] }
  0x4b   : > { %913 = vrot.lane.b32.xlu1 %v824_v17, %s4698_s18  ;;  %v829_v17 = vrot.slane %v594_v52, 1  ;;  %v5045_v21 = vsel %vm607_vm6, %v650_v8, %v654_v9  ;;  %v659_v23 = vshll.u32 %v5034_v12, 16  ;;  %v5057_v29 = vpack.c.bf16 %v347_v20, %v346_v16  ;;  %v354_v9 = vld [vmem:[%s4825_s11 + $0xb0] sm:$0xff] }
  0x4c   : > { %v467_v28 = vor.u32 %v465_v19, %v464_v18  ;;  %v657_v31 = vshrl.u32 %v5034_v12, 16  ;;  %v664_v33 = vshll.u32 %v595_v26, 16  ;;  %v399_v35 = vshrl.u32 %v370_v27, 16  ;;  %4382 = vmatmul.mubr.msk.bf16.vlgmr.msra.gmra.mxu1 %vm1065_vm5, %v827_v7 }
  0x4d   : > { %4128 = vmatpush3.bf16.msra.mxu0 %v4541_v1  ;;  %v5060_v30 = vsel %vm818_vm4, %v828_v22, %v829_v17  ;;  %v661_v32 = vrot.slane %v659_v23, 1  ;;  %v545_v38 = vrot.slane %v465_v19, 7  ;;  %v402_v43 = vshrl.u32 %v5057_v29, 16 }
  0x4e   : > { %1035 = vrot.lane.b32.xlu0 %v4989_v36, %s4699_s20  ;;  %4129 = vmatprep.subr.bf16.mxu0 %v4542_v3  ;;  %v5073_v42 = vsel %vm4933_vm3, %v396_v6, %v467_v28  ;;  %v666_v46 = vrot.slane %v664_v33, 1  ;;  %v832_v47 = vrot.slane %v595_v26, 1  ;;  %v468_v48 = vrot.slane %v399_v35, 7  ;;  %v353_v6 = vld [vmem:[%s4825_s11 + $0xa8] sm:$0xff] }
  0x4f   : > { %883 = vrot.lane.b32.xlu1 %v5002_v45, %s4700_s21  ;;  %v662_v44 = vor.u32 %v661_v32, %v657_v31  ;;  %v469_v49 = vshll.u32 %v370_v27, 16  ;;  %v5077_v51 = vpack.c.bf16 %v349_v37, %v348_v34  ;;  %4385 = vmatprep.mubr.msk.bf16.mxu1 %vm1065_vm5, %v5060_v30  ;;  %v831_v52 = vrot.slane %v5034_v12, 1 }
  0x50   : > { %v596_v53 = vsel %vm4933_vm3, %v464_v18, %v545_v38  ;;  %v671_v54 = vshll.u32 %v5073_v42, 16  ;;  %v5085_v55 = vpack.c.bf16 %v351_v40, %v350_v39  ;;  %v472_v56 = vrot.slane %v402_v43, 7 }
  0x51   : > { %4130 = vmatpush3.bf16.msra.mxu0 %v4543_v11  ;;  %v473_v57 = vshll.u32 %v5057_v29, 16  ;;  %v5092_v58 = vsel %vm607_vm6, %v662_v44, %v666_v46  ;;  %v834_v61 = vrot.slane %v5073_v42, 1  ;;  %v835_v62 = vrot.slane %v596_v53, 1  ;;  %v357_v44 = vld [vmem:[%s4825_s11 + $0xc8] sm:$0xff] }
  0x52   : > { %1037 = vrot.lane.b32.xlu0 %v5018_v60, %s4699_s20  ;;  %4131 = vmatprep.subr.bf16.mxu0 %v4545_v15  ;;  %v669_v1 = vshrl.u32 %v5073_v42, 16  ;;  %v676_v2 = vshll.u32 %v596_v53, 16  ;;  %v471_v3 = vor.u32 %v469_v49, %v468_v48  ;;  %v405_v5 = vshrl.u32 %v5077_v51, 16 }
  0x53   : > { %943 = vrot.lane.b32.xlu1 %v4952_v0, %s4699_s20  ;;  %v546_v8 = vrot.slane %v469_v49, 7  ;;  %v5107_v11 = vsel %vm818_vm4, %v831_v52, %v832_v47  ;;  %v673_v13 = vrot.slane %v671_v54, 1  ;;  %v475_v14 = vor.u32 %v473_v57, %v472_v56  ;;  %v358_v54 = vld [vmem:[%s4825_s11 + $0xd0] sm:$0xff] }
  0x54   : > { %v547_v15 = vrot.slane %v473_v57, 7  ;;  %v5110_v16 = vsel %vm818_vm4, %v834_v61, %v835_v62  ;;  %4386 = vmatmul.mubr.msk.bf16.gmra.mxu1 %vm1065_vm5, %v5107_v11  ;;  %v5116_v17 = vsel %vm4933_vm3, %v399_v35, %v471_v3  ;;  %v476_v18 = vrot.slane %v405_v5, 7  ;;  %v356_v35 = vld [vmem:[%s4825_s11 + $0xc0] sm:$0xff] }
  0x55   : > { %4132 = vmatpush3.bf16.msra.mxu0 %v4546_v24  ;;  %v477_v19 = vshll.u32 %v5077_v51, 16  ;;  %v5119_v20 = vpack.c.bf16 %v353_v6, %v352_v63  ;;  %4389 = vmatprep.mubr.msk.bf16.mxu1 %vm1065_vm5, %v5110_v16  ;;  %v5125_v22 = vsel %vm4933_vm3, %v468_v48, %v546_v8  ;;  %v837_v23 = vrot.slane %v5116_v17, 1 }
  0x56   : > { %977 = vrot.lane.b32.xlu0 %v827_v7, %s4700_s21  ;;  %v481_v25 = vshll.u32 %v5085_v55, 16  ;;  %v838_v26 = vrot.slane %v5125_v22, 1  ;;  %v5136_v27 = vsel %vm4933_vm3, %v402_v43, %v475_v14  ;;  %v5140_v28 = vsel %vm4933_vm3, %v472_v56, %v547_v15 }
  0x57   : > { %1009 = vrot.lane.b32.xlu1 %v4994_v41, %s4698_s18  ;;  %v5142_v29 = vpack.c.bf16 %v355_v10, %v354_v9  ;;  %v674_v31 = vor.u32 %v673_v13, %v669_v1  ;;  %v678_v32 = vrot.slane %v676_v2, 1  ;;  %v840_v33 = vrot.slane %v5136_v27, 1 }
  0x58   : > { %v841_v34 = vrot.slane %v5140_v28, 1  ;;  %v479_v37 = vor.u32 %v477_v19, %v476_v18  ;;  %v548_v38 = vrot.slane %v477_v19, 7  ;;  %v411_v39 = vshrl.u32 %v5119_v20, 16 }
  0x59   : > { %v681_v40 = vshrl.u32 %v5116_v17, 16  ;;  %v5155_v46 = vsel %vm818_vm4, %v837_v23, %v838_v26  ;;  %v549_v47 = vrot.slane %v481_v25, 7  ;;  %v414_v48 = vshrl.u32 %v5142_v29, 16  ;;  %v360_v23 = vld [vmem:[%s4825_s11 + $0xe0] sm:$0xff] }
  0x5a   : > { %1039 = vrot.lane.b32.xlu0 %v5045_v21, %s4699_s20  ;;  %v5159_v49 = vsel %vm607_vm6, %v674_v31, %v678_v32  ;;  %v683_v51 = vshll.u32 %v5116_v17, 16  ;;  %v5163_v52 = vsel %vm818_vm4, %v840_v33, %v841_v34  ;;  %v485_v53 = vshll.u32 %v5119_v20, 16  ;;  %v362_v31 = vld [vmem:[%s4825_s11 + $0xf0] sm:$0xff]  ;;  %v363_v32 = vld [vmem:[%s4825_s11 + $0xf8] sm:$0xff] }
  0x5b   : > { %945 = vrot.lane.b32.xlu1 %v4943_v59, %s4699_s20  ;;  %v5176_v56 = vsel %vm4933_vm3, %v476_v18, %v548_v38  ;;  %v484_v57 = vrot.slane %v411_v39, 7  ;;  %v5178_v61 = vpack.c.bf16 %v357_v44, %v356_v35  ;;  %v488_v3 = vrot.slane %v414_v48, 7 }
  0x5c   : > { %4390 = vmatmul.mubr.msk.bf16.gmra.mxu1 %vm1065_vm5, %v5155_v46  ;;  %v844_v63 = vrot.slane %v5176_v56, 1  ;;  %v685_v8 = vrot.slane %v683_v51, 1  ;;  %v550_v14 = vrot.slane %v485_v53, 7  ;;  %vm1096_vm7 = vcmask 523264  }
  0x5d   : > { %4393 = vmatprep.mubr.msk.bf16.mxu1 %vm1065_vm5, %v5163_v52  ;;  %v487_v13 = vor.u32 %v485_v53, %v484_v57  ;;  %v417_v15 = vshrl.u32 %v5178_v61, 16  ;;  %v379_v53 = vpack.c.bf16 %v363_v32, %v362_v31  ;;  %vm1127_vm8 = vcmask 785408  }
  0x5e   : > { %979 = vrot.lane.b32.xlu0 %v5060_v30, %s4700_s21  ;;  %v5226_v34 = vsel %vm4933_vm3, %v484_v57, %v550_v14 }
  0x5f   : > { %885 = vrot.lane.b32.xlu1 %v5018_v60, %s4700_s21  ;;  %v5222_v33 = vsel %vm4933_vm3, %v411_v39, %v487_v13  ;;  %v492_v35 = vrot.slane %v417_v15, 7 }
  0x60   : > { %v849_v38 = vrot.slane %v5222_v33, 1 }
  0x62   : > { %1011 = vrot.lane.b32.xlu0 %v5034_v12, %s4698_s18 }
  0x63   : > { %915 = vrot.lane.b32.xlu1 %v827_v7, %s4698_s18  ;;  %v408_v7 = vshrl.u32 %v5085_v55, 16  ;;  %v359_v55 = vld [vmem:[%s4825_s11 + $0xd8] sm:$0xff] }
  0x64   : > { %v5197_v6 = vpack.c.bf16 %v359_v55, %v358_v54  ;;  %v695_v55 = vshll.u32 %v5136_v27, 16 }
  0x65   : > { %v480_v24 = vrot.slane %v408_v7, 7 }
  0x66   : > { %1041 = vrot.lane.b32.xlu0 %v5092_v58, %s4699_s20 }
  0x67   : > { %947 = vrot.lane.b32.xlu1 %v4994_v41, %s4699_s20  ;;  %v483_v43 = vor.u32 %v481_v25, %v480_v24  ;;  %v5194_v2 = vsel %vm4933_vm3, %v480_v24, %v549_v47  ;;  %v361_v24 = vld [vmem:[%s4825_s11 + $0xe8] sm:$0xff]  ;;  %v686_v25 = vor.u32 %v685_v8, %v681_v40  ;;  %v850_v40 = vrot.slane %v5226_v34, 1 }
  0x68   : > { %v847_v10 = vrot.slane %v5194_v2, 1  ;;  %v378_v44 = vpack.c.bf16 %v361_v24, %v360_v23  ;;  %v693_v8 = vshrl.u32 %v5136_v27, 16 }
  0x69   : > { %v5186_v1 = vsel %vm4933_vm3, %v408_v7, %v483_v43  ;;  %v688_v7 = vshll.u32 %v5125_v22, 16  ;;  %v420_v22 = vshrl.u32 %v5197_v6, 16  ;;  %v497_v43 = vshll.u32 %v5197_v6, 16 }
  0x6a   : > { %981 = vrot.lane.b32.xlu0 %v5107_v11, %s4700_s21  ;;  %v846_v9 = vrot.slane %v5186_v1, 1  ;;  %v426_v6 = vshrl.u32 %v379_v53, 16  ;;  %v501_v23 = vshll.u32 %v378_v44, 16 }
  0x6b   : > { %887 = vrot.lane.b32.xlu1 %v5045_v21, %s4700_s21  ;;  %v690_v26 = vrot.slane %v688_v7, 1  ;;  %v496_v51 = vrot.slane %v420_v22, 7  ;;  %v697_v7 = vrot.slane %v695_v55, 1 }
  0x6d   : > { %v5247_v54 = vsel %vm607_vm6, %v686_v25, %v690_v26  ;;  %v504_v25 = vrot.slane %v426_v6, 7  ;;  %v505_v26 = vshll.u32 %v379_v53, 16  ;;  %v698_v31 = vor.u32 %v697_v7, %v693_v8 }
  0x6e   : > { %1013 = vrot.lane.b32.xlu0 %v5073_v42, %s4698_s18 }
  0x6f   : > { %917 = vrot.lane.b32.xlu1 %v5060_v30, %s4698_s18  ;;  %v5172_v30 = vsel %vm4933_vm3, %v405_v5, %v479_v37  ;;  %v489_v5 = vshll.u32 %v5142_v29, 16  ;;  %v5214_v29 = vsel %vm818_vm4, %v846_v9, %v847_v10  ;;  %v493_v37 = vshll.u32 %v5178_v61, 16 }
  0x70   : > { %v843_v62 = vrot.slane %v5172_v30, 1  ;;  %v700_v9 = vshll.u32 %v5140_v28, 16  ;;  %v707_v53 = vshll.u32 %v5172_v30, 16 }
  0x71   : > { %v491_v19 = vor.u32 %v489_v5, %v488_v3  ;;  %v551_v20 = vrot.slane %v489_v5, 7  ;;  %v553_v5 = vrot.slane %v497_v43, 7 }
  0x72   : > { %1043 = vrot.lane.b32.xlu0 %v5159_v49, %s4699_s20  ;;  %v5208_v18 = vsel %vm818_vm4, %v843_v62, %v844_v63  ;;  %v552_v62 = vrot.slane %v493_v37, 7  ;;  %v423_v63 = vshrl.u32 %v378_v44, 16  ;;  %v702_v32 = vrot.slane %v700_v9, 1 }
  0x73   : > { %949 = vrot.lane.b32.xlu1 %v5034_v12, %s4699_s20  ;;  %4394 = vmatmul.mubr.msk.bf16.gmra.mxu1 %vm1065_vm5, %v5208_v18  ;;  %v5240_v39 = vsel %vm4933_vm3, %v414_v48, %v491_v19  ;;  %v5244_v47 = vsel %vm4933_vm3, %v488_v3, %v551_v20  ;;  %v5257_v48 = vsel %vm818_vm4, %v849_v38, %v850_v40  ;;  %v554_v40 = vrot.slane %v501_v23, 7 }
  0x74   : > { %4397 = vmatprep.mubr.msk.bf16.mxu1 %vm1065_vm5, %v5214_v29  ;;  %v852_v57 = vrot.slane %v5240_v39, 1  ;;  %v853_v61 = vrot.slane %v5244_v47, 1  ;;  %v499_v3 = vor.u32 %v497_v43, %v496_v51  ;;  %v5272_v14 = vsel %vm4933_vm3, %v492_v35, %v552_v62 }
  0x75   : > { %v856_v28 = vrot.slane %v5272_v14, 1  ;;  %v500_v20 = vrot.slane %v423_v63, 7  ;;  %v5288_v24 = vsel %vm4933_vm3, %v496_v51, %v553_v5  ;;  %v507_v43 = vor.u32 %v505_v26, %v504_v25 }
  0x76   : > { %983 = vrot.lane.b32.xlu0 %v5110_v16, %s4700_s21  ;;  %v5262_v10 = vsel %vm818_vm4, %v852_v57, %v853_v61  ;;  %v555_v44 = vrot.slane %v505_v26, 7  ;;  %v5300_v51 = vsel %vm607_vm6, %v698_v31, %v702_v32  ;;  %v709_v5 = vrot.slane %v707_v53, 1 }
  0x77   : > { %889 = vrot.lane.b32.xlu1 %v5092_v58, %s4700_s21  ;;  %v503_v38 = vor.u32 %v501_v23, %v500_v20  ;;  %v5317_v61 = vsel %vm4933_vm3, %v500_v20, %v554_v40  ;;  %v719_v23 = vshll.u32 %v5186_v1, 16  ;;  %v724_v31 = vshll.u32 %v5194_v2, 16 }
  0x78   : > { %v862_v62 = vrot.slane %v5317_v61, 1  ;;  %v731_v2 = vshll.u32 %v5222_v33, 16  ;;  %v736_v40 = vshll.u32 %v5226_v34, 16  ;;  %v743_v53 = vshll.u32 %v5240_v39, 16 }
  0x79   : > { %v5313_v57 = vsel %vm4933_vm3, %v423_v63, %v503_v38  ;;  %v5331_v63 = vsel %vm4933_vm3, %v504_v25, %v555_v44  ;;  %v717_v25 = vshrl.u32 %v5186_v1, 16  ;;  %v721_v26 = vrot.slane %v719_v23, 1 }
  0x7a   : > { %1015 = vrot.lane.b32.xlu0 %v5116_v17, %s4698_s18  ;;  %v879_v7 = vrot.slane %v5331_v63, 1  ;;  %v726_v32 = vrot.slane %v724_v31, 1  ;;  %v733_v38 = vrot.slane %v731_v2, 1  ;;  %v760_v31 = vshll.u32 %v5272_v14, 16 }
  0x7b   : > { %919 = vrot.lane.b32.xlu1 %v5107_v11, %s4698_s18  ;;  %v495_v11 = vor.u32 %v493_v37, %v492_v35  ;;  %4398 = vmatmul.mubr.msk.bf16.gmra.mxu1 %vm1065_vm5, %v5257_v48  ;;  %v859_v37 = vrot.slane %v5288_v24, 1 }
  0x7c   : > { %4401 = vmatprep.mubr.msk.bf16.mxu1 %vm1065_vm5, %v5262_v10 }
  0x7d   : > { %v5268_v13 = vsel %vm4933_vm3, %v417_v15, %v495_v11  ;;  %v5284_v15 = vsel %vm4933_vm3, %v420_v22, %v499_v3  ;;  %v861_v11 = vrot.slane %v5313_v57, 1  ;;  %v705_v3 = vshrl.u32 %v5172_v30, 16 }
  0x7e   : > { %1045 = vrot.lane.b32.xlu0 %v5247_v54, %s4699_s20  ;;  %v855_v19 = vrot.slane %v5268_v13, 1  ;;  %v858_v35 = vrot.slane %v5284_v15, 1 }
  0x7f   : > { %951 = vrot.lane.b32.xlu1 %v5073_v42, %s4699_s20  ;;  %v710_v9 = vor.u32 %v709_v5, %v705_v3 }
  0x80   : > { %v5297_v22 = vsel %vm818_vm4, %v855_v19, %v856_v28  ;;  %v5304_v55 = vsel %vm818_vm4, %v858_v35, %v859_v37  ;;  %v729_v37 = vshrl.u32 %v5222_v33, 16 }
  0x82   : > { %985 = vrot.lane.b32.xlu0 %v5155_v46, %s4700_s21 }
  0x83   : > { %891 = vrot.lane.b32.xlu1 %v5159_v49, %s4700_s21  ;;  %4402 = vmatmul.mubr.msk.bf16.gmra.mxu1 %vm1065_vm5, %v5297_v22 }
  0x84   : > { %4405 = vmatprep.mubr.msk.bf16.mxu1 %vm1065_vm5, %v5304_v55 }
  0x86   : > { %1017 = vrot.lane.b32.xlu0 %v5136_v27, %s4698_s18 }
  0x87   : > { %921 = vrot.lane.b32.xlu1 %v5110_v16, %s4698_s18  ;;  %v712_v16 = vshll.u32 %v5176_v56, 16  ;;  %v5327_v56 = vsel %vm4933_vm3, %v426_v6, %v507_v43  ;;  %v5341_v6 = vsel %vm818_vm4, %v861_v11, %v862_v62  ;;  %v738_v43 = vrot.slane %v736_v40, 1 }
  0x88   : > { %v878_v8 = vrot.slane %v5327_v56, 1  ;;  %v745_v11 = vrot.slane %v743_v53, 1  ;;  %v748_v62 = vshll.u32 %v5244_v47, 16  ;;  %v755_v47 = vshll.u32 %v5268_v13, 16 }
  0x89   : > { %v714_v19 = vrot.slane %v712_v16, 1  ;;  %v741_v16 = vshrl.u32 %v5240_v39, 16 }
  0x8a   : > { %1047 = vrot.lane.b32.xlu0 %v5300_v51, %s4699_s20  ;;  %v5344_v28 = vsel %vm818_vm4, %v878_v8, %v879_v7  ;;  %v750_v5 = vrot.slane %v748_v62, 1 }
  0x8b   : > { %953 = vrot.lane.b32.xlu1 %v5116_v17, %s4699_s20  ;;  %4406 = vmatmul.mubr.msk.bf16.gmra.mxu1 %vm1065_vm5, %v5341_v6  ;;  %v5355_v20 = vsel %vm607_vm6, %v710_v9, %v714_v19 }
  0x8c   : > { %4409 = vmatprep.mubr.msk.bf16.mxu1 %vm1065_vm5, %v5344_v28 }
  0x8e   : > { %987 = vrot.lane.b32.xlu0 %v5163_v52, %s4700_s21 }
  0x8f   : > { %893 = vrot.lane.b32.xlu1 %v5247_v54, %s4700_s21 }
  0x92   : > { %1019 = vrot.lane.b32.xlu0 %v5172_v30, %s4698_s18 }
  0x93   : > { %923 = vrot.lane.b32.xlu1 %v5155_v46, %s4698_s18  ;;  %4410 = vmatmul.mubr.msk.bf16.gmra.mxu1 %vm1065_vm5, %v5341_v6  ;;  %v722_v46 = vor.u32 %v721_v26, %v717_v25  ;;  %v753_v25 = vshrl.u32 %v5268_v13, 16  ;;  %v757_v26 = vrot.slane %v755_v47, 1 }
  0x95   : > { %v5375_v35 = vsel %vm607_vm6, %v722_v46, %v726_v32 }
  0x96   : > { %1049 = vrot.lane.b32.xlu0 %v5355_v20, %s4699_s20 }
  0x97   : > { %955 = vrot.lane.b32.xlu1 %v5136_v27, %s4699_s20 }
  0x9a   : > { %989 = vrot.lane.b32.xlu0 %v5208_v18, %s4700_s21 }
  0x9b   : > { %895 = vrot.lane.b32.xlu1 %v5300_v51, %s4700_s21 }
  0x9e   : > { %1021 = vrot.lane.b32.xlu0 %v5186_v1, %s4698_s18 }
  0x9f   : > { %925 = vrot.lane.b32.xlu1 %v5163_v52, %s4698_s18  ;;  %v734_v52 = vor.u32 %v733_v38, %v729_v37  ;;  %v758_v37 = vor.u32 %v757_v26, %v753_v25  ;;  %v762_v38 = vrot.slane %v760_v31, 1 }
  0xa1   : > { %v5393_v44 = vsel %vm607_vm6, %v734_v52, %v738_v43 }
  0xa2   : > { %1051 = vrot.lane.b32.xlu0 %v5375_v35, %s4699_s20 }
  0xa3   : > { %957 = vrot.lane.b32.xlu1 %v5172_v30, %s4699_s20 }
  0xa6   : > { %991 = vrot.lane.b32.xlu0 %v5214_v29, %s4700_s21 }
  0xa7   : > { %897 = vrot.lane.b32.xlu1 %v5355_v20, %s4700_s21 }
  0xaa   : > { %1023 = vrot.lane.b32.xlu0 %v5222_v33, %s4698_s18 }
  0xab   : > { %927 = vrot.lane.b32.xlu1 %v5208_v18, %s4698_s18  ;;  %v746_v18 = vor.u32 %v745_v11, %v741_v16  ;;  %v5439_v16 = vsel %vm607_vm6, %v758_v37, %v762_v38  ;;  %v767_v11 = vshll.u32 %v5284_v15, 16 }
  0xad   : > { %v5411_v9 = vsel %vm607_vm6, %v746_v18, %v750_v5  ;;  %v765_v5 = vshrl.u32 %v5284_v15, 16 }
  0xae   : > { %1053 = vrot.lane.b32.xlu0 %v5393_v44, %s4699_s20 }
  0xaf   : > { %959 = vrot.lane.b32.xlu1 %v5186_v1, %s4699_s20 }
  0xb0   : > { %v1008_v34 = vpop.permute.xlu0 %1007 }
  0xb1   : > { %v1006_v3 = vpop.permute.xlu1 %1005 }
  0xb2   : > { %993 = vrot.lane.b32.xlu0 %v5257_v48, %s4700_s21 }
  0xb3   : > { %899 = vrot.lane.b32.xlu1 %v5375_v35, %s4700_s21 }
  0xb4   : > { %v974_v7 = vpop.permute.xlu0 %973 }
  0xb5   : > { %v942_v8 = vpop.permute.xlu1 %941  ;;  %v1178_v32 = vsel %vm1065_vm5, %v5002_v45, %v974_v7  ;;  %v772_v7 = vshll.u32 %v5288_v24, 16 }
  0xb6   : > { %1025 = vrot.lane.b32.xlu0 %v5240_v39, %s4698_s18  ;;  %v1225_v14 = vsel %vm1096_vm7, %v1178_v32, %v1006_v3 }
  0xb7   : > { %929 = vrot.lane.b32.xlu1 %v5214_v29, %s4698_s18  ;;  %v774_v26 = vrot.slane %v772_v7, 1  ;;  %v865_v7 = vshrl.u32 %v5327_v56, 16 }
  0xb8   : > { %v976_v23 = vpop.permute.xlu0 %975 }
  0xb9   : > { %v912_v19 = vpop.permute.xlu1 %911  ;;  %v1181_v45 = vsel %vm1065_vm5, %v4989_v36, %v976_v23 }
  0xba   : > { %1055 = vrot.lane.b32.xlu0 %v5411_v9, %s4699_s20  ;;  %v1227_v36 = vsel %vm1096_vm7, %v1181_v45, %v1008_v34 }
  0xbb   : > { %961 = vrot.lane.b32.xlu1 %v5222_v33, %s4699_s20 }
  0xbc   : > { %v882_v29 = vpop.permute.xlu0 %881 }
  0xbd   : > { %v914_v46 = vpop.permute.xlu1 %913  ;;  %v1067_v2 = vsel %vm1065_vm5, %v4952_v0, %v882_v29 }
  0xbe   : > { %995 = vrot.lane.b32.xlu0 %v5262_v10, %s4700_s21  ;;  %v1098_v43 = vsel %vm1096_vm7, %v1067_v2, %v912_v19 }
  0xbf   : > { %901 = vrot.lane.b32.xlu1 %v5393_v44, %s4700_s21  ;;  %v1129_v53 = vsel %vm1127_vm8, %v1098_v43, %v942_v8  ;;  %v769_v8 = vrot.slane %v767_v11, 1 }
  0xc0   : > { %v1036_v40 = vpop.permute.xlu0 %1035 }
  0xc1   : > { %v884_v52 = vpop.permute.xlu1 %883  ;;  %v1256_v0 = vsel %vm1127_vm8, %v1225_v14, %v1036_v40  ;;  %v770_v25 = vor.u32 %v769_v8, %v765_v5  ;;  %v777_v40 = vshrl.u32 %v5313_v57, 16 }
  0xc2   : > { %1027 = vrot.lane.b32.xlu0 %v5268_v13, %s4698_s18  ;;  %1523 = vmatprep.mubr.bf16.mxu0 %v1256_v0 }
  0xc3   : > { %931 = vrot.lane.b32.xlu1 %v5257_v48, %s4698_s18  ;;  %1524 = vmatmul.mubr.bf16.vlgmr.msra.gmra.mxu0 %v1129_v53  ;;  %v1069_v48 = vsel %vm1065_vm5, %v4960_v4, %v884_v52 }
  0xc4   : > { %v1038_v62 = vpop.permute.xlu0 %1037  ;;  %v1100_v23 = vsel %vm1096_vm7, %v1069_v48, %v914_v46  ;;  %v779_v46 = vshll.u32 %v5313_v57, 16 }
  0xc5   : > { %v944_v3 = vpop.permute.xlu1 %943  ;;  %v1259_v18 = vsel %vm1127_vm8, %v1227_v36, %v1038_v62 }
  0xc6   : > { %1057 = vrot.lane.b32.xlu0 %v5439_v16, %s4699_s20  ;;  %1531 = vmatprep.mubr.bf16.mxu0 %v1259_v18  ;;  %v1132_v4 = vsel %vm1127_vm8, %v1100_v23, %v944_v3  ;;  %v781_v52 = vrot.slane %v779_v46, 1 }
  0xc7   : > { %963 = vrot.lane.b32.xlu1 %v5240_v39, %s4699_s20 }
  0xc8   : > { %v978_v47 = vpop.permute.xlu0 %977  ;;  %v782_v53 = vor.u32 %v781_v52, %v777_v40 }
  0xc9   : > { %v1010_v19 = vpop.permute.xlu1 %1009  ;;  %v1184_v34 = vsel %vm1065_vm5, %v5018_v60, %v978_v47  ;;  %v5467_v60 = vsel %vm607_vm6, %v770_v25, %v774_v26 }
  0xca   : > { %997 = vrot.lane.b32.xlu0 %v5297_v22, %s4700_s21  ;;  %v1229_v31 = vsel %vm1096_vm7, %v1184_v34, %v1010_v19 }
  0xcb   : > { %903 = vrot.lane.b32.xlu1 %v5411_v9, %s4700_s21  ;;  %1532 = vmatmul.mubr.bf16.gmra.mxu0 %v1132_v4 }
  0xcc   : > { %v1040_v24 = vpop.permute.xlu0 %1039 }
  0xcd   : > { %v946_v29 = vpop.permute.xlu1 %945  ;;  %v1262_v32 = vsel %vm1127_vm8, %v1229_v31, %v1040_v24 }
  0xce   : > { %1029 = vrot.lane.b32.xlu0 %v5284_v15, %s4698_s18  ;;  %1539 = vmatprep.mubr.bf16.mxu0 %v1262_v32  ;;  %v1135_v38 = vsel %vm1127_vm8, %v1098_v43, %v946_v29 }
  0xcf   : > { %933 = vrot.lane.b32.xlu1 %v5262_v10, %s4698_s18  ;;  %v784_v10 = vshll.u32 %v5317_v61, 16 }
  0xd0   : > { %v980_v2 = vpop.permute.xlu0 %979 }
  0xd1   : > { %v886_v37 = vpop.permute.xlu1 %885  ;;  %v1187_v0 = vsel %vm1065_vm5, %v5045_v21, %v980_v2  ;;  %v786_v11 = vrot.slane %v784_v10, 1  ;;  %v867_v21 = vshll.u32 %v5327_v56, 16 }
  0xd2   : > { %1059 = vrot.lane.b32.xlu0 %v5467_v60, %s4699_s20  ;;  %v1071_v43 = vsel %vm1065_vm5, %v4943_v59, %v886_v37 }
  0xd3   : > { %965 = vrot.lane.b32.xlu1 %v5268_v13, %s4699_s20  ;;  %1540 = vmatmul.mubr.bf16.gmra.mxu0 %v1135_v38  ;;  %v5494_v59 = vsel %vm607_vm6, %v782_v53, %v786_v11  ;;  %v869_v47 = vrot.slane %v867_v21, 1 }
  0xd4   : > { %v1012_v14 = vpop.permute.xlu0 %1011 }
  0xd5   : > { %v916_v45 = vpop.permute.xlu1 %915  ;;  %v1231_v62 = vsel %vm1096_vm7, %v1187_v0, %v1012_v14  ;;  %v870_v25 = vor.u32 %v869_v47, %v865_v7 }
  0xd6   : > { %999 = vrot.lane.b32.xlu0 %v5304_v55, %s4700_s21  ;;  %v1102_v61 = vsel %vm1096_vm7, %v1071_v43, %v916_v45 }
  0xd7   : > { %905 = vrot.lane.b32.xlu1 %v5439_v16, %s4700_s21 }
  0xd8   : > { %v1042_v3 = vpop.permute.xlu0 %1041 }
  0xd9   : > { %v948_v36 = vpop.permute.xlu1 %947  ;;  %v1265_v18 = vsel %vm1127_vm8, %v1231_v62, %v1042_v3 }
  0xda   : > { %v1138_v48 = vsel %vm1127_vm8, %v1102_v61, %v948_v36  ;;  %1031 = vrot.lane.b32.xlu0 %v5313_v57, %s4698_s18  ;;  %1547 = vmatprep.mubr.bf16.mxu0 %v1265_v18 }
  0xdb   : > { %935 = vrot.lane.b32.xlu1 %v5297_v22, %s4698_s18  ;;  %1548 = vmatmul.mubr.bf16.gmra.mxu0 %v1138_v48  ;;  %v872_v22 = vshll.u32 %v5331_v63, 16 }
  0xdc   : > { %v982_v5 = vpop.permute.xlu0 %981 }
  0xdd   : > { %v888_v8 = vpop.permute.xlu1 %887  ;;  %v1190_v23 = vsel %vm1065_vm5, %v5092_v58, %v982_v5  ;;  %v874_v26 = vrot.slane %v872_v22, 1 }
  0xde   : > { %1061 = vrot.lane.b32.xlu0 %v5494_v59, %s4699_s20  ;;  %v1073_v4 = vsel %vm1065_vm5, %v4994_v41, %v888_v8 }
  0xdf   : > { %967 = vrot.lane.b32.xlu1 %v5284_v15, %s4699_s20  ;;  %v5520_v41 = vsel %vm607_vm6, %v870_v25, %v874_v26 }
  0xe0   : > { %v1014_v19 = vpop.permute.xlu0 %1013 }
  0xe1   : > { %v918_v34 = vpop.permute.xlu1 %917  ;;  %v1233_v31 = vsel %vm1096_vm7, %v1190_v23, %v1014_v19 }
  0xe2   : > { %1001 = vrot.lane.b32.xlu0 %v5341_v6, %s4700_s21  ;;  %v1104_v63 = vsel %vm1096_vm7, %v1073_v4, %v918_v34 }
  0xe3   : > { %907 = vrot.lane.b32.xlu1 %v5467_v60, %s4700_s21 }
  0xe4   : > { %v1044_v24 = vpop.permute.xlu0 %1043 }
  0xe5   : > { %v950_v29 = vpop.permute.xlu1 %949  ;;  %v1268_v32 = vsel %vm1127_vm8, %v1233_v31, %v1044_v24 }
  0xe6   : > { %v1141_v46 = vsel %vm1127_vm8, %v1104_v63, %v950_v29  ;;  %1033 = vrot.lane.b32.xlu0 %v5327_v56, %s4698_s18  ;;  %1555 = vmatprep.mubr.bf16.mxu0 %v1268_v32 }
  0xe7   : > { %937 = vrot.lane.b32.xlu1 %v5304_v55, %s4698_s18  ;;  %1556 = vmatmul.mubr.bf16.gmra.mxu0 %v1141_v46 }
  0xe8   : > { %v984_v58 = vpop.permute.xlu0 %983 }
  0xe9   : > { %v890_v2 = vpop.permute.xlu1 %889  ;;  %v1193_v55 = vsel %vm1065_vm5, %v5159_v49, %v984_v58 }
  0xea   : > { %1063 = vrot.lane.b32.xlu0 %v5520_v41, %s4699_s20  ;;  %v1075_v40 = vsel %vm1065_vm5, %v5034_v12, %v890_v2 }
  0xeb   : > { %969 = vrot.lane.b32.xlu1 %v5313_v57, %s4699_s20 }
  0xec   : > { %v1016_v37 = vpop.permute.xlu0 %1015 }
  0xed   : > { %v920_v38 = vpop.permute.xlu1 %919  ;;  %v1235_v52 = vsel %vm1096_vm7, %v1193_v55, %v1016_v37 }
  0xee   : > { %1003 = vrot.lane.b32.xlu0 %v5344_v28, %s4700_s21  ;;  %v1106_v10 = vsel %vm1096_vm7, %v1075_v40, %v920_v38 }
  0xef   : > { %909 = vrot.lane.b32.xlu1 %v5494_v59, %s4700_s21 }
  0xf0   : > { %v1046_v14 = vpop.permute.xlu0 %1045 }
  0xf1   : > { %v952_v45 = vpop.permute.xlu1 %951  ;;  %v1271_v0 = vsel %vm1127_vm8, %v1235_v52, %v1046_v14 }
  0xf2   : > { %v1144_v43 = vsel %vm1127_vm8, %v1106_v10, %v952_v45  ;;  %939 = vrot.lane.b32.xlu0 %v5341_v6, %s4698_s18  ;;  %1563 = vmatprep.mubr.bf16.mxu0 %v1271_v0 }
  0xf3   : > { %971 = vrot.lane.b32.xlu1 %v5327_v56, %s4699_s20  ;;  %1564 = vmatmul.mubr.bf16.gmra.mxu0 %v1144_v43 }
  0xf4   : > { %v986_v49 = vpop.permute.xlu0 %985 }
  0xf5   : > { %v892_v12 = vpop.permute.xlu1 %891  ;;  %v1196_v11 = vsel %vm1065_vm5, %v5247_v54, %v986_v49 }
  0xf6   : > { %v1077_v62 = vsel %vm1065_vm5, %v5073_v42, %v892_v12 }
  0xf8   : > { %v1018_v28 = vpop.permute.xlu0 %1017 }
  0xf9   : > { %v922_v53 = vpop.permute.xlu1 %921  ;;  %v1237_v61 = vsel %vm1096_vm7, %v1196_v11, %v1018_v28 }
  0xfa   : > { %v1108_v3 = vsel %vm1096_vm7, %v1077_v62, %v922_v53 }
  0xfc   : > { %v1048_v6 = vpop.permute.xlu0 %1047 }
  0xfd   : > { %v954_v36 = vpop.permute.xlu1 %953  ;;  %v1274_v18 = vsel %vm1127_vm8, %v1237_v61, %v1048_v6 }
  0xfe   : > { %v1147_v56 = vsel %vm1127_vm8, %v1108_v3, %v954_v36  ;;  %1571 = vmatprep.mubr.bf16.mxu0 %v1274_v18 }
  0xff   : > { %1572 = vmatmul.mubr.bf16.gmra.mxu0 %v1147_v56 }
 0x100   : > { %v988_v48 = vpop.permute.xlu0 %987 }
 0x101   : > { %v894_v21 = vpop.permute.xlu1 %893  ;;  %v1199_v54 = vsel %vm1065_vm5, %v5300_v51, %v988_v48 }
 0x102   : > { %v1079_v42 = vsel %vm1065_vm5, %v5116_v17, %v894_v21 }
 0x104   : > { %v1020_v5 = vpop.permute.xlu0 %1019 }
 0x105   : > { %v924_v8 = vpop.permute.xlu1 %923  ;;  %v1239_v7 = vsel %vm1096_vm7, %v1199_v54, %v1020_v5 }
 0x106   : > { %v1110_v47 = vsel %vm1096_vm7, %v1079_v42, %v924_v8 }
 0x108   : > { %v1050_v22 = vpop.permute.xlu0 %1049 }
 0x109   : > { %v956_v19 = vpop.permute.xlu1 %955  ;;  %v1277_v34 = vsel %vm1127_vm8, %v1239_v7, %v1050_v22 }
 0x10a   : > { %v1150_v23 = vsel %vm1127_vm8, %v1110_v47, %v956_v19  ;;  %1579 = vmatprep.mubr.bf16.mxu0 %v1277_v34 }
 0x10b   : > { %1580 = vmatmul.mubr.bf16.gmra.mxu0 %v1150_v23 }
 0x10c   : > { %v990_v4 = vpop.permute.xlu0 %989 }
 0x10d   : > { %v896_v25 = vpop.permute.xlu1 %895  ;;  %v1202_v51 = vsel %vm1065_vm5, %v5355_v20, %v990_v4 }
 0x10e   : > { %v1081_v17 = vsel %vm1065_vm5, %v5136_v27, %v896_v25 }
 0x110   : > { %v1022_v26 = vpop.permute.xlu0 %1021 }
 0x111   : > { %v926_v31 = vpop.permute.xlu1 %925  ;;  %v1241_v63 = vsel %vm1096_vm7, %v1202_v51, %v1022_v26 }
 0x112   : > { %v1112_v24 = vsel %vm1096_vm7, %v1081_v17, %v926_v31 }
 0x114   : > { %v1052_v29 = vpop.permute.xlu0 %1051 }
 0x115   : > { %v958_v32 = vpop.permute.xlu1 %957  ;;  %v1280_v46 = vsel %vm1127_vm8, %v1241_v63, %v1052_v29 }
 0x116   : > { %v1153_v58 = vsel %vm1127_vm8, %v1112_v24, %v958_v32  ;;  %1587 = vmatprep.mubr.bf16.mxu0 %v1280_v46 }
 0x117   : > { %1588 = vmatmul.mubr.bf16.gmra.mxu0 %v1153_v58 }
 0x118   : > { %v992_v2 = vpop.permute.xlu0 %991 }
 0x119   : > { %v898_v37 = vpop.permute.xlu1 %897  ;;  %v1205_v20 = vsel %vm1065_vm5, %v5375_v35, %v992_v2 }
 0x11a   : > { %v1083_v27 = vsel %vm1065_vm5, %v5172_v30, %v898_v37 }
 0x11c   : > { %v1024_v38 = vpop.permute.xlu0 %1023 }
 0x11d   : > { %v928_v55 = vpop.permute.xlu1 %927  ;;  %v1243_v40 = vsel %vm1096_vm7, %v1205_v20, %v1024_v38 }
 0x11e   : > { %v1114_v52 = vsel %vm1096_vm7, %v1083_v27, %v928_v55 }
 0x120   : > { %v1054_v10 = vpop.permute.xlu0 %1053 }
 0x121   : > { %v960_v14 = vpop.permute.xlu1 %959  ;;  %v1283_v45 = vsel %vm1127_vm8, %v1243_v40, %v1054_v10 }
 0x122   : > { %v1156_v0 = vsel %vm1127_vm8, %v1114_v52, %v960_v14  ;;  %1595 = vmatprep.mubr.bf16.mxu0 %v1283_v45 }
 0x123   : > { %1596 = vmatmul.mubr.bf16.gmra.mxu0 %v1156_v0 }
 0x124   : > { %v994_v43 = vpop.permute.xlu0 %993 }
 0x125   : > { %v900_v49 = vpop.permute.xlu1 %899  ;;  %v1208_v35 = vsel %vm1065_vm5, %v5393_v44, %v994_v43 }
 0x126   : > { %v1085_v30 = vsel %vm1065_vm5, %v5186_v1, %v900_v49 }
 0x128   : > { %v1026_v12 = vpop.permute.xlu0 %1025 }
 0x129   : > { %v930_v28 = vpop.permute.xlu1 %929  ;;  %v1245_v53 = vsel %vm1096_vm7, %v1208_v35, %v1026_v12 }
 0x12a   : > { %v1116_v11 = vsel %vm1096_vm7, %v1085_v30, %v930_v28 }
 0x12c   : > { %v1056_v62 = vpop.permute.xlu0 %1055 }
 0x12d   : > { %v962_v61 = vpop.permute.xlu1 %961  ;;  %v1286_v3 = vsel %vm1127_vm8, %v1245_v53, %v1056_v62 }
 0x12e   : > { %v1159_v6 = vsel %vm1127_vm8, %v1116_v11, %v962_v61  ;;  %1603 = vmatprep.mubr.bf16.mxu0 %v1286_v3 }
 0x12f   : > { %1604 = vmatmul.mubr.bf16.gmra.mxu0 %v1159_v6 }
 0x130   : > { %v996_v36 = vpop.permute.xlu0 %995 }
 0x131   : > { %v902_v18 = vpop.permute.xlu1 %901  ;;  %v1211_v44 = vsel %vm1065_vm5, %v5411_v9, %v996_v36 }
 0x132   : > { %v1087_v1 = vsel %vm1065_vm5, %v5222_v33, %v902_v18 }
 0x134   : > { %v1028_v56 = vpop.permute.xlu0 %1027 }
 0x135   : > { %v932_v48 = vpop.permute.xlu1 %931  ;;  %v1247_v21 = vsel %vm1096_vm7, %v1211_v44, %v1028_v56 }
 0x136   : > { %v1118_v5 = vsel %vm1096_vm7, %v1087_v1, %v932_v48 }
 0x138   : > { %v1058_v8 = vpop.permute.xlu0 %1057 }
 0x139   : > { %v964_v54 = vpop.permute.xlu1 %963  ;;  %v1289_v42 = vsel %vm1127_vm8, %v1247_v21, %v1058_v8 }
 0x13a   : > { %v1162_v7 = vsel %vm1127_vm8, %v1118_v5, %v964_v54  ;;  %1611 = vmatprep.mubr.bf16.mxu0 %v1289_v42 }
 0x13b   : > { %1612 = vmatmul.mubr.bf16.gmra.mxu0 %v1162_v7 }
 0x13c   : > { %v998_v47 = vpop.permute.xlu0 %997 }
 0x13d   : > { %v904_v22 = vpop.permute.xlu1 %903  ;;  %v1214_v9 = vsel %vm1065_vm5, %v5439_v16, %v998_v47 }
 0x13e   : > { %v1089_v33 = vsel %vm1065_vm5, %v5240_v39, %v904_v22 }
 0x140   : > { %v1030_v19 = vpop.permute.xlu0 %1029 }
 0x141   : > { %v934_v34 = vpop.permute.xlu1 %933  ;;  %v1249_v23 = vsel %vm1096_vm7, %v1214_v9, %v1030_v19 }
 0x142   : > { %v1120_v4 = vsel %vm1096_vm7, %v1089_v33, %v934_v34 }
 0x144   : > { %v1060_v25 = vpop.permute.xlu0 %1059 }
 0x145   : > { %v966_v26 = vpop.permute.xlu1 %965  ;;  %v1292_v31 = vsel %vm1127_vm8, %v1249_v23, %v1060_v25  ;;  %v4383_v23 = vpop.f32.mrf.mxu1 }
 0x146   : > { %v1165_v51 = vsel %vm1127_vm8, %v1120_v4, %v966_v26  ;;  %1619 = vmatprep.mubr.bf16.mxu0 %v1292_v31 }
 0x147   : > { %1620 = vmatmul.mubr.bf16.gmra.mxu0 %v1165_v51  ;;  %v1686_v25 = vpop.f32.mrf.mxu1 }
 0x148   : > { %v1000_v17 = vpop.permute.xlu0 %999 }
 0x149   : > { %v906_v63 = vpop.permute.xlu1 %905  ;;  %v1217_v16 = vsel %vm1065_vm5, %v5467_v60, %v1000_v17  ;;  %v4384_v51 = vpop.f32.mrf.mxu1 }
 0x14a   : > { %v1091_v39 = vsel %vm1065_vm5, %v5268_v13, %v906_v63 }
 0x14b   : > { %v1689_v63 = vpop.f32.mrf.mxu1 }
 0x14c   : > { %v1032_v24 = vpop.permute.xlu0 %1031 }
 0x14d   : > { %v936_v29 = vpop.permute.xlu1 %935  ;;  %v1251_v32 = vsel %vm1096_vm7, %v1217_v16, %v1032_v24 }
 0x14e   : > { %v1122_v46 = vsel %vm1096_vm7, %v1091_v39, %v936_v29  ;;  %v4387_v29 = vpop.f32.mrf.mxu1 }
 0x150   : > { %v1062_v58 = vpop.permute.xlu0 %1061  ;;  %v1702_v39 = vpop.f32.mrf.mxu1 }
 0x151   : > { %v968_v2 = vpop.permute.xlu1 %967  ;;  %v1295_v37 = vsel %vm1127_vm8, %v1251_v32, %v1062_v58 }
 0x152   : > { %v1168_v38 = vsel %vm1127_vm8, %v1122_v46, %v968_v2  ;;  %1627 = vmatprep.mubr.bf16.mxu0 %v1295_v37 }
 0x153   : > { %1628 = vmatmul.mubr.bf16.gmra.mxu0 %v1168_v38 }
 0x154   : > { %v1002_v55 = vpop.permute.xlu0 %1001 }
 0x155   : > { %v908_v20 = vpop.permute.xlu1 %907  ;;  %v1220_v60 = vsel %vm1065_vm5, %v5494_v59, %v1002_v55 }
 0x156   : > { %v1093_v13 = vsel %vm1065_vm5, %v5284_v15, %v908_v20 }
 0x158   : > { %v1034_v27 = vpop.permute.xlu0 %1033 }
 0x159   : > { %v938_v40 = vpop.permute.xlu1 %937  ;;  %v1253_v52 = vsel %vm1096_vm7, %v1220_v60, %v1034_v27 }
 0x15a   : > { %v1124_v10 = vsel %vm1096_vm7, %v1093_v13, %v938_v40 }
 0x15c   : > { %v1064_v14 = vpop.permute.xlu0 %1063 }
 0x15d   : > { %v970_v45 = vpop.permute.xlu1 %969  ;;  %v1298_v0 = vsel %vm1127_vm8, %v1253_v52, %v1064_v14 }
 0x15e   : > { %v1171_v43 = vsel %vm1127_vm8, %v1124_v10, %v970_v45  ;;  %1635 = vmatprep.mubr.bf16.mxu0 %v1298_v0 }
 0x15f   : > { %1636 = vmatmul.mubr.bf16.gmra.mxu0 %v1171_v43  ;;  %v4548_v43 = vld [vmem:[%s4813_s30 + $0x118] sm:$0xff]  }
 0x160   : > { %v1004_v49 = vpop.permute.xlu0 %1003  ;;  %4413 = vmatprep.subr.bf16.mxu0 %v4548_v43 }
 0x161   : > { %v910_v12 = vpop.permute.xlu1 %909  ;;  %v1223_v59 = vsel %vm1065_vm5, %v5520_v41, %v1004_v49  ;;  %4414 = vmatpush3.bf16.msra.mxu0 %v4548_v43 }
 0x162   : > { %v1254_v28 = vsel %vm1096_vm7, %v1223_v59, %v1032_v24  ;;  %v1095_v35 = vsel %vm1065_vm5, %v5313_v57, %v910_v12 }
 0x163   : > { %v1300_v15 = vsel %vm1127_vm8, %v1254_v28, %v1062_v58  ;;  %v4388_v58 = vpop.f32.mrf.mxu1 }
 0x164   : > { %v940_v30 = vpop.permute.xlu0 %939  ;;  %1643 = vmatprep.mubr.bf16.mxu0 %v1300_v15 }
 0x165   : > { %v1126_v53 = vsel %vm1096_vm7, %v1095_v35, %v940_v30  ;;  %v972_v11 = vpop.permute.xlu1 %971  ;;  %v1705_v37 = vpop.f32.mrf.mxu1 }
 0x166   : > { %v1174_v62 = vsel %vm1127_vm8, %v1126_v53, %v972_v11 }
 0x167   : > { %1644 = vmatmul.mubr.bf16.gmra.mxu0 %v1174_v62  ;;  %v5660_v38 = vpop.f32.mrf.mxu1 }
 0x169   : > { %v5666_v27 = vpop.f32.mrf.mxu1 }
 0x16b   : > { %v5670_v60 = vpop.f32.mrf.mxu1 }
 0x16d   : > { %v5674_v52 = vpop.f32.mrf.mxu1 }
 0x16f   : > { %v5678_v14 = vpop.f32.mrf.mxu1 }
 0x171   : > { %v5685_v49 = vpop.f32.mrf.mxu1 }
 0x173   : > { %v5689_v28 = vpop.f32.mrf.mxu1 }
 0x183   : > { %v4133_v61 = vpop.f32.mrf.mxu0 }
 0x185   : > { %v4134_v3 = vpop.f32.mrf.mxu0 }
 0x186   : > { %v4135_v6 = vadd.f32 %v4134_v3, %v4133_v61  ;;  %v5697_v61 = vpop.f32.mrf.mxu1 }
 0x187   : > { %v4136_v36 = vpop.f32.mrf.mxu0 }
 0x188   : > { %v5695_v11 = vadd.f32 %v4135_v6, %v1686_v25  ;;  %v5703_v43 = vpop.f32.mrf.mxu1 }
 0x189   : > { %v4137_v41 = vpop.f32.mrf.mxu0 }
 0x18a   : > { %v4138_v59 = vadd.f32 %v4137_v41, %v4136_v36  ;;  %v1883_v6 = vmul.f32 %v5695_v11, %v5695_v11 }
 0x18b   : > { %v4139_v18 = vpop.f32.mrf.mxu0 }
 0x18c   : > { %v5693_v30 = vadd.f32 %v4138_v59, %v1689_v63 }
 0x18d   : > { %v4140_v56 = vpop.f32.mrf.mxu0 }
 0x18e   : > { %v4141_v15 = vadd.f32 %v4140_v56, %v4139_v18  ;;  %v1884_v41 = vmul.f32 %v5693_v30, %v5693_v30 }
 0x18f   : > { %v4142_v48 = vpop.f32.mrf.mxu0 }
 0x190   : > { %v5701_v50 = vadd.f32 %v4383_v23, %v4141_v15  ;;  %v1813_v23 = vsel %vm1065_vm5, %v5695_v11, 0.0  ;;  %v1916_v63 = vsel %vm1065_vm5, %v1884_v41, 0.0 }
 0x191   : > { %v4143_v44 = vpop.f32.mrf.mxu0 }
 0x192   : > { %v4144_v53 = vadd.f32 %v4143_v44, %v4142_v48  ;;  %7618 = vst [vmem:[#allocation10_spill] sm:$0xff] %v5701_v50  ;;  %v1814_v44 = vsel %vm1065_vm5, %v5693_v30, 0.0 }
 0x193   : > { %v4145_v1 = vpop.f32.mrf.mxu0  ;;  %v1815_v15 = vadd.f32 %v1814_v44, %v1813_v23 }
 0x194   : > { %v5709_v18 = vadd.f32 %v4384_v51, %v4144_v53  ;;  %v4549_v51 = vld [vmem:[%s4813_s30 + $0x110] sm:$0xff]  }
 0x195   : > { %v4146_v21 = vpop.f32.mrf.mxu0  ;;  %4415 = vmatprep.subr.bf16.mxu0 %v4549_v51 }
 0x196   : > { %v4147_v62 = vadd.f32 %v4146_v21, %v4145_v1  ;;  %v1885_v1 = vmul.f32 %v5701_v50, %v5701_v50  ;;  %v1886_v59 = vmul.f32 %v5709_v18, %v5709_v18  ;;  %v1818_v53 = vsel %vm1065_vm5, %v5709_v18, 0.0  ;;  %4416 = vmatpush3.bf16.msra.mxu0 %v4549_v51 }
 0x197   : > { %v4148_v57 = vpop.f32.mrf.mxu0 }
 0x198   : > { %v5713_v48 = vadd.f32 %v4147_v62, %v1702_v39  ;;  %v1816_v39 = vsel %vm1065_vm5, %v5701_v50, 0.0  ;;  %v1920_v23 = vsel %vm1065_vm5, %v1886_v59, 0.0 }
 0x199   : > { %v4149_v5 = vpop.f32.mrf.mxu0 }
 0x19a   : > { %v4150_v56 = vadd.f32 %v4149_v5, %v4148_v57  ;;  %v5725_v5 = vpop.f32.mrf.mxu1 }
 0x19b   : > { %v5622_v8 = vpop.f32.mrf.mxu0 }
 0x19d   : > { %v5624_v54 = vpop.f32.mrf.mxu0 }
 0x19e   : > { %v4153_v21 = vadd.f32 %v5624_v54, %v5622_v8  ;;  %v5735_v8 = vadd.f32 %v4150_v56, %v1705_v37  ;;  %v1915_v54 = vsel %vm1065_vm5, %v1883_v6, 0.0  ;;  %v1817_v56 = vadd.f32 %v1816_v39, %v1815_v15  ;;  %v5749_v6 = vpop.f32.mrf.mxu1 }
 0x19f   : > { %v5626_v42 = vpop.f32.mrf.mxu0  ;;  %v1917_v37 = vadd.f32 %v1916_v63, %v1915_v54 }
 0x1a0   : > { %v5743_v62 = vadd.f32 %v4387_v29, %v4153_v21  ;;  %v1888_v29 = vmul.f32 %v5735_v8, %v5735_v8  ;;  %v1819_v21 = vadd.f32 %v1818_v53, %v1817_v56  ;;  %v1822_v51 = vsel %vm1065_vm5, %v5735_v8, 0.0  ;;  %v5774_v15 = vpop.f32.mrf.mxu1 }
 0x1a1   : > { %v5628_v7 = vpop.f32.mrf.mxu0 }
 0x1a2   : > { %v4156_v57 = vadd.f32 %v5628_v7, %v5626_v42  ;;  %v1887_v42 = vmul.f32 %v5713_v48, %v5713_v48  ;;  %v1918_v7 = vsel %vm1065_vm5, %v1885_v1, 0.0  ;;  %v1820_v1 = vsel %vm1065_vm5, %v5713_v48, 0.0  ;;  %v5788_v56 = vpop.f32.mrf.mxu1 }
 0x1a3   : > { %v1889_v63 = vmul.f32 %v5743_v62, %v5743_v62  ;;  %v1821_v54 = vadd.f32 %v1820_v1, %v1819_v21  ;;  %v1824_v53 = vsel %vm1065_vm5, %v5743_v62, 0.0 }
 0x1a4   : > { %v5747_v50 = vadd.f32 %v4388_v58, %v4156_v57  ;;  %v1922_v58 = vsel %vm1065_vm5, %v1887_v42, 0.0 }
 0x1a6   : > { %v1826_v1 = vsel %vm1065_vm5, %v5747_v50, 0.0 }
 0x1a7   : > { %v5630_v47 = vpop.f32.mrf.mxu0 }
 0x1a9   : > { %v5632_v22 = vpop.f32.mrf.mxu0 }
 0x1aa   : > { %v4159_v41 = vadd.f32 %v5632_v22, %v5630_v47  ;;  %v1919_v22 = vadd.f32 %v1918_v7, %v1917_v37  ;;  %v1924_v7 = vsel %vm1065_vm5, %v1888_v29, 0.0 }
 0x1ab   : > { %v5634_v19 = vpop.f32.mrf.mxu0 }
 0x1ac   : > { %v5768_v39 = vadd.f32 %v4159_v41, %v5666_v27  ;;  %v1823_v41 = vadd.f32 %v1822_v51, %v1821_v54 }
 0x1ad   : > { %v5636_v34 = vpop.f32.mrf.mxu0 }
 0x1ae   : > { %v4162_v47 = vadd.f32 %v5636_v34, %v5634_v19  ;;  %v1921_v19 = vadd.f32 %v1920_v23, %v1919_v22  ;;  %v1890_v34 = vmul.f32 %v5747_v50, %v5747_v50  ;;  %v1926_v23 = vsel %vm1065_vm5, %v1889_v63, 0.0 }
 0x1af   : > { %v1891_v29 = vmul.f32 %v5768_v39, %v5768_v39 }
 0x1b0   : > { %v5782_v27 = vadd.f32 %v4162_v47, %v5674_v52 }
 0x1b1   : > { %v1930_v54 = vsel %vm1065_vm5, %v1891_v29, 0.0 }
 0x1b3   : > { %v5638_v9 = vpop.f32.mrf.mxu0 }
 0x1b5   : > { %v5640_v33 = vpop.f32.mrf.mxu0 }
 0x1b6   : > { %v4165_v59 = vadd.f32 %v5640_v33, %v5638_v9  ;;  %v1923_v33 = vadd.f32 %v1922_v58, %v1921_v19  ;;  %v1830_v19 = vsel %vm1065_vm5, %v5782_v27, 0.0 }
 0x1b7   : > { %v5642_v4 = vpop.f32.mrf.mxu0 }
 0x1b8   : > { %v5796_v52 = vadd.f32 %v5660_v38, %v4165_v59  ;;  %v1925_v47 = vadd.f32 %v1924_v7, %v1923_v33  ;;  %v5813_v59 = vpop.f32.mrf.mxu1 }
 0x1b9   : > { %v5644_v26 = vpop.f32.mrf.mxu0 }
 0x1ba   : > { %v4168_v9 = vadd.f32 %v5644_v26, %v5642_v4  ;;  %v1825_v4 = vadd.f32 %v1824_v53, %v1823_v41  ;;  %v1928_v26 = vsel %vm1065_vm5, %v1890_v34, 0.0  ;;  %v1927_v38 = vadd.f32 %v1926_v23, %v1925_v47  ;;  %v5836_v23 = vpop.f32.mrf.mxu1 }
 0x1bb   : > { %v1893_v34 = vmul.f32 %v5796_v52, %v5796_v52 }
 0x1bc   : > { %v5806_v21 = vadd.f32 %v5670_v60, %v4168_v9  ;;  %v1827_v51 = vadd.f32 %v1826_v1, %v1825_v4  ;;  %v1832_v9 = vsel %vm1065_vm5, %v5796_v52, 0.0 }
 0x1be   : > { %v1894_v33 = vmul.f32 %v5806_v21, %v5806_v21  ;;  %v1834_v1 = vsel %vm1065_vm5, %v5806_v21, 0.0 }
 0x1bf   : > { %v5646_v31 = vpop.f32.mrf.mxu0 }
 0x1c1   : > { %v5648_v17 = vpop.f32.mrf.mxu0 }
 0x1c2   : > { %v4171_v37 = vadd.f32 %v5648_v17, %v5646_v31  ;;  %v1828_v31 = vsel %vm1065_vm5, %v5768_v39, 0.0  ;;  %v1892_v17 = vmul.f32 %v5782_v27, %v5782_v27 }
 0x1c3   : > { %v5650_v24 = vpop.f32.mrf.mxu0  ;;  %v1829_v7 = vadd.f32 %v1828_v31, %v1827_v51 }
 0x1c4   : > { %v5811_v63 = vadd.f32 %v4171_v37, %v5685_v49  ;;  %v1932_v53 = vsel %vm1065_vm5, %v1892_v17, 0.0  ;;  %v1936_v17 = vsel %vm1065_vm5, %v1894_v33, 0.0 }
 0x1c5   : > { %v5652_v16 = vpop.f32.mrf.mxu0 }
 0x1c6   : > { %v4174_v58 = vadd.f32 %v5652_v16, %v5650_v24  ;;  %v1929_v24 = vadd.f32 %v1928_v26, %v1927_v38 }
 0x1c8   : > { %v5832_v41 = vadd.f32 %v4174_v58, %v5697_v61  ;;  %v1931_v37 = vadd.f32 %v1930_v54, %v1929_v24  ;;  %v1836_v58 = vsel %vm1065_vm5, %v5811_v63, 0.0 }
 0x1ca   : > { %v1933_v47 = vadd.f32 %v1932_v53, %v1931_v37  ;;  %v1896_v38 = vmul.f32 %v5832_v41, %v5832_v41 }
 0x1cb   : > { %v5654_v32 = vpop.f32.mrf.mxu0 }
 0x1cc   : > { %v1940_v53 = vsel %vm1065_vm5, %v1896_v38, 0.0 }
 0x1cd   : > { %v5656_v46 = vpop.f32.mrf.mxu0 }
 0x1ce   : > { %v4177_v60 = vadd.f32 %v5656_v46, %v5654_v32  ;;  %v1831_v32 = vadd.f32 %v1830_v19, %v1829_v7  ;;  %v1895_v46 = vmul.f32 %v5811_v63, %v5811_v63 }
 0x1cf   : > { %v5658_v2 = vpop.f32.mrf.mxu0 }
 0x1d0   : > { %v5844_v29 = vadd.f32 %v5678_v14, %v4177_v60  ;;  %v1833_v4 = vadd.f32 %v1832_v9, %v1831_v32 }
 0x1d1   : > { %v5662_v55 = vpop.f32.mrf.mxu0 }
 0x1d2   : > { %v4180_v16 = vadd.f32 %v5662_v55, %v5658_v2  ;;  %v1934_v55 = vsel %vm1065_vm5, %v1893_v34, 0.0  ;;  %v1835_v54 = vadd.f32 %v1834_v1, %v1833_v4  ;;  %v1897_v19 = vmul.f32 %v5844_v29, %v5844_v29 }
 0x1d3   : > { %v1935_v51 = vadd.f32 %v1934_v55, %v1933_v47  ;;  %v1840_v9 = vsel %vm1065_vm5, %v5844_v29, 0.0 }
 0x1d4   : > { %v5849_v26 = vadd.f32 %v5689_v28, %v4180_v16  ;;  %v1838_v28 = vsel %vm1065_vm5, %v5832_v41, 0.0  ;;  %v1837_v7 = vadd.f32 %v1836_v58, %v1835_v54  ;;  %v1942_v32 = vsel %vm1065_vm5, %v1897_v19, 0.0 }
 0x1d5   : > { %v1937_v24 = vadd.f32 %v1936_v17, %v1935_v51 }
 0x1d7   : > { %v5664_v20 = vpop.f32.mrf.mxu0 }
 0x1d9   : > { %v5668_v40 = vpop.f32.mrf.mxu0 }
 0x1da   : > { %v4183_v61 = vadd.f32 %v5668_v40, %v5664_v20  ;;  %v1938_v20 = vsel %vm1065_vm5, %v1895_v46, 0.0  ;;  %v1769_v40 = vpop.f32.mrf.mxu1  ;;  %v1842_v46 = vsel %vm1065_vm5, %v5849_v26, 0.0 }
 0x1db   : > { %v5672_v13 = vpop.f32.mrf.mxu0 }
 0x1dc   : > { %v5864_v34 = vadd.f32 %v4183_v61, %v5725_v5 }
 0x1dd   : > { %v5676_v10 = vpop.f32.mrf.mxu0 }
 0x1de   : > { %v4186_v14 = vadd.f32 %v5676_v10, %v5672_v13  ;;  %v1898_v13 = vmul.f32 %v5849_v26, %v5849_v26  ;;  %v5870_v10 = vpop.f32.mrf.mxu1  ;;  %v1899_v55 = vmul.f32 %v5864_v34, %v5864_v34 }
 0x1e0   : > { %v5876_v33 = vadd.f32 %v4186_v14, %v5774_v15  ;;  %v1946_v51 = vsel %vm1065_vm5, %v1899_v55, 0.0 }
 0x1e2   : > { %v1846_v54 = vsel %vm1065_vm5, %v5876_v33, 0.0 }
 0x1e3   : > { %v5680_v45 = vpop.f32.mrf.mxu0 }
 0x1e5   : > { %v5682_v0 = vpop.f32.mrf.mxu0 }
 0x1e6   : > { %v4189_v60 = vadd.f32 %v5682_v0, %v5680_v45  ;;  %v1939_v45 = vadd.f32 %v1938_v20, %v1937_v24  ;;  %v1839_v0 = vadd.f32 %v1838_v28, %v1837_v7 }
 0x1e7   : > { %v5687_v12 = vpop.f32.mrf.mxu0 }
 0x1e8   : > { %v5888_v1 = vadd.f32 %v5703_v43, %v4189_v60  ;;  %v1941_v15 = vadd.f32 %v1940_v53, %v1939_v45  ;;  %v1841_v61 = vadd.f32 %v1840_v9, %v1839_v0 }
 0x1e9   : > { %v5691_v35 = vpop.f32.mrf.mxu0 }
 0x1ea   : > { %v4192_v5 = vadd.f32 %v5691_v35, %v5687_v12  ;;  %v1944_v12 = vsel %vm1065_vm5, %v1898_v13, 0.0  ;;  %v1782_v35 = vpop.f32.mrf.mxu1  ;;  %v1943_v43 = vadd.f32 %v1942_v32, %v1941_v15  ;;  %v1843_v58 = vadd.f32 %v1842_v46, %v1841_v61 }
 0x1eb   : > { %v1901_v20 = vmul.f32 %v5888_v1, %v5888_v1  ;;  %v1848_v7 = vsel %vm1065_vm5, %v5888_v1, 0.0 }
 0x1ec   : > { %v5896_v4 = vadd.f32 %v5749_v6, %v4192_v5  ;;  %v1945_v19 = vadd.f32 %v1944_v12, %v1943_v43 }
 0x1ee   : > { %v1902_v24 = vmul.f32 %v5896_v4, %v5896_v4  ;;  %v1947_v53 = vadd.f32 %v1946_v51, %v1945_v19 }
 0x1ef   : > { %v5699_v3 = vpop.f32.mrf.mxu0 }
 0x1f0   : > { %v1952_v46 = vsel %vm1065_vm5, %v1902_v24, 0.0 }
 0x1f1   : > { %v5705_v36 = vpop.f32.mrf.mxu0 }
 0x1f2   : > { %v4195_v37 = vadd.f32 %v5705_v36, %v5699_v3  ;;  %v1844_v3 = vsel %vm1065_vm5, %v5864_v34, 0.0  ;;  %v1900_v36 = vmul.f32 %v5876_v33, %v5876_v33 }
 0x1f3   : > { %v5727_v25 = vpop.f32.mrf.mxu0  ;;  %v1845_v28 = vadd.f32 %v1844_v3, %v1843_v58 }
 0x1f4   : > { %v5901_v38 = vadd.f32 %v4195_v37, %v5813_v59  ;;  %v1948_v60 = vsel %vm1065_vm5, %v1900_v36, 0.0 }
 0x1f5   : > { %v5751_v44 = vpop.f32.mrf.mxu0  ;;  %v1847_v9 = vadd.f32 %v1846_v54, %v1845_v28  ;;  %v1949_v0 = vadd.f32 %v1948_v60, %v1947_v53 }
 0x1f6   : > { %v4198_v17 = vadd.f32 %v5751_v44, %v5727_v25  ;;  %v4408_v44 = vpop.f32.mrf.mxu1  ;;  %v1852_v55 = vsel %vm1065_vm5, %v5901_v38, 0.0 }
 0x1f7   : > { %v1849_v37 = vadd.f32 %v1848_v7, %v1847_v9 }
 0x1f8   : > { %v5917_v13 = vadd.f32 %v4198_v17, %v1769_v40  ;;  %v1785_v32 = vpop.f32.mrf.mxu1 }
 0x1fa   : > { %v1904_v15 = vmul.f32 %v5917_v13, %v5917_v13 }
 0x1fb   : > { %v5761_v57 = vpop.f32.mrf.mxu0 }
 0x1fd   : > { %v5776_v42 = vpop.f32.mrf.mxu0 }
 0x1fe   : > { %v4201_v6 = vadd.f32 %v5776_v42, %v5761_v57  ;;  %v1903_v57 = vmul.f32 %v5901_v38, %v5901_v38 }
 0x1ff   : > { %v5799_v22 = vpop.f32.mrf.mxu0 }
 0x200   : > { %v5925_v5 = vadd.f32 %v5788_v56, %v4201_v6  ;;  %v1954_v3 = vsel %vm1065_vm5, %v1903_v57, 0.0 }
 0x201   : > { %v5824_v49 = vpop.f32.mrf.mxu0 }
 0x202   : > { %v4204_v25 = vadd.f32 %v5824_v49, %v5799_v22  ;;  %v1950_v22 = vsel %vm1065_vm5, %v1901_v20, 0.0  ;;  %v1850_v49 = vsel %vm1065_vm5, %v5896_v4, 0.0  ;;  %v1905_v36 = vmul.f32 %v5925_v5, %v5925_v5 }
 0x203   : > { %v1951_v12 = vadd.f32 %v1950_v22, %v1949_v0  ;;  %v1851_v56 = vadd.f32 %v1850_v49, %v1849_v37  ;;  %v1856_v54 = vsel %vm1065_vm5, %v5925_v5, 0.0 }
 0x204   : > { %v5929_v40 = vadd.f32 %v5836_v23, %v4204_v25  ;;  %v1854_v23 = vsel %vm1065_vm5, %v5917_v13, 0.0 }
 0x205   : > { %v1853_v58 = vadd.f32 %v1852_v55, %v1851_v56  ;;  %v1953_v51 = vadd.f32 %v1952_v46, %v1951_v12 }
 0x207   : > { %v5838_v2 = vpop.f32.mrf.mxu0  ;;  %v1955_v28 = vadd.f32 %v1954_v3, %v1953_v51  ;;  %v1855_v19 = vadd.f32 %v1854_v23, %v1853_v58 }
 0x209   : > { %v4206_v31 = vpop.f32.mrf.mxu0  ;;  %v1857_v53 = vadd.f32 %v1856_v54, %v1855_v19 }
 0x20a   : > { %v4207_v45 = vadd.f32 %v4206_v31, %v5838_v2  ;;  %v5937_v31 = vpop.f32.mrf.mxu1 }
 0x20b   : > { %v4208_v16 = vpop.f32.mrf.mxu0 }
 0x20c   : > { %v5943_v17 = vadd.f32 %v4207_v45, %v1782_v35  ;;  %v1798_v60 = vpop.f32.mrf.mxu1  ;;  %v1958_v35 = vsel %vm1065_vm5, %v1905_v36, 0.0 }
 0x20d   : > { %v4209_v47 = vpop.f32.mrf.mxu0 }
 0x20e   : > { %v4210_v61 = vadd.f32 %v4209_v47, %v4208_v16  ;;  %v1906_v16 = vmul.f32 %v5929_v40, %v5929_v40  ;;  %v1956_v47 = vsel %vm1065_vm5, %v1904_v15, 0.0  ;;  %v4412_v46 = vpop.f32.mrf.mxu1 }
 0x20f   : > { %v1957_v24 = vadd.f32 %v1956_v47, %v1955_v28 }
 0x210   : > { %v5950_v20 = vadd.f32 %v4210_v61, %v1785_v32  ;;  %v1960_v9 = vsel %vm1065_vm5, %v1906_v16, 0.0  ;;  %v1801_v51 = vpop.f32.mrf.mxu1 }
 0x211   : > { %v1959_v0 = vadd.f32 %v1958_v35, %v1957_v24 }
 0x212   : > { %v1908_v22 = vmul.f32 %v5950_v20, %v5950_v20  ;;  %v1862_v55 = vsel %vm1065_vm5, %v5950_v20, 0.0 }
 0x213   : > { %v4211_v14 = vpop.f32.mrf.mxu0  ;;  %v1961_v56 = vadd.f32 %v1960_v9, %v1959_v0 }
 0x215   : > { %v4212_v59 = vpop.f32.mrf.mxu0 }
 0x216   : > { %v4213_v43 = vadd.f32 %v4212_v59, %v4211_v14  ;;  %v1858_v14 = vsel %vm1065_vm5, %v5929_v40, 0.0  ;;  %v1907_v59 = vmul.f32 %v5943_v17, %v5943_v17 }
 0x217   : > { %v4214_v42 = vpop.f32.mrf.mxu0  ;;  %v1859_v37 = vadd.f32 %v1858_v14, %v1857_v53 }
 0x218   : > { %v5958_v7 = vadd.f32 %v5870_v10, %v4213_v43  ;;  %v1962_v10 = vsel %vm1065_vm5, %v1907_v59, 0.0 }
 0x219   : > { %v4215_v2 = vpop.f32.mrf.mxu0  ;;  %v1963_v43 = vadd.f32 %v1962_v10, %v1961_v56 }
 0x21a   : > { %v4216_v6 = vadd.f32 %v4215_v2, %v4214_v42  ;;  %v1860_v42 = vsel %vm1065_vm5, %v5943_v17, 0.0  ;;  %v1909_v15 = vmul.f32 %v5958_v7, %v5958_v7  ;;  %v1864_v2 = vsel %vm1065_vm5, %v5958_v7, 0.0 }
 0x21b   : > { %v1861_v12 = vadd.f32 %v1860_v42, %v1859_v37 }
 0x21c   : > { %v5965_v49 = vadd.f32 %v4408_v44, %v4216_v6  ;;  %v1964_v44 = vsel %vm1065_vm5, %v1908_v22, 0.0  ;;  %v1966_v47 = vsel %vm1065_vm5, %v1909_v15, 0.0 }
 0x21d   : > { %v1863_v58 = vadd.f32 %v1862_v55, %v1861_v12  ;;  %v1965_v19 = vadd.f32 %v1964_v44, %v1963_v43 }
 0x21e   : > { %v1910_v23 = vmul.f32 %v5965_v49, %v5965_v49  ;;  %v1866_v54 = vsel %vm1065_vm5, %v5965_v49, 0.0 }
 0x21f   : > { %v4217_v25 = vpop.f32.mrf.mxu0  ;;  %v1967_v53 = vadd.f32 %v1966_v47, %v1965_v19 }
 0x220   : > { %v1968_v35 = vsel %vm1065_vm5, %v1910_v23, 0.0 }
 0x221   : > { %v4218_v57 = vpop.f32.mrf.mxu0  ;;  %v1969_v37 = vadd.f32 %v1968_v35, %v1967_v53 }
 0x222   : > { %v4219_v45 = vadd.f32 %v4218_v57, %v4217_v25  ;;  %v1865_v25 = vadd.f32 %v1864_v2, %v1863_v58 }
 0x223   : > { %v4220_v32 = vpop.f32.mrf.mxu0 }
 0x224   : > { %v5972_v61 = vadd.f32 %v4219_v45, %v1798_v60  ;;  %v1867_v9 = vadd.f32 %v1866_v54, %v1865_v25 }
 0x225   : > { %v4221_v3 = vpop.f32.mrf.mxu0 }
 0x226   : > { %v4222_v36 = vadd.f32 %v4221_v3, %v4220_v32  ;;  %v1911_v6 = vmul.f32 %v5972_v61, %v5972_v61  ;;  %v1868_v14 = vsel %vm1065_vm5, %v5972_v61, 0.0 }
 0x227   : > { %v4223_v16 = vpop.f32.mrf.mxu0  ;;  %v1869_v0 = vadd.f32 %v1868_v14, %v1867_v9 }
 0x228   : > { %v5984_v28 = vadd.f32 %v4222_v36, %v1801_v51  ;;  %v1970_v42 = vsel %vm1065_vm5, %v1911_v6, 0.0 }
 0x229   : > { %v4224_v60 = vpop.f32.mrf.mxu0  ;;  %v1971_v56 = vadd.f32 %v1970_v42, %v1969_v37 }
 0x22a   : > { %v1912_v59 = vmul.f32 %v5984_v28, %v5984_v28  ;;  %v4225_v24 = vadd.f32 %v4224_v60, %v4223_v16  ;;  %v1870_v22 = vsel %vm1065_vm5, %v5984_v28, 0.0 }
 0x22b   : > { %v4226_v57 = vpop.f32.mrf.mxu0  ;;  %v1871_v3 = vadd.f32 %v1870_v22, %v1869_v0 }
 0x22c   : > { %v1807_v45 = vadd.f32 %v5937_v31, %v4225_v24  ;;  %v1972_v10 = vsel %vm1065_vm5, %v1912_v59, 0.0 }
 0x22d   : > { %v4227_v32 = vpop.f32.mrf.mxu0  ;;  %v1973_v23 = vadd.f32 %v1972_v10, %v1971_v56  ;;  %v1993_v10 = vlaneseq }
 0x22e   : > { %v1872_v55 = vsel %vm1065_vm5, %v1807_v45, 0.0  ;;  %v1913_v15 = vmul.f32 %v1807_v45, %v1807_v45  ;;  %v4228_v12 = vadd.f32 %v4227_v32, %v4226_v57 }
 0x22f   : > { %v1873_v36 = vadd.f32 %v1872_v55, %v1871_v3  ;;  %v1994_v55 = vshrl.u32 %v1993_v10, 7 }
 0x230   : > { %v1974_v44 = vsel %vm1065_vm5, %v1913_v15, 0.0  ;;  %v1810_v2 = vadd.f32 %v4412_v46, %v4228_v12  ;;  %v1988_v15 = vld [vmem:[%s4818_s6] sm:$0x1] }
 0x231   : > { %v1975_v31 = vadd.f32 %v1974_v44, %v1973_v23  ;;  %v6001_v12 = vsub.s32 0, %v1994_v55  ;;  %v2030_v44 = vld [vmem:[%s4823_s8] sm:$0x1]  ;;  %v4550_v55 = vld [vmem:[%s4813_s30 + $0x108] sm:$0xff]  }
 0x232   : > { %v1874_v43 = vsel %vm1065_vm5, %v1810_v2, 0.0  ;;  %v1914_v58 = vmul.f32 %v1810_v2, %v1810_v2  ;;  %4247 = vmatprep.subr.bf16.mxu1 %v4550_v55 }
 0x233   : > { %v1875_v51 = vadd.f32 %v1874_v43, %v1873_v36  ;;  %7619 = vst [vmem:[#allocation11_spill] sm:$0xff] %v6001_v12 }
 0x234   : > { %v1976_v16 = vsel %vm1065_vm5, %v1914_v58, 0.0 }
 0x235   : > { %v1876_v47 = vrot.slane %v1875_v51, 4  ;;  %v1977_v54 = vadd.f32 %v1976_v16, %v1975_v31 }
 0x237   : > { %v1877_v6 = vadd.f32 %v1876_v47, %v1875_v51  ;;  %v1978_v19 = vrot.slane %v1977_v54, 4 }
 0x239   : > { %v1878_v25 = vrot.slane %v1877_v6, 2  ;;  %v1979_v60 = vadd.f32 %v1978_v19, %v1977_v54 }
 0x23b   : > { %v1879_v35 = vadd.f32 %v1878_v25, %v1877_v6  ;;  %v1980_v14 = vrot.slane %v1979_v60, 2 }
 0x23d   : > { %v1880_v59 = vrot.slane %v1879_v35, 1  ;;  %v1981_v46 = vadd.f32 %v1980_v14, %v1979_v60  ;;  %v7620_v60 = vld [vmem:[#allocation10_spill] sm:$0xff] }
 0x23f   : > { %v1881_v24 = vadd.f32 %v1880_v59, %v1879_v35  ;;  %v1982_v53 = vrot.slane %v1981_v46, 1 }
 0x241   : > { %v1882_v9 = vmul.f32 0.00390625, %v1881_v24  ;;  %v1983_v57 = vadd.f32 %v1982_v53, %v1981_v46 }
 0x243   : > { %v1984_v42 = vmul.f32 0.00390625, %v1983_v57  ;;  %v1985_v22 = vmul.f32 %v1882_v9, %v1882_v9 }
 0x245   : > { %v1986_v0 = vsub.f32 %v1984_v42, %v1985_v22 }
 0x247   : > { %v1987_v37 = vmax.f32 %v1986_v0, 0.0 }
 0x249   : > { %v1989_v32 = vadd.f32 1e-05, %v1987_v37 }
 0x24b   : > { %4566 = vrsqrt.f32 %v1989_v32 }
 0x258   : > { %v4567_v56 = vpop.eup %4566 }
 0x259   : > { %v1991_v3 = vmul.f32 %v4567_v56, %v1988_v15 }
 0x25b   : > { %v6005_v23 = vrot.slane %v1991_v3, %v6001_v12  ;;  %v2031_v36 = vmul.f32 %v1991_v3, %v1882_v9 }
 0x25d   : > { %v2028_v43 = vmul.f32 %v6005_v23, %v1807_v45  ;;  %v2029_v58 = vmul.f32 %v6005_v23, %v1810_v2  ;;  %v2032_v31 = vsub.f32 %v2030_v44, %v2031_v36  ;;  %v1998_v25 = vmul.f32 %v6005_v23, %v5695_v11 }
 0x25e   : > { %v1999_v45 = vmul.f32 %v6005_v23, %v5693_v30  ;;  %v2000_v2 = vmul.f32 %v6005_v23, %v7620_v60  ;;  %v2001_v35 = vmul.f32 %v6005_v23, %v5709_v18  ;;  %v2002_v14 = vmul.f32 %v6005_v23, %v5713_v48 }
 0x25f   : > { %v6010_v51 = vrot.slane %v2032_v31, %v6001_v12  ;;  %v2003_v59 = vmul.f32 %v6005_v23, %v5735_v8  ;;  %v2004_v46 = vmul.f32 %v6005_v23, %v5743_v62  ;;  %v2005_v11 = vmul.f32 %v6005_v23, %v5747_v50 }
 0x260   : > { %v2006_v30 = vmul.f32 %v6005_v23, %v5768_v39  ;;  %v2007_v24 = vmul.f32 %v6005_v23, %v5782_v27  ;;  %v2008_v18 = vmul.f32 %v6005_v23, %v5796_v52  ;;  %v2009_v48 = vmul.f32 %v6005_v23, %v5806_v21 }
 0x261   : > { %v2069_v16 = vadd.f32 %v6010_v51, %v2028_v43  ;;  %v2070_v47 = vadd.f32 %v6010_v51, %v2029_v58  ;;  %v2010_v8 = vmul.f32 %v6005_v23, %v5811_v63  ;;  %v2011_v62 = vmul.f32 %v6005_v23, %v5832_v41 }
 0x262   : > { %v2012_v50 = vmul.f32 %v6005_v23, %v5844_v29  ;;  %v2013_v39 = vmul.f32 %v6005_v23, %v5849_v26  ;;  %v2041_v27 = vadd.f32 %v6010_v51, %v2000_v2  ;;  %v2042_v53 = vadd.f32 %v6010_v51, %v2001_v35 }
 0x263   : > { %v2101_v54 = vmax.f32 %v2069_v16, 0.0  ;;  %v2102_v6 = vmax.f32 %v2070_v47, 0.0  ;;  %v2014_v52 = vmul.f32 %v6005_v23, %v5864_v34  ;;  %v2015_v21 = vmul.f32 %v6005_v23, %v5876_v33 }
 0x264   : > { %v2026_v63 = vmul.f32 %v6005_v23, %v5972_v61  ;;  %v2027_v41 = vmul.f32 %v6005_v23, %v5984_v28  ;;  %v2016_v29 = vmul.f32 %v6005_v23, %v5888_v1  ;;  %v2017_v26 = vmul.f32 %v6005_v23, %v5896_v4 }
 0x265   : > { %v6014_v19 = vpack.c.bf16 %v2102_v6, %v2101_v54  ;;  %v2018_v9 = vmul.f32 %v6005_v23, %v5901_v38  ;;  %v2019_v34 = vmul.f32 %v6005_v23, %v5917_v13  ;;  %v2043_v33 = vadd.f32 %v6010_v51, %v2002_v14 }
 0x266   : > { %v2044_v61 = vadd.f32 %v6010_v51, %v2003_v59  ;;  %v2067_v57 = vadd.f32 %v6010_v51, %v2026_v63  ;;  %v2068_v28 = vadd.f32 %v6010_v51, %v2027_v41  ;;  %v2020_v1 = vmul.f32 %v6005_v23, %v5925_v5 }
 0x267   : > { %v2021_v4 = vmul.f32 %v6005_v23, %v5929_v40  ;;  %v2073_v42 = vmax.f32 %v2041_v27, 0.0  ;;  %v2074_v38 = vmax.f32 %v2042_v53, 0.0  ;;  %v6076_v13 = vmul.f32 %v6005_v23, %v5943_v17 }
 0x268   : > { %v6080_v22 = vmul.f32 %v6005_v23, %v5950_v20  ;;  %v2039_v0 = vadd.f32 %v6010_v51, %v1998_v25  ;;  %v2040_v37 = vadd.f32 %v6010_v51, %v1999_v45  ;;  %v2045_v32 = vadd.f32 %v6010_v51, %v2004_v46 }
 0x269   : > { %v2046_v5 = vadd.f32 %v6010_v51, %v2005_v11  ;;  %v2047_v40 = vadd.f32 %v6010_v51, %v2006_v30  ;;  %v2048_v10 = vadd.f32 %v6010_v51, %v2007_v24  ;;  %v2075_v15 = vmax.f32 %v2043_v33, 0.0 }
 0x26a   : > { %v2076_v17 = vmax.f32 %v2044_v61, 0.0  ;;  %v2099_v56 = vmax.f32 %v2067_v57, 0.0  ;;  %v2100_v3 = vmax.f32 %v2068_v28, 0.0  ;;  %v6091_v20 = vmul.f32 %v6005_v23, %v5958_v7  ;;  %v4551_v7 = vld [vmem:[%s4813_s30 + $0xc8] sm:$0xff]  }
 0x26b   : > { %v2049_v44 = vadd.f32 %v6010_v51, %v2008_v18  ;;  %v2050_v36 = vadd.f32 %v6010_v51, %v2009_v48  ;;  %v2104_v43 = vpack.c.bf16 %v2074_v38, %v2073_v42  ;;  %v2051_v58 = vadd.f32 %v6010_v51, %v2010_v8  ;;  %4248 = vmatpush3.bf16.msra.mxu1 %v4551_v7 }
 0x26c   : > { %v2052_v31 = vadd.f32 %v6010_v51, %v2011_v62  ;;  %v6098_v16 = vadd.f32 %v6010_v51, %v2012_v50  ;;  %v2071_v47 = vmax.f32 %v2039_v0, 0.0  ;;  %v2072_v54 = vmax.f32 %v2040_v37, 0.0  ;;  %v4553_v37 = vld [vmem:[%s4813_s30 + $0xc0] sm:$0xff]  }
 0x26d   : > { %v2077_v6 = vmax.f32 %v2045_v32, 0.0  ;;  %v2079_v25 = vmax.f32 %v2047_v40, 0.0  ;;  %v2080_v45 = vmax.f32 %v2048_v10, 0.0  ;;  %v2078_v60 = vmax.f32 %v2046_v5, 0.0 }
 0x26e   : > { %v6101_v2 = vpack.c.bf16 %v2076_v17, %v2075_v15  ;;  %v6103_v35 = vpack.c.bf16 %v2100_v3, %v2099_v56  ;;  %v2123_v14 = vshrl.u32 %v2104_v43, 16  ;;  %v2054_v59 = vadd.f32 %v6010_v51, %v2013_v39 }
 0x26f   : > { %v6107_v46 = vadd.f32 %v6010_v51, %v2014_v52  ;;  %v6110_v11 = vadd.f32 %v6010_v51, %v2015_v21  ;;  %v6113_v30 = vadd.f32 %v6010_v51, %v2016_v29  ;;  %v6116_v24 = vadd.f32 %v6010_v51, %v2017_v26 }
 0x270   : > { %v6119_v18 = vadd.f32 %v6010_v51, %v2018_v9  ;;  %v2187_v48 = vrot.slane %v2123_v14, 7  ;;  %v2188_v8 = vshll.u32 %v2104_v43, 16  ;;  %v6122_v62 = vadd.f32 %v6010_v51, %v2019_v34  ;;  %v4552_v34 = vld [vmem:[%s4813_s30 + $0x100] sm:$0xff]  }
 0x271   : > { %v6125_v50 = vadd.f32 %v6010_v51, %v2020_v1  ;;  %v6128_v39 = vadd.f32 %v6010_v51, %v2021_v4  ;;  %v6130_v27 = vpack.c.bf16 %v2080_v45, %v2079_v25  ;;  %v6132_v53 = vpack.c.bf16 %v2072_v54, %v2071_v47  ;;  %4249 = vmatprep.subr.bf16.mxu1 %v4552_v34 }
 0x272   : > { %v2106_v52 = vpack.c.bf16 %v2078_v60, %v2077_v6  ;;  %v2190_v21 = vor.u32 %v2188_v8, %v2187_v48  ;;  %v2126_v63 = vshrl.u32 %v6101_v2, 16  ;;  %v2081_v41 = vmax.f32 %v2049_v44, 0.0  ;;  %4250 = vmatpush3.bf16.msra.mxu1 %v4553_v37 }
 0x273   : > { %v2082_v29 = vmax.f32 %v2050_v36, 0.0  ;;  %v2083_v26 = vmax.f32 %v2051_v58, 0.0  ;;  %v2084_v9 = vmax.f32 %v2052_v31, 0.0  ;;  %v2085_v33 = vmax.f32 %v6098_v16, 0.0 }
 0x274   : > { %v2086_v61 = vmax.f32 %v2054_v59, 0.0  ;;  %v6139_v28 = vsel %vm4933_vm3, %v2123_v14, %v2190_v21  ;;  %v2192_v1 = vshll.u32 %v6101_v2, 16  ;;  %v2087_v4 = vmax.f32 %v6107_v46, 0.0  ;;  %v4554_v59 = vld [vmem:[%s4813_s30 + $0xf8] sm:$0xff]  }
 0x275   : > { %v2088_v42 = vmax.f32 %v6110_v11, 0.0  ;;  %v2089_v38 = vmax.f32 %v6113_v30, 0.0  ;;  %2739 = vrot.lane.b32.xlu0 %v6139_v28, %s4698_s18  ;;  %v2132_v0 = vshrl.u32 %v6130_v27, 16  ;;  %v2090_v32 = vmax.f32 %v6116_v24, 0.0  ;;  %v4555_v21 = vld [vmem:[%s4813_s30 + $0xb8] sm:$0xff]   ;;  %4251 = vmatprep.subr.bf16.mxu1 %v4554_v59 }
 0x276   : > { %v2129_v5 = vshrl.u32 %v2106_v52, 16  ;;  %v2120_v40 = vshrl.u32 %v6132_v53, 16  ;;  %v2191_v10 = vrot.slane %v2126_v63, 7  ;;  %v2091_v55 = vmax.f32 %v6119_v18, 0.0  ;;  %4252 = vmatpush3.bf16.msra.mxu1 %v4555_v21 }
 0x277   : > { %v6152_v15 = vpack.c.bf16 %v2082_v29, %v2081_v41  ;;  %v6154_v17 = vpack.c.bf16 %v2084_v9, %v2083_v26  ;;  %v2184_v56 = vshll.u32 %v6132_v53, 16  ;;  %v2196_v3 = vshll.u32 %v2106_v52, 16 }
 0x278   : > { %v6157_v44 = vrot.slane %v2120_v40, 7  ;;  %v2281_v36 = vrot.slane %v2192_v1, 7  ;;  %v2280_v43 = vrot.slane %v2188_v8, 7  ;;  %v2200_v58 = vshll.u32 %v6130_v27, 16 }
 0x279   : > { %v2199_v31 = vrot.slane %v2132_v0, 7  ;;  %v2553_v16 = vrot.slane %v6139_v28, 1  ;;  %v2194_v47 = vor.u32 %v2192_v1, %v2191_v10  ;;  %v2195_v45 = vrot.slane %v2129_v5, 7 }
 0x27a   : > { %v2186_v54 = vor.u32 %v2184_v56, %v6157_v44  ;;  %v6166_v6 = vsel %vm4933_vm3, %v2187_v48, %v2280_v43  ;;  %v6170_v25 = vsel %vm4933_vm3, %v2191_v10, %v2281_v36  ;;  %v6172_v7 = vpack.c.bf16 %v2086_v61, %v2085_v33 }
 0x27b   : > { %v2138_v60 = vshrl.u32 %v6154_v17, 16  ;;  %v2204_v2 = vshll.u32 %v6152_v15, 16  ;;  %v2554_v14 = vrot.slane %v6166_v6, 1  ;;  %v6184_v11 = vsel %vm4933_vm3, %v2126_v63, %v2194_v47 }
 0x27c   : > { %v6180_v46 = vsel %vm4933_vm3, %v2120_v40, %v2186_v54  ;;  %v2560_v30 = vrot.slane %v6170_v25, 1  ;;  %v2198_v24 = vor.u32 %v2196_v3, %v2195_v45  ;;  %2741 = vrot.lane.b32.xlu0 %v6184_v11, %s4698_s18  ;;  %v2559_v8 = vrot.slane %v6184_v11, 1 }
 0x27d   : > { %2675 = vrot.lane.b32.xlu1 %v6180_v46, %s4699_s20  ;;  %v6190_v48 = vsel %vm818_vm4, %v2553_v16, %v2554_v14  ;;  %v2282_v27 = vrot.slane %v2196_v3, 7  ;;  %v2202_v52 = vor.u32 %v2200_v58, %v2199_v31  ;;  %v6196_v41 = vpack.c.bf16 %v2088_v42, %v2087_v4  ;;  %v4557_v14 = vld [vmem:[%s4813_s30 + $0xb0] sm:$0xff]  }
 0x27e   : > { %4417 = vmatprep.mubr.msk.bf16.mxu0 %vm1065_vm5, %v6190_v48  ;;  %v6202_v63 = vsel %vm4933_vm3, %v2129_v5, %v2198_v24  ;;  %v2135_v29 = vshrl.u32 %v6152_v15, 16  ;;  %v2283_v26 = vrot.slane %v2200_v58, 7  ;;  %v6206_v9 = vsel %vm818_vm4, %v2559_v8, %v2560_v30  ;;  %v4556_v58 = vld [vmem:[%s4813_s30 + $0xf0] sm:$0xff]  }
 0x27f   : > { %v6210_v34 = vsel %vm4933_vm3, %v2195_v45, %v2282_v27  ;;  %v2562_v33 = vrot.slane %v6202_v63, 1  ;;  %v2284_v61 = vrot.slane %v2204_v2, 7  ;;  %v2207_v1 = vrot.slane %v2138_v60, 7  ;;  %4418 = vmatmul.mubr.msk.bf16.vlgmr.msra.gmra.mxu0 %vm1065_vm5, %v6206_v9  ;;  %4253 = vmatprep.subr.bf16.mxu1 %v4556_v58 }
 0x280   : > { %v2563_v4 = vrot.slane %v6210_v34, 1  ;;  %v6220_v42 = vsel %vm4933_vm3, %v2132_v0, %v2202_v52  ;;  %v2203_v37 = vrot.slane %v2135_v29, 7  ;;  %v2092_v5 = vmax.f32 %v6122_v62, 0.0  ;;  %4254 = vmatpush3.bf16.msra.mxu1 %v4557_v14 }
 0x281   : > { %v2093_v40 = vmax.f32 %v6125_v50, 0.0  ;;  %v6224_v10 = vpack.c.bf16 %v2090_v32, %v2089_v38  ;;  %2677 = vrot.lane.b32.xlu1 %v6139_v28, %s4699_s20  ;;  %2745 = vrot.lane.b32.xlu0 %v6220_v42, %s4698_s18  ;;  %v2141_v15 = vshrl.u32 %v6172_v7, 16  ;;  %v2208_v3 = vshll.u32 %v6154_v17, 16 }
 0x282   : > { %v6233_v0 = vsel %vm818_vm4, %v2562_v33, %v2563_v4  ;;  %v2206_v36 = vor.u32 %v2204_v2, %v2203_v37  ;;  %v6237_v62 = vsel %vm4933_vm3, %v2199_v31, %v2283_v26  ;;  %v2212_v50 = vshll.u32 %v6172_v7, 16 }
 0x283   : > { %4421 = vmatprep.mubr.msk.bf16.mxu0 %vm1065_vm5, %v6233_v0  ;;  %v2565_v38 = vrot.slane %v6220_v42, 1  ;;  %v6245_v32 = vsel %vm4933_vm3, %v2203_v37, %v2284_v61  ;;  %v2211_v43 = vrot.slane %v2141_v15, 7  ;;  %v2094_v16 = vmax.f32 %v6128_v39, 0.0 }
 0x284   : > { %v2144_v47 = vshrl.u32 %v6196_v41, 16  ;;  %v6252_v31 = vsel %vm4933_vm3, %v2135_v29, %v2206_v36  ;;  %v2210_v54 = vor.u32 %v2208_v3, %v2207_v1  ;;  %v2147_v45 = vshrl.u32 %v6224_v10, 16 }
 0x285   : > { %2743 = vrot.lane.b32.xlu1 %v6202_v63, %s4698_s18  ;;  %2747 = vrot.lane.b32.xlu0 %v6252_v31, %s4698_s18  ;;  %v2566_v7 = vrot.slane %v6237_v62, 1  ;;  %v2568_v2 = vrot.slane %v6252_v31, 1  ;;  %v2214_v39 = vor.u32 %v2212_v50, %v2211_v43  ;;  %v2063_v59 = vadd.f32 %v6010_v51, %v6076_v13 }
 0x286   : > { %v2064_v30 = vadd.f32 %v6010_v51, %v6080_v22  ;;  %v2569_v24 = vrot.slane %v6245_v32, 1  ;;  %v2285_v8 = vrot.slane %v2208_v3, 7  ;;  %v2025_v27 = vmul.f32 %v6005_v23, %v5965_v49 }
 0x287   : > { %v2065_v52 = vadd.f32 %v6010_v51, %v6091_v20  ;;  %v6272_v21 = vsel %vm818_vm4, %v2565_v38, %v2566_v7  ;;  %v2286_v29 = vrot.slane %v2212_v50, 7  ;;  %v6276_v13 = vpack.c.bf16 %v2092_v5, %v2091_v55 }
 0x288   : > { %v2215_v22 = vrot.slane %v2144_v47, 7  ;;  %4422 = vmatmul.mubr.msk.bf16.gmra.mxu0 %vm1065_vm5, %v6272_v21  ;;  %v6283_v49 = vsel %vm818_vm4, %v2568_v2, %v2569_v24  ;;  %v6289_v23 = vsel %vm4933_vm3, %v2138_v60, %v2210_v54  ;;  %v2066_v20 = vadd.f32 %v6010_v51, %v2025_v27 }
 0x289   : > { %v6292_v18 = vpack.c.bf16 %v2094_v16, %v2093_v40  ;;  %2679 = vrot.lane.b32.xlu1 %v6184_v11, %s4699_s20  ;;  %4425 = vmatprep.mubr.msk.bf16.mxu0 %vm1065_vm5, %v6283_v49  ;;  %v6300_v55 = vsel %vm4933_vm3, %v2141_v15, %v2214_v39  ;;  %v2219_v17 = vrot.slane %v2147_v45, 7  ;;  %v2095_v60 = vmax.f32 %v2063_v59, 0.0  ;;  %v4558_v40 = vld [vmem:[%s4813_s30 + $0xe8] sm:$0xff]  }
 0x28a   : > { %v2096_v26 = vmax.f32 %v2064_v30, 0.0  ;;  %v2216_v33 = vshll.u32 %v6196_v41, 16  ;;  %2749 = vrot.lane.b32.xlu0 %v6289_v23, %s4698_s18  ;;  %v6309_v51 = vsel %vm4933_vm3, %v2207_v1, %v2285_v8  ;;  %v2097_v61 = vmax.f32 %v2065_v52, 0.0  ;;  %4255 = vmatprep.subr.bf16.mxu1 %v4558_v40 }
 0x28b   : > { %v2220_v4 = vshll.u32 %v6224_v10, 16  ;;  %v2571_v37 = vrot.slane %v6289_v23, 1  ;;  %v6315_v5 = vsel %vm4933_vm3, %v2211_v43, %v2286_v29  ;;  %v2150_v15 = vshrl.u32 %v6276_v13, 16  ;;  %v4559_v43 = vld [vmem:[%s4813_s30 + $0xa8] sm:$0xff]  }
 0x28c   : > { %v2574_v3 = vrot.slane %v6300_v55, 1  ;;  %v2218_v36 = vor.u32 %v2216_v33, %v2215_v22  ;;  %v2279_v1 = vrot.slane %v2184_v56, 7  ;;  %v2098_v50 = vmax.f32 %v2066_v20, 0.0  ;;  %4256 = vmatpush3.bf16.msra.mxu1 %v4559_v43  ;;  %v4560_v20 = vld [vmem:[%s4813_s30 + $0xe0] sm:$0xff]  }
 0x28d   : > { %v2153_v38 = vshrl.u32 %v6292_v18, 16  ;;  %2681 = vrot.lane.b32.xlu1 %v6202_v63, %s4699_s20  ;;  %v2572_v58 = vrot.slane %v6309_v51, 1  ;;  %v2222_v16 = vor.u32 %v2220_v4, %v2219_v17  ;;  %v2575_v54 = vrot.slane %v6315_v5, 1  ;;  %4257 = vmatprep.subr.bf16.mxu1 %v4560_v20 }
 0x28e   : > { %2751 = vrot.lane.b32.xlu0 %v6300_v55, %s4698_s18  ;;  %v2287_v7 = vrot.slane %v2216_v33, 7  ;;  %v6330_v2 = vpack.c.bf16 %v2096_v26, %v2095_v60  ;;  %v2288_v56 = vrot.slane %v2220_v4, 7  ;;  %v2223_v39 = vrot.slane %v2150_v15, 7  ;;  %v4561_v4 = vld [vmem:[%s4813_s30 + $0xa0] sm:$0xff]  }
 0x28f   : > { %v6333_v53 = vsel %vm818_vm4, %v2571_v37, %v2572_v58  ;;  %v6338_v14 = vsel %vm818_vm4, %v2574_v3, %v2575_v54  ;;  %v6344_v59 = vsel %vm4933_vm3, %v2144_v47, %v2218_v36  ;;  %v6349_v30 = vsel %vm4933_vm3, %v6157_v44, %v2279_v1 }
 0x290   : > { %4426 = vmatmul.mubr.msk.bf16.gmra.mxu0 %vm1065_vm5, %v6333_v53  ;;  %v6351_v24 = vpack.c.bf16 %v2098_v50, %v2097_v61  ;;  %v2556_v41 = vrot.slane %v6180_v46, 1  ;;  %v6362_v47 = vsel %vm4933_vm3, %v2147_v45, %v2222_v16  ;;  %v2227_v8 = vrot.slane %v2153_v38, 7  ;;  %4258 = vmatpush3.bf16.msra.mxu1 %v4561_v4 }
 0x291   : > { %2683 = vrot.lane.b32.xlu1 %v6220_v42, %s4699_s20  ;;  %4429 = vmatprep.mubr.msk.bf16.mxu0 %vm1065_vm5, %v6338_v14  ;;  %7622 = vst [vmem:[#allocation10_spill] sm:$0xff] %v6362_v47  ;;  %v2224_v44 = vshll.u32 %v6276_v13, 16  ;;  %v6369_v27 = vsel %vm4933_vm3, %v2215_v22, %v2287_v7  ;;  %v2228_v52 = vshll.u32 %v6292_v18, 16  ;;  %v2577_v29 = vrot.slane %v6344_v59, 1 }
 0x292   : > { %2753 = vrot.lane.b32.xlu0 %v6344_v59, %s4698_s18  ;;  %v2557_v10 = vrot.slane %v6349_v30, 1  ;;  %v6376_v45 = vsel %vm4933_vm3, %v2219_v17, %v2288_v56  ;;  %v2156_v13 = vshrl.u32 %v6330_v2, 16  ;;  %v2580_v26 = vrot.slane %v6362_v47, 1 }
 0x293   : > { %v2226_v60 = vor.u32 %v2224_v44, %v2223_v39  ;;  %v2159_v33 = vshrl.u32 %v6351_v24, 16  ;;  %v2578_v22 = vrot.slane %v6369_v27, 1  ;;  %v2230_v61 = vor.u32 %v2228_v52, %v2227_v8 }
 0x294   : > { %v2558_v18 = vsel %vm818_vm4, %v2556_v41, %v2557_v10  ;;  %v2581_v17 = vrot.slane %v6376_v45, 1  ;;  %v2289_v37 = vrot.slane %v2224_v44, 7  ;;  %v2290_v3 = vrot.slane %v2228_v52, 7 }
 0x295   : > { %2685 = vrot.lane.b32.xlu1 %v6252_v31, %s4699_s20  ;;  %v6390_v40 = vsel %vm818_vm4, %v2577_v29, %v2578_v22  ;;  %v2231_v36 = vrot.slane %v2156_v13, 7  ;;  %v6394_v1 = vsel %vm4933_vm3, %v2150_v15, %v2226_v60  ;;  %v6407_v58 = vsel %vm4933_vm3, %v2153_v38, %v2230_v61  ;;  %v4562_v38 = vld [vmem:[%s4813_s30 + $0xd8] sm:$0xff]  }
 0x296   : > { %2707 = vrot.lane.b32.xlu0 %v2558_v18, %s4700_s21  ;;  %7623 = vst [vmem:[#allocation9_spill] sm:$0xff] %v6394_v1  ;;  %v6399_v50 = vsel %vm818_vm4, %v2580_v26, %v2581_v17  ;;  %7624 = vst [vmem:[#allocation12_spill] sm:$0xff] %v6407_v58  ;;  %v2235_v16 = vrot.slane %v2159_v33, 7  ;;  %v2232_v15 = vshll.u32 %v6330_v2, 16  ;;  %v6414_v43 = vsel %vm4933_vm3, %v2223_v39, %v2289_v37  ;;  %v4564_v17 = vld [vmem:[%s4813_s30 + $0xd0] sm:$0xff]  }
 0x297   : > { %v2236_v54 = vshll.u32 %v6351_v24, 16  ;;  %v2583_v7 = vrot.slane %v6394_v1, 1  ;;  %v6420_v56 = vsel %vm4933_vm3, %v2227_v8, %v2290_v3  ;;  %v2162_v41 = vshrl.u32 %v6103_v35, 16  ;;  %4259 = vmatprep.subr.bf16.mxu1 %v4562_v38  ;;  %v4563_v24 = vld [vmem:[%s4813_s30 + $0x98] sm:$0xff]   ;;  %v4565_v3 = vld [vmem:[%s4813_s30 + $0x90] sm:$0xff]  }
 0x298   : > { %4430 = vmatmul.mubr.msk.bf16.gmra.mxu0 %vm1065_vm5, %v6390_v40  ;;  %v2234_v44 = vor.u32 %v2232_v15, %v2231_v36  ;;  %v2586_v2 = vrot.slane %v6407_v58, 1  ;;  %v2584_v39 = vrot.slane %v6414_v43, 1  ;;  %v2587_v8 = vrot.slane %v6420_v56, 1  ;;  %4260 = vmatpush3.bf16.msra.mxu1 %v4563_v24  ;;  %v6486_v38 = vld [vmem:[%s4813_s30 + $0x118] sm:$0xff]  }
 0x299   : > { %2687 = vrot.lane.b32.xlu1 %v6289_v23, %s4699_s20  ;;  %4433 = vmatprep.mubr.msk.bf16.mxu0 %vm1065_vm5, %v6399_v50  ;;  %v2238_v52 = vor.u32 %v2236_v54, %v2235_v16  ;;  %v2291_v29 = vrot.slane %v2232_v15, 7  ;;  %v2292_v20 = vrot.slane %v2236_v54, 7  ;;  %v2239_v60 = vrot.slane %v2162_v41, 7 }
 0x29a   : > { %2709 = vrot.lane.b32.xlu0 %v6190_v48, %s4700_s21  ;;  %v6433_v10 = vsel %vm818_vm4, %v2583_v7, %v2584_v39  ;;  %v6442_v26 = vsel %vm818_vm4, %v2586_v2, %v2587_v8  ;;  %v2240_v61 = vshll.u32 %v6103_v35, 16  ;;  %4261 = vmatprep.subr.bf16.mxu1 %v4564_v17  ;;  %v2346_v7 = vshll.u32 %v6139_v28, 16 }
 0x29b   : > { %v6449_v22 = vsel %vm4933_vm3, %v2159_v33, %v2238_v52  ;;  %v2351_v52 = vshll.u32 %v6166_v6, 16  ;;  %v2368_v17 = vshrl.u32 %v6184_v11, 16 }
 0x29c   : > { %7626 = vst [vmem:[#allocation14_spill] sm:$0xff] %v6449_v22  ;;  %v2242_v37 = vor.u32 %v2240_v61, %v2239_v60  ;;  %v2592_v33 = vrot.slane %v6449_v22, 1  ;;  %v2293_v15 = vrot.slane %v2240_v61, 7  ;;  %4262 = vmatpush3.bf16.msra.mxu1 %v4565_v3  ;;  %v2348_v2 = vrot.slane %v2346_v7, 1 }
 0x29d   : > { %2645 = vrot.lane.b32.xlu1 %v6190_v48, %s4698_s18  ;;  %v6437_v48 = vsel %vm4933_vm3, %v2156_v13, %v2234_v44  ;;  %v6456_v13 = vsel %vm4933_vm3, %v2231_v36, %v2291_v29  ;;  %4449 = vmatprep.subr.bf16.mxu1 %v6486_v38  ;;  %v2358_v29 = vshll.u32 %v6180_v46, 16  ;;  %v2382_v3 = vshll.u32 %v6202_v63, 16 }
 0x29e   : > { %2711 = vrot.lane.b32.xlu0 %v6206_v9, %s4700_s21  ;;  %7625 = vst [vmem:[#allocation13_spill] sm:$0xff] %v6437_v48  ;;  %v2589_v4 = vrot.slane %v6437_v48, 1  ;;  %v2590_v35 = vrot.slane %v6456_v13, 1  ;;  %v6477_v54 = vsel %vm4933_vm3, %v2162_v41, %v2242_v37  ;;  %v6497_v41 = vsel %vm4933_vm3, %v2239_v60, %v2293_v15 }
 0x29f   : > { %v2595_v44 = vrot.slane %v6477_v54, 1  ;;  %v2596_v39 = vrot.slane %v6497_v41, 1  ;;  %v2360_v60 = vrot.slane %v2358_v29, 1  ;;  %v2375_v37 = vshll.u32 %v6170_v25, 16 }
 0x2a0   : > { %4434 = vmatmul.mubr.msk.bf16.gmra.mxu0 %vm1065_vm5, %v6433_v10  ;;  %v2399_v29 = vshll.u32 %v6237_v62, 16  ;;  %v2404_v62 = vshrl.u32 %v6252_v31, 16 }
 0x2a1   : > { %2647 = vrot.lane.b32.xlu1 %v2558_v18, %s4698_s18  ;;  %4437 = vmatprep.mubr.msk.bf16.mxu0 %vm1065_vm5, %v6442_v26  ;;  %v6461_v18 = vsel %vm4933_vm3, %v2235_v16, %v2292_v20  ;;  %v6473_v16 = vsel %vm818_vm4, %v2589_v4, %v2590_v35  ;;  %v6508_v24 = vsel %vm818_vm4, %v2595_v44, %v2596_v39  ;;  %v2353_v20 = vrot.slane %v2351_v52, 1 }
 0x2a2   : > { %2713 = vrot.lane.b32.xlu0 %v6233_v0, %s4700_s21  ;;  %v2593_v36 = vrot.slane %v6461_v18, 1  ;;  %v2356_v4 = vshrl.u32 %v6180_v46, 16  ;;  %v2377_v15 = vrot.slane %v2375_v37, 1  ;;  %v2387_v44 = vshll.u32 %v6210_v34, 16 }
 0x2a3   : > { %v2394_v39 = vshll.u32 %v6220_v42, 16  ;;  %v2392_v34 = vshrl.u32 %v6220_v42, 16 }
 0x2a5   : > { %2649 = vrot.lane.b32.xlu1 %v6206_v9, %s4698_s18  ;;  %v6482_v9 = vsel %vm818_vm4, %v2592_v33, %v2593_v36  ;;  %v2361_v33 = vor.u32 %v2360_v60, %v2356_v4  ;;  %v2411_v4 = vshll.u32 %v6245_v32, 16  ;;  %v2416_v32 = vshrl.u32 %v6289_v23, 16 }
 0x2a6   : > { %2715 = vrot.lane.b32.xlu0 %v6272_v21, %s4700_s21 }
 0x2a7   : > { %v2413_v37 = vrot.slane %v2411_v4, 1 }
 0x2a8   : > { %4438 = vmatmul.mubr.msk.bf16.gmra.mxu0 %vm1065_vm5, %v6473_v16 }
 0x2a9   : > { %2651 = vrot.lane.b32.xlu1 %v6233_v0, %s4698_s18  ;;  %4441 = vmatprep.mubr.msk.bf16.mxu0 %vm1065_vm5, %v6482_v9  ;;  %v2344_v0 = vshrl.u32 %v6139_v28, 16 }
 0x2aa   : > { %2717 = vrot.lane.b32.xlu0 %v6283_v49, %s4700_s21 }
 0x2ab   : > { %v2349_v8 = vor.u32 %v2348_v2, %v2344_v0  ;;  %v2389_v0 = vrot.slane %v2387_v44, 1  ;;  %v2435_v44 = vshll.u32 %v6315_v5, 16  ;;  %v2440_v5 = vshrl.u32 %v6344_v59, 16 }
 0x2ad   : > { %2653 = vrot.lane.b32.xlu1 %v6272_v21, %s4698_s18  ;;  %v2370_v21 = vshll.u32 %v6184_v11, 16  ;;  %v6519_v6 = vsel %vm607_vm6, %v2349_v8, %v2353_v20  ;;  %v2396_v8 = vrot.slane %v2394_v39, 1  ;;  %v2406_v20 = vshll.u32 %v6252_v31, 16 }
 0x2ae   : > { %2719 = vrot.lane.b32.xlu0 %v6333_v53, %s4700_s21  ;;  %v2442_v39 = vshll.u32 %v6344_v59, 16 }
 0x2af   : > { %v2372_v61 = vrot.slane %v2370_v21, 1  ;;  %v2397_v21 = vor.u32 %v2396_v8, %v2392_v34 }
 0x2b0   : > { %4442 = vmatmul.mubr.msk.bf16.gmra.mxu0 %vm1065_vm5, %v6508_v24  ;;  %v2444_v34 = vrot.slane %v2442_v39, 1 }
 0x2b1   : > { %2655 = vrot.lane.b32.xlu1 %v6283_v49, %s4698_s18  ;;  %v2363_v49 = vshll.u32 %v6349_v30, 16  ;;  %v2373_v35 = vor.u32 %v2372_v61, %v2368_v17  ;;  %v2384_v30 = vrot.slane %v2382_v3, 1  ;;  %v2408_v61 = vrot.slane %v2406_v20, 1 }
 0x2b2   : > { %2721 = vrot.lane.b32.xlu0 %v6338_v14, %s4700_s21  ;;  %v2418_v17 = vshll.u32 %v6289_v23, 16  ;;  %v2454_v20 = vshll.u32 %v6362_v47, 16 }
 0x2b3   : > { %v2365_v36 = vrot.slane %v2363_v49, 1  ;;  %v6540_v25 = vsel %vm607_vm6, %v2373_v35, %v2377_v15  ;;  %v2409_v49 = vor.u32 %v2408_v61, %v2404_v62 }
 0x2b4   : > { %v2420_v35 = vrot.slane %v2418_v17, 1  ;;  %v2456_v62 = vrot.slane %v2454_v20, 1  ;;  %v2459_v17 = vshll.u32 %v6376_v45, 16  ;;  %v2483_v20 = vshll.u32 %v6420_v56, 16 }
 0x2b5   : > { %2615 = vrot.lane.b32.xlu1 %v6519_v6, %s4700_s21  ;;  %v6535_v7 = vsel %vm607_vm6, %v2361_v33, %v2365_v36  ;;  %v6582_v33 = vsel %vm607_vm6, %v2409_v49, %v2413_v37  ;;  %v2430_v36 = vshll.u32 %v6300_v55, 16  ;;  %v2452_v49 = vshrl.u32 %v6362_v47, 16 }
 0x2b6   : > { %2769 = vrot.lane.b32.xlu0 %v6519_v6, %s4699_s20  ;;  %v2421_v3 = vor.u32 %v2420_v35, %v2416_v32  ;;  %v2466_v35 = vshll.u32 %v6394_v1, 16 }
 0x2b7   : > { %v2457_v37 = vor.u32 %v2456_v62, %v2452_v49  ;;  %v2490_v49 = vshll.u32 %v6437_v48, 16 }
 0x2b8   : > { %v2468_v45 = vrot.slane %v2466_v35, 1 }
 0x2b9   : > { %2657 = vrot.lane.b32.xlu1 %v6333_v53, %s4698_s18  ;;  %v2380_v53 = vshrl.u32 %v6202_v63, 16 }
 0x2ba   : > { %2723 = vrot.lane.b32.xlu0 %v6390_v40, %s4700_s21 }
 0x2bb   : > { %v2385_v2 = vor.u32 %v2384_v30, %v2380_v53  ;;  %v2432_v53 = vrot.slane %v2430_v36, 1 }
 0x2bd   : > { %2617 = vrot.lane.b32.xlu1 %v6535_v7, %s4700_s21  ;;  %v6554_v52 = vsel %vm607_vm6, %v2385_v2, %v2389_v0  ;;  %v2437_v0 = vrot.slane %v2435_v44, 1 }
 0x2be   : > { %2771 = vrot.lane.b32.xlu0 %v6540_v25, %s4699_s20 }
 0x2c1   : > { %2689 = vrot.lane.b32.xlu1 %v6300_v55, %s4699_s20 }
 0x2c2   : > { %2755 = vrot.lane.b32.xlu0 %v6362_v47, %s4698_s18 }
 0x2c5   : > { %2659 = vrot.lane.b32.xlu1 %v6338_v14, %s4698_s18  ;;  %v2401_v14 = vrot.slane %v2399_v29, 1 }
 0x2c6   : > { %2773 = vrot.lane.b32.xlu0 %v6554_v52, %s4699_s20 }
 0x2c7   : > { %v6568_v60 = vsel %vm607_vm6, %v2397_v21, %v2401_v14  ;;  %v2445_v21 = vor.u32 %v2444_v34, %v2440_v5 }
 0x2c9   : > { %2691 = vrot.lane.b32.xlu1 %v6344_v59, %s4699_s20 }
 0x2ca   : > { %2725 = vrot.lane.b32.xlu0 %v6399_v50, %s4700_s21 }
 0x2cd   : > { %2619 = vrot.lane.b32.xlu1 %v6540_v25, %s4700_s21 }
 0x2ce   : > { %2775 = vrot.lane.b32.xlu0 %v6568_v60, %s4699_s20 }
 0x2d1   : > { %2661 = vrot.lane.b32.xlu1 %v6390_v40, %s4698_s18  ;;  %v2423_v40 = vshll.u32 %v6309_v51, 16  ;;  %v2428_v51 = vshrl.u32 %v6300_v55, 16 }
 0x2d2   : > { %2757 = vrot.lane.b32.xlu0 %v6394_v1, %s4698_s18 }
 0x2d3   : > { %v2425_v15 = vrot.slane %v2423_v40, 1  ;;  %v2433_v2 = vor.u32 %v2432_v53, %v2428_v51  ;;  %v2464_v53 = vshrl.u32 %v6394_v1, 16  ;;  %v2471_v51 = vshll.u32 %v6414_v43, 16 }
 0x2d5   : > { %2621 = vrot.lane.b32.xlu1 %v6554_v52, %s4700_s21  ;;  %v6596_v30 = vsel %vm607_vm6, %v2421_v3, %v2425_v15  ;;  %v6610_v8 = vsel %vm607_vm6, %v2433_v2, %v2437_v0  ;;  %v2461_v3 = vrot.slane %v2459_v17, 1  ;;  %v2469_v44 = vor.u32 %v2468_v45, %v2464_v53 }
 0x2d6   : > { %2777 = vrot.lane.b32.xlu0 %v6582_v33, %s4699_s20  ;;  %v2478_v2 = vshll.u32 %v6407_v58, 16  ;;  %v2473_v0 = vrot.slane %v2471_v51, 1  ;;  %v2488_v45 = vshrl.u32 %v6437_v48, 16  ;;  %v2495_v53 = vshll.u32 %v6456_v13, 16 }
 0x2d7   : > { %v6648_v36 = vsel %vm607_vm6, %v2457_v37, %v2461_v3  ;;  %v2485_v37 = vrot.slane %v2483_v20, 1  ;;  %v2492_v3 = vrot.slane %v2490_v49, 1 }
 0x2d8   : > { %v6670_v5 = vsel %vm607_vm6, %v2469_v44, %v2473_v0  ;;  %v2480_v43 = vrot.slane %v2478_v2, 1  ;;  %v2502_v2 = vshll.u32 %v6449_v22, 16  ;;  %v2165_v0 = vshrl.u32 %v6014_v19, 16 }
 0x2d9   : > { %2693 = vrot.lane.b32.xlu1 %v6362_v47, %s4699_s20  ;;  %7627 = vst [vmem:[#allocation15_spill] sm:$0xff] %v6670_v5  ;;  %v2493_v44 = vor.u32 %v2492_v3, %v2488_v45  ;;  %v2500_v3 = vshrl.u32 %v6449_v22, 16  ;;  %v2507_v45 = vshll.u32 %v6461_v18, 16 }
 0x2da   : > { %2727 = vrot.lane.b32.xlu0 %v6433_v10, %s4700_s21  ;;  %v2243_v49 = vrot.slane %v2165_v0, 7 }
 0x2dd   : > { %2623 = vrot.lane.b32.xlu1 %v6568_v60, %s4700_s21 }
 0x2de   : > { %2779 = vrot.lane.b32.xlu0 %v6596_v30, %s4699_s20 }
 0x2e1   : > { %2663 = vrot.lane.b32.xlu1 %v6399_v50, %s4698_s18  ;;  %v2447_v50 = vshll.u32 %v6369_v27, 16 }
 0x2e2   : > { %2759 = vrot.lane.b32.xlu0 %v6407_v58, %s4698_s18 }
 0x2e3   : > { %v2449_v14 = vrot.slane %v2447_v50, 1 }
 0x2e5   : > { %2625 = vrot.lane.b32.xlu1 %v6582_v33, %s4700_s21  ;;  %v6626_v61 = vsel %vm607_vm6, %v2445_v21, %v2449_v14  ;;  %v2476_v21 = vshrl.u32 %v6407_v58, 16 }
 0x2e6   : > { %2781 = vrot.lane.b32.xlu0 %v6610_v8, %s4699_s20 }
 0x2e7   : > { %v6618_v29 = vpop.permute.xlu0 %2739  ;;  %v2481_v62 = vor.u32 %v2480_v43, %v2476_v21  ;;  %v2497_v21 = vrot.slane %v2495_v53, 1  ;;  %v2244_v53 = vshll.u32 %v6014_v19, 16 }
 0x2e9   : > { %2695 = vrot.lane.b32.xlu1 %v6394_v1, %s4699_s20  ;;  %v6692_v56 = vsel %vm607_vm6, %v2481_v62, %v2485_v37  ;;  %v6713_v13 = vsel %vm607_vm6, %v2493_v44, %v2497_v21  ;;  %v2504_v62 = vrot.slane %v2502_v2, 1  ;;  %v2514_v44 = vshll.u32 %v6477_v54, 16 }
 0x2ea   : > { %2729 = vrot.lane.b32.xlu0 %v6442_v26, %s4700_s21  ;;  %7628 = vst [vmem:[#allocation16_spill] sm:$0xff] %v6692_v56  ;;  %7629 = vst [vmem:[#allocation17_spill] sm:$0xff] %v6713_v13  ;;  %v2246_v2 = vor.u32 %v2244_v53, %v2243_v49 }
 0x2eb   : > { %v2516_v18 = vrot.slane %v2514_v44, 1 }
 0x2ed   : > { %2627 = vrot.lane.b32.xlu1 %v6596_v30, %s4700_s21 }
 0x2ee   : > { %2783 = vrot.lane.b32.xlu0 %v6626_v61, %s4699_s20  ;;  %v6632_v4 = vpop.permute.xlu0 %2741 }
 0x2ef   : > { %v6630_v27 = vpop.permute.xlu1 %2675 }
 0x2f1   : > { %2665 = vrot.lane.b32.xlu1 %v6433_v10, %s4698_s18 }
 0x2f2   : > { %2761 = vrot.lane.b32.xlu0 %v6437_v48, %s4698_s18 }
 0x2f3   : > { %v6641_v32 = vpop.permute.xlu1 %2677  ;;  %v6643_v40 = vpop.permute.xlu0 %2745 }
 0x2f5   : > { %2629 = vrot.lane.b32.xlu1 %v6610_v8, %s4700_s21 }
 0x2f6   : > { %2785 = vrot.lane.b32.xlu0 %v6648_v36, %s4699_s20 }
 0x2f7   : > { %v6652_v10 = vpop.permute.xlu1 %2743  ;;  %v6654_v15 = vpop.permute.xlu0 %2747 }
 0x2f9   : > { %2697 = vrot.lane.b32.xlu1 %v6407_v58, %s4699_s20  ;;  %v2509_v58 = vrot.slane %v2507_v45, 1  ;;  %v2519_v45 = vshll.u32 %v6497_v41, 16 }
 0x2fa   : > { %2731 = vrot.lane.b32.xlu0 %v6473_v16, %s4700_s21 }
 0x2fb   : > { %v6663_v39 = vpop.permute.xlu1 %2679 }
 0x2fc   : > { %v6665_v34 = vpop.permute.xlu0 %2749 }
 0x2fd   : > { %2631 = vrot.lane.b32.xlu1 %v6626_v61, %s4700_s21 }
 0x2fe   : > { %2787 = vrot.lane.b32.xlu0 %v6670_v5, %s4699_s20 }
 0x2ff   : > { %v6674_v50 = vpop.permute.xlu1 %2681 }
 0x300   : > { %v6678_v14 = vpop.permute.xlu0 %2751 }
 0x301   : > { %2667 = vrot.lane.b32.xlu1 %v6442_v26, %s4698_s18 }
 0x302   : > { %2763 = vrot.lane.b32.xlu0 %v6449_v22, %s4698_s18 }
 0x303   : > { %v6685_v17 = vpop.permute.xlu1 %2683 }
 0x304   : > { %v6687_v35 = vpop.permute.xlu0 %2753 }
 0x305   : > { %2633 = vrot.lane.b32.xlu1 %v6648_v36, %s4700_s21 }
 0x306   : > { %2789 = vrot.lane.b32.xlu0 %v6692_v56, %s4699_s20 }
 0x307   : > { %v6696_v26 = vpop.permute.xlu1 %2685 }
 0x308   : > { %v2708_v51 = vpop.permute.xlu0 %2707 }
 0x309   : > { %2699 = vrot.lane.b32.xlu1 %v6437_v48, %s4699_s20  ;;  %v2505_v48 = vor.u32 %v2504_v62, %v2500_v3  ;;  %v2512_v3 = vshrl.u32 %v6477_v54, 16 }
 0x30a   : > { %2733 = vrot.lane.b32.xlu0 %v6482_v9, %s4700_s21 }
 0x30b   : > { %v6706_v43 = vpop.permute.xlu1 %2687  ;;  %v6734_v19 = vsel %vm607_vm6, %v2505_v48, %v2509_v58  ;;  %v2517_v58 = vor.u32 %v2516_v18, %v2512_v3 }
 0x30c   : > { %v6708_v20 = vpop.permute.xlu0 %2709 }
 0x30d   : > { %2635 = vrot.lane.b32.xlu1 %v6670_v5, %s4700_s21  ;;  %v2294_v5 = vrot.slane %v2244_v53, 7 }
 0x30e   : > { %2791 = vrot.lane.b32.xlu0 %v6713_v13, %s4699_s20 }
 0x30f   : > { %v2646_v37 = vpop.permute.xlu1 %2645 }
 0x310   : > { %v6719_v12 = vpop.permute.xlu0 %2711 }
 0x311   : > { %2669 = vrot.lane.b32.xlu1 %v6473_v16, %s4698_s18  ;;  %v2326_v16 = vsel %vm4933_vm3, %v2165_v0, %v2246_v2  ;;  %v2521_v0 = vrot.slane %v2519_v45, 1 }
 0x312   : > { %2765 = vrot.lane.b32.xlu0 %v6477_v54, %s4698_s18  ;;  %v2601_v48 = vshll.u32 %v2326_v16, 16  ;;  %v2599_v3 = vshrl.u32 %v2326_v16, 16 }
 0x313   : > { %v6727_v21 = vpop.permute.xlu1 %2647  ;;  %v6759_v41 = vsel %vm607_vm6, %v2517_v58, %v2521_v0 }
 0x314   : > { %v6729_v1 = vpop.permute.xlu0 %2713  ;;  %v2603_v53 = vrot.slane %v2601_v48, 1  ;;  %v2909_v48 = vsel %vm1065_vm5, %v6535_v7, %v2708_v51 }
 0x315   : > { %2637 = vrot.lane.b32.xlu1 %v6692_v56, %s4700_s21  ;;  %v2342_v56 = vsel %vm4933_vm3, %v2243_v49, %v2294_v5 }
 0x316   : > { %2793 = vrot.lane.b32.xlu0 %v6734_v19, %s4699_s20  ;;  %v2604_v57 = vor.u32 %v2603_v53, %v2599_v3  ;;  %v2613_v3 = vrot.slane %v2342_v56, 1 }
 0x317   : > { %v6740_v62 = vpop.permute.xlu1 %2649 }
 0x318   : > { %v6744_v47 = vpop.permute.xlu0 %2715 }
 0x319   : > { %2701 = vrot.lane.b32.xlu1 %v6449_v22, %s4699_s20  ;;  %v2606_v22 = vshll.u32 %v2342_v56, 16 }
 0x31a   : > { %2735 = vrot.lane.b32.xlu0 %v6508_v24, %s4700_s21 }
 0x31b   : > { %v6750_v44 = vpop.permute.xlu1 %2651  ;;  %v2608_v49 = vrot.slane %v2606_v22, 1 }
 0x31c   : > { %v6752_v2 = vpop.permute.xlu0 %2717 }
 0x31d   : > { %2639 = vrot.lane.b32.xlu1 %v6713_v13, %s4700_s21  ;;  %v6779_v13 = vsel %vm607_vm6, %v2604_v57, %v2608_v49 }
 0x31e   : > { %2795 = vrot.lane.b32.xlu0 %v6759_v41, %s4699_s20 }
 0x31f   : > { %v6763_v18 = vpop.permute.xlu1 %2653 }
 0x320   : > { %v6765_v45 = vpop.permute.xlu0 %2719 }
 0x321   : > { %2671 = vrot.lane.b32.xlu1 %v6482_v9, %s4698_s18  ;;  %v2612_v9 = vrot.slane %v2326_v16, 1 }
 0x322   : > { %2767 = vrot.lane.b32.xlu0 %v2326_v16, %s4698_s18 }
 0x323   : > { %v6770_v5 = vpop.permute.xlu1 %2655  ;;  %v6795_v49 = vsel %vm818_vm4, %v2612_v9, %v2613_v3 }
 0x324   : > { %v2722_v58 = vpop.permute.xlu0 %2721 }
 0x325   : > { %2641 = vrot.lane.b32.xlu1 %v6734_v19, %s4700_s21  ;;  %v2930_v0 = vsel %vm1065_vm5, %v6610_v8, %v2722_v58  ;;  %v2956_v8 = vsel %vm1096_vm7, %v2909_v48, %v6618_v29  ;;  %v4571_v58 = vld [vmem:[%s4813_s30 + $0x110] sm:$0xff]  }
 0x326   : > { %2797 = vrot.lane.b32.xlu0 %v6779_v13, %s4699_s20  ;;  %v6785_v22 = vsel %vm1096_vm7, %v2930_v0, %v6687_v35 }
 0x327   : > { %v2616_v53 = vpop.permute.xlu1 %2615 }
 0x328   : > { %v2800_v7 = vsel %vm1065_vm5, %v6139_v28, %v2616_v53  ;;  %v2770_v51 = vpop.permute.xlu0 %2769 }
 0x329   : > { %v2830_v57 = vsel %vm1096_vm7, %v2800_v7, %v2646_v37  ;;  %2703 = vrot.lane.b32.xlu1 %v6477_v54, %s4699_s20  ;;  %v2987_v35 = vsel %vm1127_vm8, %v2956_v8, %v2770_v51  ;;  %v2912_v37 = vsel %vm1065_vm5, %v6519_v6, %v6708_v20 }
 0x32a   : > { %2737 = vrot.lane.b32.xlu0 %v6795_v49, %s4700_s21  ;;  %3255 = vmatprep.mubr.bf16.mxu1 %v2987_v35  ;;  %v2860_v28 = vsel %vm1127_vm8, %v2830_v57, %v6630_v27 }
 0x32b   : > { %v6802_v56 = vpop.permute.xlu1 %2657  ;;  %3256 = vmatmul.mubr.bf16.vlgmr.msra.gmra.mxu1 %v2860_v28 }
 0x32c   : > { %4451 = vmatpush3.bf16.msra.mxu1 %v6486_v38  ;;  %v6805_v29 = vpop.permute.xlu0 %2723  ;;  %v2958_v38 = vsel %vm1096_vm7, %v2912_v37, %v6632_v4  ;;  %v2915_v4 = vsel %vm1065_vm5, %v6540_v25, %v6719_v12  ;;  %v2918_v12 = vsel %vm1065_vm5, %v6554_v52, %v6729_v1 }
 0x32d   : > { %2643 = vrot.lane.b32.xlu1 %v6759_v41, %s4700_s21  ;;  %4450 = vmatprep.subr.bf16.mxu1 %v4571_v58  ;;  %v2960_v7 = vsel %vm1096_vm7, %v2915_v4, %v6652_v10  ;;  %v2962_v28 = vsel %vm1096_vm7, %v2918_v12, %v6643_v40 }
 0x32e   : > { %2673 = vrot.lane.b32.xlu0 %v6508_v24, %s4698_s18 }
 0x32f   : > { %v2618_v27 = vpop.permute.xlu1 %2617 }
 0x330   : > { %v2802_v48 = vsel %vm1065_vm5, %v6180_v46, %v2618_v27  ;;  %v2772_v0 = vpop.permute.xlu0 %2771  ;;  %4452 = vmatpush3.bf16.msra.mxu1 %v4571_v58 }
 0x331   : > { %2705 = vrot.lane.b32.xlu1 %v2326_v16, %s4699_s20  ;;  %v2990_v6 = vsel %vm1127_vm8, %v2958_v38, %v2772_v0  ;;  %v2832_v20 = vsel %vm1096_vm7, %v2802_v48, %v6727_v21 }
 0x332   : > { %3263 = vmatprep.mubr.bf16.mxu1 %v2990_v6  ;;  %v2863_v9 = vsel %vm1127_vm8, %v2832_v20, %v6641_v32  ;;  %v2866_v32 = vsel %vm1127_vm8, %v2830_v57, %v6663_v39 }
 0x333   : > { %v6825_v53 = vpop.permute.xlu1 %2689  ;;  %3264 = vmatmul.mubr.bf16.gmra.mxu1 %v2863_v9 }
 0x334   : > { %v6827_v46 = vpop.permute.xlu0 %2755 }
 0x337   : > { %v6832_v3 = vpop.permute.xlu1 %2659 }
 0x338   : > { %v2774_v16 = vpop.permute.xlu0 %2773 }
 0x339   : > { %v2993_v21 = vsel %vm1127_vm8, %v2960_v7, %v2774_v16 }
 0x33a   : > { %3271 = vmatprep.mubr.bf16.mxu1 %v2993_v21 }
 0x33b   : > { %v6839_v51 = vpop.permute.xlu1 %2691  ;;  %3272 = vmatmul.mubr.bf16.gmra.mxu1 %v2866_v32 }
 0x33c   : > { %v6841_v8 = vpop.permute.xlu0 %2725 }
 0x33f   : > { %v2620_v25 = vpop.permute.xlu1 %2619 }
 0x340   : > { %v2804_v35 = vsel %vm1065_vm5, %v6184_v11, %v2620_v25  ;;  %v2776_v10 = vpop.permute.xlu0 %2775  ;;  %v2921_v11 = vsel %vm1065_vm5, %v6568_v60, %v6744_v47 }
 0x341   : > { %v2996_v37 = vsel %vm1127_vm8, %v2962_v28, %v2776_v10  ;;  %v2834_v39 = vsel %vm1096_vm7, %v2804_v35, %v6740_v62  ;;  %v2964_v62 = vsel %vm1096_vm7, %v2921_v11, %v6654_v15  ;;  %v2933_v10 = vsel %vm1065_vm5, %v6626_v61, %v6805_v29 }
 0x342   : > { %3279 = vmatprep.mubr.bf16.mxu1 %v2996_v37  ;;  %v2869_v57 = vsel %vm1127_vm8, %v2834_v39, %v6674_v50  ;;  %v2936_v29 = vsel %vm1065_vm5, %v6648_v36, %v6841_v8 }
 0x343   : > { %v6855_v58 = vpop.permute.xlu1 %2661  ;;  %3280 = vmatmul.mubr.bf16.gmra.mxu1 %v2869_v57 }
 0x344   : > { %v2758_v1 = vpop.permute.xlu0 %2757 }
 0x347   : > { %v2622_v52 = vpop.permute.xlu1 %2621 }
 0x348   : > { %v2806_v40 = vsel %vm1065_vm5, %v6202_v63, %v2622_v52  ;;  %v2778_v27 = vpop.permute.xlu0 %2777  ;;  %v2924_v63 = vsel %vm1065_vm5, %v6582_v33, %v6752_v2 }
 0x349   : > { %v2999_v48 = vsel %vm1127_vm8, %v2964_v62, %v2778_v27  ;;  %v2836_v50 = vsel %vm1096_vm7, %v2806_v40, %v6750_v44  ;;  %v2966_v20 = vsel %vm1096_vm7, %v2924_v63, %v6665_v34 }
 0x34a   : > { %3287 = vmatprep.mubr.bf16.mxu1 %v2999_v48  ;;  %v2872_v0 = vsel %vm1127_vm8, %v2836_v50, %v6685_v17  ;;  %v7630_v48 = vld [vmem:[#allocation15_spill] sm:$0xff]  ;;  %v7631_v50 = vld [vmem:[#allocation10_spill] sm:$0xff] }
 0x34b   : > { %v2694_v38 = vpop.permute.xlu1 %2693  ;;  %3288 = vmatmul.mubr.bf16.gmra.mxu1 %v2872_v0 }
 0x34c   : > { %v2728_v47 = vpop.permute.xlu0 %2727 }
 0x34d   : > { %v2939_v36 = vsel %vm1065_vm5, %v7630_v48, %v2728_v47 }
 0x34f   : > { %v2624_v60 = vpop.permute.xlu1 %2623 }
 0x350   : > { %v2808_v15 = vsel %vm1065_vm5, %v6220_v42, %v2624_v60  ;;  %v2780_v6 = vpop.permute.xlu0 %2779  ;;  %v2927_v42 = vsel %vm1065_vm5, %v6596_v30, %v6765_v45 }
 0x351   : > { %v3002_v44 = vsel %vm1127_vm8, %v2966_v20, %v2780_v6  ;;  %v2838_v17 = vsel %vm1096_vm7, %v2808_v15, %v6763_v18  ;;  %v2968_v7 = vsel %vm1096_vm7, %v2927_v42, %v6678_v14  ;;  %v7632_v6 = vld [vmem:[#allocation16_spill] sm:$0xff] }
 0x352   : > { %3295 = vmatprep.mubr.bf16.mxu1 %v3002_v44  ;;  %v2875_v9 = vsel %vm1127_vm8, %v2838_v17, %v6696_v26  ;;  %v7633_v17 = vld [vmem:[#allocation9_spill] sm:$0xff] }
 0x353   : > { %v2664_v4 = vpop.permute.xlu1 %2663  ;;  %3296 = vmatmul.mubr.bf16.gmra.mxu1 %v2875_v9 }
 0x354   : > { %v2760_v33 = vpop.permute.xlu0 %2759 }
 0x357   : > { %v2626_v2 = vpop.permute.xlu1 %2625 }
 0x358   : > { %v2810_v34 = vsel %vm1065_vm5, %v6252_v31, %v2626_v2  ;;  %v2782_v16 = vpop.permute.xlu0 %2781 }
 0x359   : > { %v3005_v18 = vsel %vm1127_vm8, %v2968_v7, %v2782_v16  ;;  %v2840_v26 = vsel %vm1096_vm7, %v2810_v34, %v6770_v5  ;;  %v7634_v7 = vld [vmem:[#allocation17_spill] sm:$0xff] }
 0x35a   : > { %3303 = vmatprep.mubr.bf16.mxu1 %v3005_v18  ;;  %v2878_v21 = vsel %vm1127_vm8, %v2840_v26, %v6706_v43 }
 0x35b   : > { %v2696_v32 = vpop.permute.xlu1 %2695  ;;  %3304 = vmatmul.mubr.bf16.gmra.mxu1 %v2878_v21 }
 0x35c   : > { %v2730_v30 = vpop.permute.xlu0 %2729 }
 0x35d   : > { %v2942_v47 = vsel %vm1065_vm5, %v7632_v6, %v2730_v30 }
 0x35f   : > { %v2628_v45 = vpop.permute.xlu1 %2627 }
 0x360   : > { %v2812_v31 = vsel %vm1065_vm5, %v6289_v23, %v2628_v45  ;;  %v2784_v12 = vpop.permute.xlu0 %2783  ;;  %v2972_v23 = vsel %vm1096_vm7, %v2933_v10, %v6827_v46 }
 0x361   : > { %v3008_v14 = vsel %vm1127_vm8, %v6785_v22, %v2784_v12  ;;  %v2842_v25 = vsel %vm1096_vm7, %v2812_v31, %v6802_v56 }
 0x362   : > { %3311 = vmatprep.mubr.bf16.mxu1 %v3008_v14  ;;  %v2881_v5 = vsel %vm1127_vm8, %v2842_v25, %v6825_v53 }
 0x363   : > { %v2666_v35 = vpop.permute.xlu1 %2665  ;;  %3312 = vmatmul.mubr.bf16.gmra.mxu1 %v2881_v5 }
 0x364   : > { %v2762_v43 = vpop.permute.xlu0 %2761 }
 0x365   : > { %v2978_v44 = vsel %vm1096_vm7, %v2942_v47, %v2762_v43 }
 0x367   : > { %v2630_v28 = vpop.permute.xlu1 %2629 }
 0x368   : > { %v2814_v22 = vsel %vm1065_vm5, %v6300_v55, %v2630_v28  ;;  %v2786_v37 = vpop.permute.xlu0 %2785  ;;  %v2974_v55 = vsel %vm1096_vm7, %v2936_v29, %v2758_v1  ;;  %v2976_v1 = vsel %vm1096_vm7, %v2939_v36, %v2760_v33  ;;  %v7636_v28 = vld [vmem:[#allocation13_spill] sm:$0xff] }
 0x369   : > { %v3011_v56 = vsel %vm1127_vm8, %v2972_v23, %v2786_v37  ;;  %v2844_v53 = vsel %vm1096_vm7, %v2814_v22, %v6832_v3 }
 0x36a   : > { %3319 = vmatprep.mubr.bf16.mxu1 %v3011_v56  ;;  %v2884_v39 = vsel %vm1127_vm8, %v2844_v53, %v6839_v51 }
 0x36b   : > { %v2698_v57 = vpop.permute.xlu1 %2697  ;;  %3320 = vmatmul.mubr.bf16.gmra.mxu1 %v2884_v39 }
 0x36c   : > { %v2732_v61 = vpop.permute.xlu0 %2731 }
 0x36d   : > { %v2945_v18 = vsel %vm1065_vm5, %v7634_v7, %v2732_v61 }
 0x36f   : > { %v2632_v46 = vpop.permute.xlu1 %2631 }
 0x370   : > { %v2816_v11 = vsel %vm1065_vm5, %v6344_v59, %v2632_v46  ;;  %v2788_v52 = vpop.permute.xlu0 %2787  ;;  %v7637_v46 = vld [vmem:[#allocation14_spill] sm:$0xff] }
 0x371   : > { %v3014_v3 = vsel %vm1127_vm8, %v2974_v55, %v2788_v52  ;;  %v2846_v40 = vsel %vm1096_vm7, %v2816_v11, %v6855_v58 }
 0x372   : > { %3327 = vmatprep.mubr.bf16.mxu1 %v3014_v3  ;;  %v2887_v51 = vsel %vm1127_vm8, %v2846_v40, %v2694_v38 }
 0x373   : > { %v2668_v27 = vpop.permute.xlu1 %2667  ;;  %3328 = vmatmul.mubr.bf16.gmra.mxu1 %v2887_v51 }
 0x374   : > { %v2764_v62 = vpop.permute.xlu0 %2763 }
 0x375   : > { %v2980_v21 = vsel %vm1096_vm7, %v2945_v18, %v2764_v62 }
 0x377   : > { %v2634_v8 = vpop.permute.xlu1 %2633 }
 0x378   : > { %v2818_v59 = vsel %vm1065_vm5, %v7631_v50, %v2634_v8  ;;  %v2790_v0 = vpop.permute.xlu0 %2789 }
 0x379   : > { %v3017_v63 = vsel %vm1127_vm8, %v2976_v1, %v2790_v0  ;;  %v2848_v58 = vsel %vm1096_vm7, %v2818_v59, %v2664_v4 }
 0x37a   : > { %3335 = vmatprep.mubr.bf16.mxu1 %v3017_v63  ;;  %v2890_v38 = vsel %vm1127_vm8, %v2848_v58, %v2696_v32  ;;  %v7635_v32 = vld [vmem:[#allocation12_spill] sm:$0xff] }
 0x37b   : > { %v2700_v60 = vpop.permute.xlu1 %2699  ;;  %3336 = vmatmul.mubr.bf16.gmra.mxu1 %v2890_v38 }
 0x37c   : > { %v2734_v15 = vpop.permute.xlu0 %2733 }
 0x37f   : > { %v2636_v20 = vpop.permute.xlu1 %2635 }
 0x380   : > { %v2820_v9 = vsel %vm1065_vm5, %v7633_v17, %v2636_v20  ;;  %v2792_v33 = vpop.permute.xlu0 %2791 }
 0x381   : > { %v3020_v42 = vsel %vm1127_vm8, %v2978_v44, %v2792_v33  ;;  %v2850_v4 = vsel %vm1096_vm7, %v2820_v9, %v2666_v35  ;;  %v2948_v35 = vsel %vm1065_vm5, %v6734_v19, %v2734_v15  ;;  %v4419_v44 = vpop.f32.mrf.mxu0 }
 0x382   : > { %3343 = vmatprep.mubr.bf16.mxu1 %v3020_v42  ;;  %v2893_v2 = vsel %vm1127_vm8, %v2850_v4, %v2698_v57 }
 0x383   : > { %v2670_v34 = vpop.permute.xlu1 %2669  ;;  %3344 = vmatmul.mubr.bf16.gmra.mxu1 %v2893_v2  ;;  %v3418_v42 = vpop.f32.mrf.mxu0 }
 0x384   : > { %v2766_v16 = vpop.permute.xlu0 %2765 }
 0x385   : > { %v2982_v10 = vsel %vm1096_vm7, %v2948_v35, %v2766_v16 }
 0x387   : > { %v2638_v26 = vpop.permute.xlu1 %2637 }
 0x388   : > { %v2822_v30 = vsel %vm1065_vm5, %v7635_v32, %v2638_v26  ;;  %v2794_v45 = vpop.permute.xlu0 %2793 }
 0x389   : > { %v3023_v31 = vsel %vm1127_vm8, %v2980_v21, %v2794_v45  ;;  %v2852_v12 = vsel %vm1096_vm7, %v2822_v30, %v2668_v27 }
 0x38a   : > { %3351 = vmatprep.mubr.bf16.mxu1 %v3023_v31  ;;  %v2896_v14 = vsel %vm1127_vm8, %v2852_v12, %v2700_v60 }
 0x38b   : > { %v2702_v25 = vpop.permute.xlu1 %2701  ;;  %3352 = vmatmul.mubr.bf16.gmra.mxu1 %v2896_v14 }
 0x38c   : > { %v2736_v5 = vpop.permute.xlu0 %2735 }
 0x38d   : > { %v2951_v19 = vsel %vm1065_vm5, %v6759_v41, %v2736_v5 }
 0x38f   : > { %v2640_v43 = vpop.permute.xlu1 %2639 }
 0x390   : > { %v2824_v23 = vsel %vm1065_vm5, %v7636_v28, %v2640_v43  ;;  %v2796_v22 = vpop.permute.xlu0 %2795 }
 0x391   : > { %v3026_v37 = vsel %vm1127_vm8, %v2982_v10, %v2796_v22  ;;  %v2854_v56 = vsel %vm1096_vm7, %v2824_v23, %v2670_v34  ;;  %v4420_v34 = vpop.f32.mrf.mxu0 }
 0x392   : > { %3359 = vmatprep.mubr.bf16.mxu1 %v3026_v37  ;;  %v2899_v53 = vsel %vm1127_vm8, %v2854_v56, %v2702_v25 }
 0x393   : > { %v2672_v39 = vpop.permute.xlu1 %2671  ;;  %3360 = vmatmul.mubr.bf16.gmra.mxu1 %v2899_v53  ;;  %v3421_v7 = vpop.f32.mrf.mxu0 }
 0x394   : > { %v2768_v57 = vpop.permute.xlu0 %2767 }
 0x395   : > { %v2984_v29 = vsel %vm1096_vm7, %v2951_v19, %v2768_v57  ;;  %v6975_v21 = vpop.f32.mrf.mxu0 }
 0x397   : > { %v2642_v61 = vpop.permute.xlu1 %2641  ;;  %v3434_v45 = vpop.f32.mrf.mxu0 }
 0x398   : > { %v2826_v55 = vsel %vm1065_vm5, %v7637_v46, %v2642_v61  ;;  %v2798_v11 = vpop.permute.xlu0 %2797 }
 0x399   : > { %v3029_v52 = vsel %vm1127_vm8, %v2984_v29, %v2798_v11  ;;  %v2856_v40 = vsel %vm1096_vm7, %v2826_v55, %v2672_v39  ;;  %v6981_v14 = vpop.f32.mrf.mxu0 }
 0x39a   : > { %3367 = vmatprep.mubr.bf16.mxu1 %v3029_v52 }
 0x39b   : > { %v2704_v3 = vpop.permute.xlu1 %2703  ;;  %v3437_v35 = vpop.f32.mrf.mxu0 }
 0x39c   : > { %v2902_v51 = vsel %vm1127_vm8, %v2856_v40, %v2704_v3  ;;  %v2738_v27 = vpop.permute.xlu0 %2737 }
 0x39d   : > { %3368 = vmatmul.mubr.bf16.gmra.mxu1 %v2902_v51  ;;  %v2954_v41 = vsel %vm1065_vm5, %v6779_v13, %v2738_v27  ;;  %v6991_v28 = vpop.f32.mrf.mxu0 }
 0x39e   : > { %v2985_v62 = vsel %vm1096_vm7, %v2954_v41, %v2766_v16 }
 0x39f   : > { %v2644_v48 = vpop.permute.xlu1 %2643  ;;  %v3031_v36 = vsel %vm1127_vm8, %v2985_v62, %v2796_v22  ;;  %v6997_v37 = vpop.f32.mrf.mxu0 }
 0x3a0   : > { %v2828_v8 = vsel %vm1065_vm5, %v6477_v54, %v2644_v48  ;;  %v2674_v1 = vpop.permute.xlu0 %2673  ;;  %3375 = vmatprep.mubr.bf16.mxu1 %v3031_v36 }
 0x3a1   : > { %v2858_v50 = vsel %vm1096_vm7, %v2828_v8, %v2674_v1  ;;  %v7003_v39 = vpop.f32.mrf.mxu0 }
 0x3a3   : > { %v2706_v59 = vpop.permute.xlu1 %2705  ;;  %v7009_v61 = vpop.f32.mrf.mxu0 }
 0x3a4   : > { %v2905_v0 = vsel %vm1127_vm8, %v2858_v50, %v2706_v59 }
 0x3a5   : > { %3376 = vmatmul.mubr.bf16.gmra.mxu1 %v2905_v0  ;;  %v7015_v55 = vpop.f32.mrf.mxu0 }
 0x3a6   : > { %4445 = vmatprep.mubr.msk.bf16.mxu1 %vm1065_vm5, %v6795_v49 }
 0x3a7   : > { %v7021_v3 = vpop.f32.mrf.mxu0 }
 0x3a9   : > { %v7027_v27 = vpop.f32.mrf.mxu0 }
 0x3ab   : > { %v7033_v48 = vpop.f32.mrf.mxu0 }
 0x3ad   : > { %4446 = vmatmul.mubr.msk.bf16.vlgmr.msra.gmra.mxu1 %vm1065_vm5, %v6508_v24  ;;  %v7045_v0 = vpop.f32.mrf.mxu0 }
 0x3eb   : > { %v4263_v13 = vpop.f32.mrf.mxu1 }
 0x3ed   : > { %v4264_v63 = vpop.f32.mrf.mxu1 }
 0x3ee   : > { %v4265_v58 = vadd.f32 %v4264_v63, %v4263_v13 }
 0x3ef   : > { %v4266_v38 = vpop.f32.mrf.mxu1 }
 0x3f0   : > { %v7039_v1 = vadd.f32 %v4265_v58, %v3418_v42 }
 0x3f1   : > { %v4267_v60 = vpop.f32.mrf.mxu1 }
 0x3f2   : > { %v4268_v54 = vadd.f32 %v4267_v60, %v4266_v38 }
 0x3f3   : > { %v4269_v15 = vpop.f32.mrf.mxu1 }
 0x3f4   : > { %v7037_v8 = vadd.f32 %v4268_v54, %v3421_v7  ;;  %v3615_v54 = vmul.f32 %v7039_v1, %v7039_v1 }
 0x3f5   : > { %v4270_v6 = vpop.f32.mrf.mxu1 }
 0x3f6   : > { %v4271_v47 = vadd.f32 %v4270_v6, %v4269_v15  ;;  %v3616_v38 = vmul.f32 %v7037_v8, %v7037_v8  ;;  %v3546_v6 = vsel %vm1065_vm5, %v7037_v8, 0.0 }
 0x3f7   : > { %v4272_v20 = vpop.f32.mrf.mxu1 }
 0x3f8   : > { %v7043_v59 = vadd.f32 %v4419_v44, %v4271_v47  ;;  %v7063_v44 = vpop.f32.mrf.mxu0  ;;  %v3648_v42 = vsel %vm1065_vm5, %v3616_v38, 0.0 }
 0x3f9   : > { %v4273_v17 = vpop.f32.mrf.mxu1 }
 0x3fa   : > { %v4274_v9 = vadd.f32 %v4273_v17, %v4272_v20  ;;  %v3617_v47 = vmul.f32 %v7043_v59, %v7043_v59  ;;  %v3545_v17 = vsel %vm1065_vm5, %v7039_v1, 0.0 }
 0x3fb   : > { %v4275_v33 = vpop.f32.mrf.mxu1 }
 0x3fc   : > { %v7047_v13 = vadd.f32 %v4420_v34, %v4274_v9  ;;  %v3647_v34 = vsel %vm1065_vm5, %v3615_v54, 0.0 }
 0x3fd   : > { %v4276_v4 = vpop.f32.mrf.mxu1 }
 0x3fe   : > { %v4277_v49 = vadd.f32 %v4276_v4, %v4275_v33  ;;  %7638 = vst [vmem:[#allocation15_spill] sm:$0xff] %v7047_v13  ;;  %v3618_v9 = vmul.f32 %v7047_v13, %v7047_v13  ;;  %v3548_v4 = vsel %vm1065_vm5, %v7043_v59, 0.0 }
 0x3ff   : > { %v4278_v2 = vpop.f32.mrf.mxu1 }
 0x400   : > { %v7055_v15 = vadd.f32 %v4277_v49, %v3434_v45  ;;  %v3550_v45 = vsel %vm1065_vm5, %v7047_v13, 0.0  ;;  %v3652_v54 = vsel %vm1065_vm5, %v3618_v9, 0.0 }
 0x401   : > { %v4279_v24 = vpop.f32.mrf.mxu1 }
 0x402   : > { %v4280_v60 = vadd.f32 %v4279_v24, %v4278_v2  ;;  %v3547_v24 = vadd.f32 %v3546_v6, %v3545_v17  ;;  %v3552_v17 = vsel %vm1065_vm5, %v7055_v15, 0.0 }
 0x403   : > { %v4281_v16 = vpop.f32.mrf.mxu1 }
 0x404   : > { %v7074_v49 = vadd.f32 %v4280_v60, %v3437_v35  ;;  %v7088_v60 = vpop.f32.mrf.mxu0 }
 0x405   : > { %v4282_v18 = vpop.f32.mrf.mxu1 }
 0x406   : > { %v4283_v20 = vadd.f32 %v4282_v18, %v4281_v16  ;;  %v3619_v16 = vmul.f32 %v7055_v15, %v7055_v15  ;;  %v3650_v18 = vsel %vm1065_vm5, %v3617_v47, 0.0  ;;  %v3620_v47 = vmul.f32 %v7074_v49, %v7074_v49 }
 0x407   : > { %v4284_v26 = vpop.f32.mrf.mxu1  ;;  %v3554_v9 = vsel %vm1065_vm5, %v7074_v49, 0.0 }
 0x408   : > { %v7085_v38 = vadd.f32 %v6975_v21, %v4283_v20  ;;  %v3654_v20 = vsel %vm1065_vm5, %v3619_v16, 0.0 }
 0x409   : > { %v4285_v32 = vpop.f32.mrf.mxu1 }
 0x40a   : > { %v4286_v2 = vadd.f32 %v4285_v32, %v4284_v26  ;;  %v3649_v26 = vadd.f32 %v3648_v42, %v3647_v34  ;;  %v3549_v32 = vadd.f32 %v3548_v4, %v3547_v24  ;;  %v3621_v4 = vmul.f32 %v7085_v38, %v7085_v38 }
 0x40b   : > { %v6977_v30 = vpop.f32.mrf.mxu1 }
 0x40c   : > { %v7098_v13 = vadd.f32 %v6981_v14, %v4286_v2  ;;  %v7114_v2 = vpop.f32.mrf.mxu0 }
 0x40d   : > { %v4288_v31 = vpop.f32.mrf.mxu1 }
 0x40e   : > { %v4289_v35 = vadd.f32 %v4288_v31, %v6977_v30  ;;  %v3651_v30 = vadd.f32 %v3650_v18, %v3649_v26  ;;  %v3551_v31 = vadd.f32 %v3550_v45, %v3549_v32  ;;  %v3656_v18 = vsel %vm1065_vm5, %v3620_v47, 0.0 }
 0x40f   : > { %v6979_v12 = vpop.f32.mrf.mxu1  ;;  %v3556_v45 = vsel %vm1065_vm5, %v7085_v38, 0.0 }
 0x410   : > { %v7110_v34 = vadd.f32 %v4289_v35, %v6997_v37  ;;  %v3622_v37 = vmul.f32 %v7098_v13, %v7098_v13 }
 0x411   : > { %v6983_v25 = vpop.f32.mrf.mxu1 }
 0x412   : > { %v4292_v21 = vadd.f32 %v6983_v25, %v6979_v12  ;;  %v3653_v12 = vadd.f32 %v3652_v54, %v3651_v30  ;;  %v3553_v25 = vadd.f32 %v3552_v17, %v3551_v31  ;;  %v3623_v54 = vmul.f32 %v7110_v34, %v7110_v34 }
 0x413   : > { %v6985_v5 = vpop.f32.mrf.mxu1  ;;  %v3560_v31 = vsel %vm1065_vm5, %v7110_v34, 0.0 }
 0x414   : > { %v7126_v35 = vadd.f32 %v4292_v21, %v7009_v61  ;;  %v7140_v61 = vpop.f32.mrf.mxu0 }
 0x415   : > { %v6987_v43 = vpop.f32.mrf.mxu1 }
 0x416   : > { %v4295_v14 = vadd.f32 %v6987_v43, %v6985_v5  ;;  %v3655_v5 = vadd.f32 %v3654_v20, %v3653_v12  ;;  %v3555_v43 = vadd.f32 %v3554_v9, %v3553_v25  ;;  %v3624_v20 = vmul.f32 %v7126_v35, %v7126_v35 }
 0x417   : > { %v6989_v10 = vpop.f32.mrf.mxu1  ;;  %v3662_v12 = vsel %vm1065_vm5, %v3623_v54, 0.0  ;;  %v3562_v25 = vsel %vm1065_vm5, %v7126_v35, 0.0 }
 0x418   : > { %v7138_v17 = vadd.f32 %v6991_v28, %v4295_v14  ;;  %v3657_v47 = vadd.f32 %v3656_v18, %v3655_v5  ;;  %v3557_v21 = vadd.f32 %v3556_v45, %v3555_v43  ;;  %v3498_v45 = vpop.f32.mrf.mxu0  ;;  %v3664_v5 = vsel %vm1065_vm5, %v3624_v20, 0.0 }
 0x419   : > { %v6993_v23 = vpop.f32.mrf.mxu1 }
 0x41a   : > { %v4298_v24 = vadd.f32 %v6993_v23, %v6989_v10  ;;  %v3658_v10 = vsel %vm1065_vm5, %v3621_v4, 0.0  ;;  %v3558_v23 = vsel %vm1065_vm5, %v7098_v13, 0.0  ;;  %v3564_v43 = vsel %vm1065_vm5, %v7138_v17, 0.0 }
 0x41b   : > { %v6995_v22 = vpop.f32.mrf.mxu1  ;;  %v3659_v9 = vadd.f32 %v3658_v10, %v3657_v47  ;;  %v3559_v4 = vadd.f32 %v3558_v23, %v3557_v21 }
 0x41c   : > { %v7143_v30 = vadd.f32 %v7003_v39, %v4298_v24  ;;  %v3625_v24 = vmul.f32 %v7138_v17, %v7138_v17 }
 0x41d   : > { %v6999_v56 = vpop.f32.mrf.mxu1 }
 0x41e   : > { %v4301_v26 = vadd.f32 %v6999_v56, %v6995_v22  ;;  %v3660_v56 = vsel %vm1065_vm5, %v3622_v37, 0.0  ;;  %v3666_v47 = vsel %vm1065_vm5, %v3625_v24, 0.0  ;;  %v3566_v21 = vsel %vm1065_vm5, %v7143_v30, 0.0 }
 0x41f   : > { %v7001_v53 = vpop.f32.mrf.mxu1 }
 0x420   : > { %v7155_v14 = vadd.f32 %v4301_v26, %v7021_v3  ;;  %v3626_v3 = vmul.f32 %v7143_v30, %v7143_v30 }
 0x421   : > { %v7005_v57 = vpop.f32.mrf.mxu1 }
 0x422   : > { %v4304_v28 = vadd.f32 %v7005_v57, %v7001_v53  ;;  %v3661_v53 = vadd.f32 %v3660_v56, %v3659_v9  ;;  %v3561_v57 = vadd.f32 %v3560_v31, %v3559_v4  ;;  %v3627_v23 = vmul.f32 %v7155_v14, %v7155_v14  ;;  %v7190_v31 = vpop.f32.mrf.mxu0 }
 0x423   : > { %v7007_v19 = vpop.f32.mrf.mxu1  ;;  %v3668_v20 = vsel %vm1065_vm5, %v3626_v3, 0.0  ;;  %v3568_v9 = vsel %vm1065_vm5, %v7155_v14, 0.0 }
 0x424   : > { %v7174_v26 = vadd.f32 %v4304_v28, %v7033_v48  ;;  %v3501_v3 = vpop.f32.mrf.mxu0 }
 0x425   : > { %v7011_v29 = vpop.f32.mrf.mxu1 }
 0x426   : > { %v4307_v18 = vadd.f32 %v7011_v29, %v7007_v19  ;;  %v3663_v19 = vadd.f32 %v3662_v12, %v3661_v53  ;;  %v3563_v29 = vadd.f32 %v3562_v25, %v3561_v57  ;;  %v3628_v4 = vmul.f32 %v7174_v26, %v7174_v26 }
 0x427   : > { %v7013_v46 = vpop.f32.mrf.mxu1  ;;  %v3670_v25 = vsel %vm1065_vm5, %v3627_v23, 0.0 }
 0x428   : > { %v7186_v56 = vadd.f32 %v7015_v55, %v4307_v18  ;;  %v3570_v18 = vsel %vm1065_vm5, %v7174_v26, 0.0 }
 0x429   : > { %v7017_v11 = vpop.f32.mrf.mxu1 }
 0x42a   : > { %v4310_v10 = vadd.f32 %v7017_v11, %v7013_v46  ;;  %v3665_v46 = vadd.f32 %v3664_v5, %v3663_v19  ;;  %v3565_v11 = vadd.f32 %v3564_v43, %v3563_v29  ;;  %v3629_v53 = vmul.f32 %v7186_v56, %v7186_v56 }
 0x42b   : > { %v7019_v52 = vpop.f32.mrf.mxu1  ;;  %v3572_v19 = vsel %vm1065_vm5, %v7186_v56, 0.0 }
 0x42c   : > { %v7200_v55 = vadd.f32 %v7027_v27, %v4310_v10  ;;  %v3567_v12 = vadd.f32 %v3566_v21, %v3565_v11  ;;  %v3672_v10 = vsel %vm1065_vm5, %v3628_v4, 0.0 }
 0x42d   : > { %v7023_v40 = vpop.f32.mrf.mxu1 }
 0x42e   : > { %v4313_v48 = vadd.f32 %v7023_v40, %v7019_v52  ;;  %v3667_v40 = vadd.f32 %v3666_v47, %v3665_v46  ;;  %v3630_v29 = vmul.f32 %v7200_v55, %v7200_v55  ;;  %v7236_v46 = vpop.f32.mrf.mxu0 }
 0x42f   : > { %v7025_v51 = vpop.f32.mrf.mxu1 }
 0x430   : > { %v7212_v57 = vadd.f32 %v4313_v48, %v7063_v44 }
 0x431   : > { %v7029_v41 = vpop.f32.mrf.mxu1 }
 0x432   : > { %v4316_v52 = vadd.f32 %v7029_v41, %v7025_v51  ;;  %v3669_v51 = vadd.f32 %v3668_v20, %v3667_v40  ;;  %v3569_v41 = vadd.f32 %v3568_v9, %v3567_v12  ;;  %v3631_v21 = vmul.f32 %v7212_v57, %v7212_v57 }
 0x433   : > { %v7031_v62 = vpop.f32.mrf.mxu1  ;;  %v3576_v9 = vsel %vm1065_vm5, %v7212_v57, 0.0 }
 0x434   : > { %v7224_v44 = vadd.f32 %v4316_v52, %v7114_v2  ;;  %v3671_v23 = vadd.f32 %v3670_v25, %v3669_v51  ;;  %v3678_v25 = vsel %vm1065_vm5, %v3631_v21, 0.0 }
 0x435   : > { %v7035_v36 = vpop.f32.mrf.mxu1 }
 0x436   : > { %v4319_v27 = vadd.f32 %v7035_v36, %v7031_v62  ;;  %v3571_v62 = vadd.f32 %v3570_v18, %v3569_v41  ;;  %v3673_v2 = vadd.f32 %v3672_v10, %v3671_v23  ;;  %v3632_v4 = vmul.f32 %v7224_v44, %v7224_v44 }
 0x437   : > { %v7041_v50 = vpop.f32.mrf.mxu1 }
 0x438   : > { %v7234_v48 = vadd.f32 %v7045_v0, %v4319_v27  ;;  %v3573_v11 = vadd.f32 %v3572_v19, %v3571_v62  ;;  %v3514_v27 = vpop.f32.mrf.mxu0 }
 0x439   : > { %v7049_v63 = vpop.f32.mrf.mxu1 }
 0x43a   : > { %v4322_v5 = vadd.f32 %v7049_v63, %v7041_v50  ;;  %v3674_v50 = vsel %vm1065_vm5, %v3629_v53, 0.0  ;;  %v3574_v63 = vsel %vm1065_vm5, %v7200_v55, 0.0  ;;  %v3633_v18 = vmul.f32 %v7234_v48, %v7234_v48 }
 0x43b   : > { %v7057_v58 = vpop.f32.mrf.mxu1  ;;  %v3675_v52 = vadd.f32 %v3674_v50, %v3673_v2  ;;  %v3575_v40 = vadd.f32 %v3574_v63, %v3573_v11  ;;  %v4444_v63 = vpop.f32.mrf.mxu0 }
 0x43c   : > { %v7239_v20 = vadd.f32 %v7088_v60, %v4322_v5  ;;  %v3578_v60 = vsel %vm1065_vm5, %v7224_v44, 0.0  ;;  %v3580_v5 = vsel %vm1065_vm5, %v7234_v48, 0.0  ;;  %v3682_v62 = vsel %vm1065_vm5, %v3633_v18, 0.0 }
 0x43d   : > { %v7069_v33 = vpop.f32.mrf.mxu1  ;;  %v3577_v41 = vadd.f32 %v3576_v9, %v3575_v40 }
 0x43e   : > { %v4325_v36 = vadd.f32 %v7069_v33, %v7057_v58  ;;  %v3676_v33 = vsel %vm1065_vm5, %v3630_v29, 0.0 }
 0x43f   : > { %v7079_v7 = vpop.f32.mrf.mxu1  ;;  %v3677_v51 = vadd.f32 %v3676_v33, %v3675_v52 }
 0x440   : > { %v7248_v12 = vadd.f32 %v4325_v36, %v3498_v45  ;;  %v3680_v45 = vsel %vm1065_vm5, %v3632_v4, 0.0  ;;  %v3582_v36 = vsel %vm1065_vm5, %v7239_v20, 0.0 }
 0x441   : > { %v7091_v6 = vpop.f32.mrf.mxu1  ;;  %v3679_v29 = vadd.f32 %v3678_v25, %v3677_v51 }
 0x442   : > { %v4328_v0 = vadd.f32 %v7091_v6, %v7079_v7  ;;  %v3634_v7 = vmul.f32 %v7239_v20, %v7239_v20  ;;  %v3584_v11 = vsel %vm1065_vm5, %v7248_v12, 0.0 }
 0x443   : > { %v7103_v42 = vpop.f32.mrf.mxu1  ;;  %v3681_v21 = vadd.f32 %v3680_v45, %v3679_v29 }
 0x444   : > { %v7264_v10 = vadd.f32 %v4328_v0, %v3501_v3 }
 0x445   : > { %v7118_v16 = vpop.f32.mrf.mxu1  ;;  %v3683_v4 = vadd.f32 %v3682_v62, %v3681_v21 }
 0x446   : > { %v4331_v53 = vadd.f32 %v7118_v16, %v7103_v42  ;;  %v3579_v42 = vadd.f32 %v3578_v60, %v3577_v41  ;;  %v3635_v16 = vmul.f32 %v7248_v12, %v7248_v12  ;;  %v3636_v33 = vmul.f32 %v7264_v10, %v7264_v10 }
 0x447   : > { %v7130_v32 = vpop.f32.mrf.mxu1  ;;  %v3586_v52 = vsel %vm1065_vm5, %v7264_v10, 0.0 }
 0x448   : > { %v7274_v50 = vadd.f32 %v7140_v61, %v4331_v53 }
 0x449   : > { %v7145_v22 = vpop.f32.mrf.mxu1 }
 0x44a   : > { %v4334_v19 = vadd.f32 %v7145_v22, %v7130_v32  ;;  %v3581_v32 = vadd.f32 %v3580_v5, %v3579_v42  ;;  %v3684_v22 = vsel %vm1065_vm5, %v3634_v7, 0.0  ;;  %v3637_v40 = vmul.f32 %v7274_v50, %v7274_v50 }
 0x44b   : > { %v7157_v39 = vpop.f32.mrf.mxu1  ;;  %v3685_v18 = vadd.f32 %v3684_v22, %v3683_v4  ;;  %v3588_v41 = vsel %vm1065_vm5, %v7274_v50, 0.0 }
 0x44c   : > { %v7284_v9 = vadd.f32 %v7190_v31, %v4334_v19  ;;  %v3517_v31 = vpop.f32.mrf.mxu0 }
 0x44d   : > { %v7168_v37 = vpop.f32.mrf.mxu1 }
 0x44e   : > { %v4337_v3 = vadd.f32 %v7168_v37, %v7157_v39  ;;  %v3583_v39 = vadd.f32 %v3582_v36, %v3581_v32  ;;  %v3686_v37 = vsel %vm1065_vm5, %v3635_v16, 0.0  ;;  %v3638_v7 = vmul.f32 %v7284_v9, %v7284_v9 }
 0x44f   : > { %v7180_v54 = vpop.f32.mrf.mxu1  ;;  %v3687_v5 = vadd.f32 %v3686_v37, %v3685_v18 }
 0x450   : > { %v7293_v25 = vadd.f32 %v4337_v3, %v3514_v27  ;;  %v3585_v53 = vadd.f32 %v3584_v11, %v3583_v39  ;;  %v3692_v36 = vsel %vm1065_vm5, %v3638_v7, 0.0 }
 0x451   : > { %v7193_v28 = vpop.f32.mrf.mxu1 }
 0x452   : > { %v4340_v61 = vadd.f32 %v7193_v28, %v7180_v54  ;;  %v3688_v28 = vsel %vm1065_vm5, %v3636_v33, 0.0  ;;  %v3587_v27 = vadd.f32 %v3586_v52, %v3585_v53  ;;  %v3592_v3 = vsel %vm1065_vm5, %v7293_v25, 0.0 }
 0x453   : > { %v7205_v24 = vpop.f32.mrf.mxu1  ;;  %v3689_v29 = vadd.f32 %v3688_v28, %v3687_v5 }
 0x454   : > { %v7301_v45 = vadd.f32 %v4340_v61, %v3517_v31  ;;  %v3589_v42 = vadd.f32 %v3588_v41, %v3587_v27 }
 0x455   : > { %v4342_v43 = vpop.f32.mrf.mxu1 }
 0x456   : > { %v4343_v60 = vadd.f32 %v4342_v43, %v7205_v24  ;;  %v3690_v24 = vsel %vm1065_vm5, %v3637_v40, 0.0  ;;  %v3590_v43 = vsel %vm1065_vm5, %v7284_v9, 0.0  ;;  %v3640_v21 = vmul.f32 %v7301_v45, %v7301_v45 }
 0x457   : > { %v4344_v47 = vpop.f32.mrf.mxu1  ;;  %v3691_v32 = vadd.f32 %v3690_v24, %v3689_v29  ;;  %v3591_v22 = vadd.f32 %v3590_v43, %v3589_v42 }
 0x458   : > { %v3696_v52 = vsel %vm1065_vm5, %v3640_v21, 0.0 }
 0x459   : > { %v4345_v58 = vpop.f32.mrf.mxu1  ;;  %v3693_v61 = vadd.f32 %v3692_v36, %v3691_v32  ;;  %v3593_v4 = vadd.f32 %v3592_v3, %v3591_v22 }
 0x45a   : > { %v4346_v51 = vadd.f32 %v4345_v58, %v4344_v47  ;;  %v3639_v47 = vmul.f32 %v7293_v25, %v7293_v25  ;;  %v7309_v58 = vadd.f32 %v7236_v46, %v4343_v60  ;;  %v3594_v46 = vsel %vm1065_vm5, %v7301_v45, 0.0 }
 0x45b   : > { %v3595_v18 = vadd.f32 %v3594_v46, %v3593_v4 }
 0x45c   : > { %v7311_v16 = vadd.f32 %v4444_v63, %v4346_v51  ;;  %v3694_v33 = vsel %vm1065_vm5, %v3639_v47, 0.0  ;;  %v3641_v63 = vmul.f32 %v7309_v58, %v7309_v58  ;;  %v3596_v40 = vsel %vm1065_vm5, %v7309_v58, 0.0 }
 0x45d   : > { %v7259_v6 = vpop.f32.mrf.mxu1  ;;  %v3695_v31 = vadd.f32 %v3694_v33, %v3693_v61  ;;  %v3597_v27 = vadd.f32 %v3596_v40, %v3595_v18 }
 0x45e   : > { %v3642_v39 = vmul.f32 %v7311_v16, %v7311_v16  ;;  %v3698_v51 = vsel %vm1065_vm5, %v3641_v63, 0.0  ;;  %v3598_v28 = vsel %vm1065_vm5, %v7311_v16, 0.0 }
 0x45f   : > { %v4348_v23 = vpop.f32.mrf.mxu1  ;;  %v3697_v5 = vadd.f32 %v3696_v52, %v3695_v31  ;;  %v3599_v3 = vadd.f32 %v3598_v28, %v3597_v27 }
 0x460   : > { %v4349_v60 = vadd.f32 %v4348_v23, %v7259_v6  ;;  %v3700_v24 = vsel %vm1065_vm5, %v3642_v39, 0.0 }
 0x461   : > { %v4350_v2 = vpop.f32.mrf.mxu1  ;;  %v3699_v36 = vadd.f32 %v3698_v51, %v3697_v5 }
 0x463   : > { %v4351_v0 = vpop.f32.mrf.mxu1 }
 0x464   : > { %v4352_v43 = vadd.f32 %v4351_v0, %v4350_v2  ;;  %v3701_v2 = vadd.f32 %v3700_v24, %v3699_v36 }
 0x465   : > { %v4353_v54 = vpop.f32.mrf.mxu1 }
 0x467   : > { %v4354_v19 = vpop.f32.mrf.mxu1 }
 0x468   : > { %v4355_v41 = vadd.f32 %v4354_v19, %v4353_v54 }
 0x469   : > { %v4356_v62 = vpop.f32.mrf.mxu1 }
 0x46b   : > { %v4357_v11 = vpop.f32.mrf.mxu1 }
 0x46c   : > { %v4358_v29 = vadd.f32 %v4357_v11, %v4356_v62 }
 0x46d   : > { %v4447_v37 = vpop.f32.mrf.mxu1 }
 0x46e   : > { %v7335_v42 = vadd.f32 %v4447_v37, %v4355_v41 }
 0x46f   : > { %v3530_v53 = vpop.f32.mrf.mxu1 }
 0x470   : > { %v7332_v7 = vadd.f32 %v4349_v60, %v3530_v53  ;;  %v3645_v0 = vmul.f32 %v7335_v42, %v7335_v42  ;;  %v3604_v63 = vsel %vm1065_vm5, %v7335_v42, 0.0 }
 0x471   : > { %v4448_v47 = vpop.f32.mrf.mxu1 }
 0x472   : > { %v3600_v6 = vsel %vm1065_vm5, %v7332_v7, 0.0  ;;  %v3643_v23 = vmul.f32 %v7332_v7, %v7332_v7  ;;  %v7342_v21 = vadd.f32 %v4448_v47, %v4358_v29  ;;  %v3706_v52 = vsel %vm1065_vm5, %v3645_v0, 0.0 }
 0x473   : > { %v3533_v54 = vpop.f32.mrf.mxu1  ;;  %v3601_v22 = vadd.f32 %v3600_v6, %v3599_v3 }
 0x474   : > { %v3702_v19 = vsel %vm1065_vm5, %v3643_v23, 0.0  ;;  %v3534_v32 = vadd.f32 %v4352_v43, %v3533_v54  ;;  %v3646_v61 = vmul.f32 %v7342_v21, %v7342_v21  ;;  %v3606_v40 = vsel %vm1065_vm5, %v7342_v21, 0.0 }
 0x475   : > { %v3703_v33 = vadd.f32 %v3702_v19, %v3701_v2 }
 0x476   : > { %v3602_v62 = vsel %vm1065_vm5, %v3534_v32, 0.0  ;;  %v3644_v11 = vmul.f32 %v3534_v32, %v3534_v32  ;;  %v3708_v18 = vsel %vm1065_vm5, %v3646_v61, 0.0 }
 0x477   : > { %v3603_v46 = vadd.f32 %v3602_v62, %v3601_v22  ;;  %v4108_v62 = vld [vmem:[%s4818_s6 + $0x1] sm:$0x1] }
 0x478   : > { %v3704_v4 = vsel %vm1065_vm5, %v3644_v11, 0.0 }
 0x479   : > { %v3605_v39 = vadd.f32 %v3604_v63, %v3603_v46  ;;  %v3705_v37 = vadd.f32 %v3704_v4, %v3703_v33  ;;  %v4109_v46 = vld [vmem:[%s4823_s8 + $0x1] sm:$0x1]  ;;  %v7639_v63 = vld [vmem:[#allocation11_spill] sm:$0xff] }
 0x47b   : > { %v3607_v60 = vadd.f32 %v3606_v40, %v3605_v39  ;;  %v3707_v31 = vadd.f32 %v3706_v52, %v3705_v37 }
 0x47d   : > { %v3608_v53 = vrot.slane %v3607_v60, 4  ;;  %v3709_v51 = vadd.f32 %v3708_v18, %v3707_v31  ;;  %v7640_v31 = vld [vmem:[#allocation15_spill] sm:$0xff] }
 0x47f   : > { %v3609_v28 = vadd.f32 %v3608_v53, %v3607_v60  ;;  %v3710_v41 = vrot.slane %v3709_v51, 4 }
 0x481   : > { %v3610_v5 = vrot.slane %v3609_v28, 2  ;;  %v3711_v27 = vadd.f32 %v3710_v41, %v3709_v51 }
 0x483   : > { %v3611_v24 = vadd.f32 %v3610_v5, %v3609_v28  ;;  %v3712_v43 = vrot.slane %v3711_v27, 2 }
 0x485   : > { %v3612_v47 = vrot.slane %v3611_v24, 1  ;;  %v3713_v29 = vadd.f32 %v3712_v43, %v3711_v27  ;;  %v4572_v43 = vld [vmem:[%s4825_s11 + $0xe8] sm:$0xff] }
 0x487   : > { %v3613_v6 = vadd.f32 %v3612_v47, %v3611_v24  ;;  %v3714_v23 = vrot.slane %v3713_v29, 1 }
 0x489   : > { %v3614_v36 = vmul.f32 0.00390625, %v3613_v6  ;;  %v3715_v3 = vadd.f32 %v3714_v23, %v3713_v29 }
 0x48b   : > { %v3716_v54 = vmul.f32 0.00390625, %v3715_v3  ;;  %v3717_v19 = vmul.f32 %v3614_v36, %v3614_v36 }
 0x48d   : > { %v3718_v22 = vsub.f32 %v3716_v54, %v3717_v19 }
 0x48f   : > { %v3719_v2 = vmax.f32 %v3718_v22, 0.0 }
 0x491   : > { %v3722_v0 = vadd.f32 1e-05, %v3719_v2 }
 0x493   : > { %4568 = vrsqrt.f32 %v3722_v0 }
 0x4a0   : > { %v4569_v11 = vpop.eup %4568 }
 0x4a1   : > { %v3724_v33 = vmul.f32 %v4569_v11, %v4108_v62 }
 0x4a3   : > { %v3729_v61 = vrot.slane %v3724_v33, %v7639_v63  ;;  %v3765_v4 = vmul.f32 %v3724_v33, %v3614_v36 }
 0x4a5   : > { %v3760_v39 = vmul.f32 %v3729_v61, %v3534_v32  ;;  %v3766_v37 = vsub.f32 %v4109_v46, %v3765_v4  ;;  %v3731_v52 = vmul.f32 %v3729_v61, %v7039_v1  ;;  %v3732_v40 = vmul.f32 %v3729_v61, %v7037_v8 }
 0x4a6   : > { %v3733_v60 = vmul.f32 %v3729_v61, %v7043_v59  ;;  %v3734_v18 = vmul.f32 %v3729_v61, %v7640_v31  ;;  %v3735_v53 = vmul.f32 %v3729_v61, %v7055_v15  ;;  %v3736_v51 = vmul.f32 %v3729_v61, %v7074_v49  ;;  %v4573_v31 = vld [vmem:[%s4825_s11] sm:$0xff] }
 0x4a7   : > { %v3771_v28 = vrot.slane %v3766_v37, %v7639_v63  ;;  %v3737_v41 = vmul.f32 %v3729_v61, %v7085_v38  ;;  %v3738_v32 = vmul.f32 %v3729_v61, %v7098_v13  ;;  %v3739_v5 = vmul.f32 %v3729_v61, %v7110_v34 }
 0x4a8   : > { %v3740_v1 = vmul.f32 %v3729_v61, %v7126_v35  ;;  %v3741_v8 = vmul.f32 %v3729_v61, %v7138_v17  ;;  %v3742_v59 = vmul.f32 %v3729_v61, %v7143_v30  ;;  %v3743_v27 = vmul.f32 %v3729_v61, %v7155_v14 }
 0x4a9   : > { %v3802_v15 = vadd.f32 %v3771_v28, %v3760_v39  ;;  %v3744_v49 = vmul.f32 %v3729_v61, %v7174_v26  ;;  %v3745_v24 = vmul.f32 %v3729_v61, %v7186_v56  ;;  %v3746_v38 = vmul.f32 %v3729_v61, %v7200_v55 }
 0x4aa   : > { %v3747_v13 = vmul.f32 %v3729_v61, %v7212_v57  ;;  %v3748_v34 = vmul.f32 %v3729_v61, %v7224_v44  ;;  %v3749_v35 = vmul.f32 %v3729_v61, %v7234_v48  ;;  %v3750_v17 = vmul.f32 %v3729_v61, %v7239_v20 }
 0x4ab   : > { %v3834_v30 = vadd.f32 %v4572_v43, %v3802_v15  ;;  %v3751_v14 = vmul.f32 %v3729_v61, %v7248_v12  ;;  %v3752_v47 = vmul.f32 %v3729_v61, %v7264_v10  ;;  %v3753_v26 = vmul.f32 %v3729_v61, %v7274_v50  ;;  %v4583_v43 = vld [vmem:[%s4825_s11 + $0x50] sm:$0xff] }
 0x4ac   : > { %v3754_v56 = vmul.f32 %v3729_v61, %v7284_v9  ;;  %v3755_v55 = vmul.f32 %v3729_v61, %v7293_v25  ;;  %v3756_v57 = vmul.f32 %v3729_v61, %v7301_v45  ;;  %v3757_v44 = vmul.f32 %v3729_v61, %v7309_v58 }
 0x4ad   : > { %3866 = vst.msk [vmem:[%s4825_s11 + $0xe8] sm:$0xff] %vm1065_vm5, %v3834_v30  ;;  %v3758_v48 = vmul.f32 %v3729_v61, %v7311_v16  ;;  %v3759_v20 = vmul.f32 %v3729_v61, %v7332_v7  ;;  %v3761_v12 = vmul.f32 %v3729_v61, %v7335_v42  ;;  %v3762_v10 = vmul.f32 %v3729_v61, %v7342_v21 }
 0x4ae   : > { %v3773_v29 = vadd.f32 %v3771_v28, %v3731_v52  ;;  %v3774_v50 = vadd.f32 %v3771_v28, %v3732_v40  ;;  %v3775_v6 = vadd.f32 %v3771_v28, %v3733_v60  ;;  %v3776_v9 = vadd.f32 %v3771_v28, %v3734_v18 }
 0x4af   : > { %v3777_v23 = vadd.f32 %v3771_v28, %v3735_v53  ;;  %v3778_v25 = vadd.f32 %v3771_v28, %v3736_v51  ;;  %v3779_v36 = vadd.f32 %v3771_v28, %v3737_v41  ;;  %v3780_v45 = vadd.f32 %v3771_v28, %v3738_v32  ;;  %v4574_v53 = vld [vmem:[%s4825_s11 + $0x8] sm:$0xff]  ;;  %v4575_v41 = vld [vmem:[%s4825_s11 + $0x10] sm:$0xff] }
 0x4b0   : > { %v3781_v3 = vadd.f32 %v3771_v28, %v3739_v5  ;;  %v3782_v58 = vadd.f32 %v3771_v28, %v3740_v1  ;;  %v3783_v54 = vadd.f32 %v3771_v28, %v3741_v8  ;;  %v3784_v19 = vadd.f32 %v3771_v28, %v3742_v59  ;;  %v4576_v5 = vld [vmem:[%s4825_s11 + $0x18] sm:$0xff]  ;;  %v4577_v8 = vld [vmem:[%s4825_s11 + $0x20] sm:$0xff] }
 0x4b1   : > { %v3785_v22 = vadd.f32 %v3771_v28, %v3743_v27  ;;  %v3786_v16 = vadd.f32 %v3771_v28, %v3744_v49  ;;  %v3787_v2 = vadd.f32 %v3771_v28, %v3745_v24  ;;  %v3788_v7 = vadd.f32 %v3771_v28, %v3746_v38  ;;  %v4578_v27 = vld [vmem:[%s4825_s11 + $0x28] sm:$0xff]  ;;  %v4580_v24 = vld [vmem:[%s4825_s11 + $0x38] sm:$0xff] }
 0x4b2   : > { %v3789_v42 = vadd.f32 %v3771_v28, %v3747_v13  ;;  %v3790_v0 = vadd.f32 %v3771_v28, %v3748_v34  ;;  %v3791_v21 = vadd.f32 %v3771_v28, %v3749_v35  ;;  %v3792_v62 = vadd.f32 %v3771_v28, %v3750_v17  ;;  %v4581_v13 = vld [vmem:[%s4825_s11 + $0x40] sm:$0xff]  ;;  %v4582_v35 = vld [vmem:[%s4825_s11 + $0x48] sm:$0xff] }
 0x4b3   : > { %v7394_v11 = vadd.f32 %v3771_v28, %v3751_v14  ;;  %v7396_v33 = vadd.f32 %v3771_v28, %v3752_v47  ;;  %v7398_v46 = vadd.f32 %v3771_v28, %v3753_v26  ;;  %v7400_v63 = vadd.f32 %v3771_v28, %v3754_v56  ;;  %v4584_v14 = vld [vmem:[%s4825_s11 + $0x58] sm:$0xff]  ;;  %v4585_v26 = vld [vmem:[%s4825_s11 + $0x60] sm:$0xff] }
 0x4b4   : > { %v7402_v61 = vadd.f32 %v3771_v28, %v3755_v55  ;;  %v7404_v4 = vadd.f32 %v3771_v28, %v3756_v57  ;;  %v7406_v39 = vadd.f32 %v3771_v28, %v3757_v44  ;;  %v7408_v37 = vadd.f32 %v3771_v28, %v3758_v48  ;;  %v4586_v55 = vld [vmem:[%s4825_s11 + $0x68] sm:$0xff]  ;;  %v4587_v44 = vld [vmem:[%s4825_s11 + $0x70] sm:$0xff] }
 0x4b5   : > { %v7410_v52 = vadd.f32 %v3771_v28, %v3759_v20  ;;  %v7412_v40 = vadd.f32 %v3771_v28, %v3761_v12  ;;  %v7414_v60 = vadd.f32 %v3771_v28, %v3762_v10  ;;  %v3805_v18 = vadd.f32 %v4573_v31, %v3773_v29  ;;  %v4579_v28 = vld [vmem:[%s4825_s11 + $0x30] sm:$0xff]  ;;  %v4588_v20 = vld [vmem:[%s4825_s11 + $0x78] sm:$0xff]  ;;  %v4589_v10 = vld [vmem:[%s4825_s11 + $0x80] sm:$0xff] }
 0x4b6   : > { %v3806_v51 = vadd.f32 %v4574_v53, %v3774_v50  ;;  %v3807_v32 = vadd.f32 %v4575_v41, %v3775_v6  ;;  %v3808_v1 = vadd.f32 %v4576_v5, %v3776_v9  ;;  %v3809_v59 = vadd.f32 %v4577_v8, %v3777_v23  ;;  %v4590_v50 = vld [vmem:[%s4825_s11 + $0x88] sm:$0xff]  ;;  %v4591_v9 = vld [vmem:[%s4825_s11 + $0x90] sm:$0xff] }
 0x4b7   : > { %v3810_v15 = vadd.f32 %v4578_v27, %v3778_v25  ;;  %v3811_v49 = vadd.f32 %v4579_v28, %v3779_v36  ;;  %v3812_v38 = vadd.f32 %v4580_v24, %v3780_v45  ;;  %v3813_v34 = vadd.f32 %v4581_v13, %v3781_v3  ;;  %3837 = vst.msk [vmem:[%s4825_s11] sm:$0xff] %vm1065_vm5, %v3805_v18  ;;  %v4592_v25 = vld [vmem:[%s4825_s11 + $0x98] sm:$0xff]  ;;  %v4593_v45 = vld [vmem:[%s4825_s11 + $0xa0] sm:$0xff] }
 0x4b8   : > { %v3814_v17 = vadd.f32 %v4582_v35, %v3782_v58  ;;  %v3815_v30 = vadd.f32 %v4583_v43, %v3783_v54  ;;  %v3816_v47 = vadd.f32 %v4584_v14, %v3784_v19  ;;  %v3817_v56 = vadd.f32 %v4585_v26, %v3785_v22  ;;  %3838 = vst.msk [vmem:[%s4825_s11 + $0x8] sm:$0xff] %vm1065_vm5, %v3806_v51  ;;  %v4594_v58 = vld [vmem:[%s4825_s11 + $0xa8] sm:$0xff]  ;;  %v4595_v19 = vld [vmem:[%s4825_s11 + $0xb0] sm:$0xff] }
 0x4b9   : > { %3839 = vst.msk [vmem:[%s4825_s11 + $0x10] sm:$0xff] %vm1065_vm5, %v3807_v32  ;;  %3840 = vst.msk [vmem:[%s4825_s11 + $0x18] sm:$0xff] %vm1065_vm5, %v3808_v1  ;;  %v3818_v57 = vadd.f32 %v4586_v55, %v3786_v16  ;;  %v3819_v48 = vadd.f32 %v4587_v44, %v3787_v2  ;;  %v3820_v12 = vadd.f32 %v4588_v20, %v3788_v7  ;;  %v4596_v16 = vld [vmem:[%s4825_s11 + $0xb8] sm:$0xff]  ;;  %v4597_v7 = vld [vmem:[%s4825_s11 + $0xc0] sm:$0xff] }
 0x4ba   : > { %3841 = vst.msk [vmem:[%s4825_s11 + $0x20] sm:$0xff] %vm1065_vm5, %v3809_v59  ;;  %v3821_v29 = vadd.f32 %v4589_v10, %v3789_v42  ;;  %3842 = vst.msk [vmem:[%s4825_s11 + $0x28] sm:$0xff] %vm1065_vm5, %v3810_v15  ;;  %v3822_v6 = vadd.f32 %v4590_v50, %v3790_v0  ;;  %v3823_v23 = vadd.f32 %v4591_v9, %v3791_v21  ;;  %v4598_v0 = vld [vmem:[%s4825_s11 + $0xc8] sm:$0xff] }
 0x4bb   : > { %3843 = vst.msk [vmem:[%s4825_s11 + $0x30] sm:$0xff] %vm1065_vm5, %v3811_v49  ;;  %3844 = vst.msk [vmem:[%s4825_s11 + $0x38] sm:$0xff] %vm1065_vm5, %v3812_v38  ;;  %v3824_v36 = vadd.f32 %v4592_v25, %v3792_v62  ;;  %v3825_v3 = vadd.f32 %v4593_v45, %v7394_v11  ;;  %v3826_v54 = vadd.f32 %v4594_v58, %v7396_v33  ;;  %v4599_v62 = vld [vmem:[%s4825_s11 + $0xd0] sm:$0xff]  ;;  %v4600_v33 = vld [vmem:[%s4825_s11 + $0xd8] sm:$0xff] }
 0x4bc   : > { %3845 = vst.msk [vmem:[%s4825_s11 + $0x40] sm:$0xff] %vm1065_vm5, %v3813_v34  ;;  %3846 = vst.msk [vmem:[%s4825_s11 + $0x48] sm:$0xff] %vm1065_vm5, %v3814_v17  ;;  %v3827_v22 = vadd.f32 %v4595_v19, %v7398_v46  ;;  %v3828_v2 = vadd.f32 %v4596_v16, %v7400_v63  ;;  %v3829_v42 = vadd.f32 %v4597_v7, %v7402_v61  ;;  %v4601_v63 = vld [vmem:[%s4825_s11 + $0xe0] sm:$0xff] }
 0x4bd   : > { %3847 = vst.msk [vmem:[%s4825_s11 + $0x50] sm:$0xff] %vm1065_vm5, %v3815_v30  ;;  %3848 = vst.msk [vmem:[%s4825_s11 + $0x58] sm:$0xff] %vm1065_vm5, %v3816_v47  ;;  %v3830_v21 = vadd.f32 %v4598_v0, %v7404_v4  ;;  %v3831_v11 = vadd.f32 %v4599_v62, %v7406_v39  ;;  %v3832_v46 = vadd.f32 %v4600_v33, %v7408_v37  ;;  %v4602_v4 = vld [vmem:[%s4825_s11 + $0xf0] sm:$0xff]  ;;  %v4603_v37 = vld [vmem:[%s4825_s11 + $0xf8] sm:$0xff] }
 0x4be   : > { %3849 = vst.msk [vmem:[%s4825_s11 + $0x60] sm:$0xff] %vm1065_vm5, %v3817_v56  ;;  %3850 = vst.msk [vmem:[%s4825_s11 + $0x68] sm:$0xff] %vm1065_vm5, %v3818_v57  ;;  %v3833_v61 = vadd.f32 %v4601_v63, %v7410_v52  ;;  %v3835_v39 = vadd.f32 %v4602_v4, %v7412_v40  ;;  %v3836_v52 = vadd.f32 %v4603_v37, %v7414_v60 }
 0x4bf   : > { %3851 = vst.msk [vmem:[%s4825_s11 + $0x70] sm:$0xff] %vm1065_vm5, %v3819_v48  ;;  %3852 = vst.msk [vmem:[%s4825_s11 + $0x78] sm:$0xff] %vm1065_vm5, %v3820_v12 }
 0x4c0   : > { %3853 = vst.msk [vmem:[%s4825_s11 + $0x80] sm:$0xff] %vm1065_vm5, %v3821_v29  ;;  %3854 = vst.msk [vmem:[%s4825_s11 + $0x88] sm:$0xff] %vm1065_vm5, %v3822_v6 }
 0x4c1   : > { %3855 = vst.msk [vmem:[%s4825_s11 + $0x90] sm:$0xff] %vm1065_vm5, %v3823_v23  ;;  %3856 = vst.msk [vmem:[%s4825_s11 + $0x98] sm:$0xff] %vm1065_vm5, %v3824_v36 }
 0x4c2   : > { %3857 = vst.msk [vmem:[%s4825_s11 + $0xa0] sm:$0xff] %vm1065_vm5, %v3825_v3  ;;  %3858 = vst.msk [vmem:[%s4825_s11 + $0xa8] sm:$0xff] %vm1065_vm5, %v3826_v54 }
 0x4c3   : > { %3859 = vst.msk [vmem:[%s4825_s11 + $0xb0] sm:$0xff] %vm1065_vm5, %v3827_v22  ;;  %3860 = vst.msk [vmem:[%s4825_s11 + $0xb8] sm:$0xff] %vm1065_vm5, %v3828_v2 }
 0x4c4   : > { %3861 = vst.msk [vmem:[%s4825_s11 + $0xc0] sm:$0xff] %vm1065_vm5, %v3829_v42  ;;  %3862 = vst.msk [vmem:[%s4825_s11 + $0xc8] sm:$0xff] %vm1065_vm5, %v3830_v21 }
 0x4c5   : > { %3863 = vst.msk [vmem:[%s4825_s11 + $0xd0] sm:$0xff] %vm1065_vm5, %v3831_v11  ;;  %3864 = vst.msk [vmem:[%s4825_s11 + $0xd8] sm:$0xff] %vm1065_vm5, %v3832_v46 }
 0x4c6   : > { %3865 = vst.msk [vmem:[%s4825_s11 + $0xe0] sm:$0xff] %vm1065_vm5, %v3833_v61  ;;  %3867 = vst.msk [vmem:[%s4825_s11 + $0xf0] sm:$0xff] %vm1065_vm5, %v3835_v39 }
 0x4c7   : > { %3868 = vst.msk [vmem:[%s4825_s11 + $0xf8] sm:$0xff] %vm1065_vm5, %v3836_v52 }
 0x4c8   : > { %4617 = shalt.err (!%p4614_p8)
}
 0x4c9   : > { %s4618_s24 = scalar_lea.hbm %s7503_s9, 4096  ;;  %s4622_s8 = scalar_lea.hbm %s7590_s4, 8192 }
 0x4ca   : > { %p4619_p10 = scmp.ne.s32.totalorder %s7503_s9, %s4618_s24  ;;  %p4623_p13 = scmp.lt.s32.totalorder %s7503_s9, %s7590_s4 }
 0x4cb   : > { %p4624_p0 = scmp.lt.s32.totalorder %s4622_s8, %s4618_s24 }
 0x4cc   : > { %p4620_p11 = pnand %p4619_p10, %p4778_p3 }
 0x4cd   : > { %p4625_p1 = por %p4624_p0, %p4623_p13 }
 0x4ce   : > { %p4621_p12 = pneg %p4620_p11 }
 0x4d0   : > { %p4626_p2 = pnand %p4625_p1, %p4621_p12 }
 0x4d2   : > { %4629 = shalt.err (!%p4626_p2)
}
 0x4d3   : > { %s4702_s20 = smov 128   ;;  %s4703_s21 = smov 8  }
 0x4d4   : > { %4454 = dma.vmem_to_hbm [thread:$0]  (%p4778_p3), %s7507_s26, 4096, %s7503_s9, %s7535_s10, %s4702_s20, %s4702_s20, %s4703_s21  }
 0x4d5 PF: > { %p4460_p4 = scmp.ge.s32.totalorder %s4696_s22, 2  ;;  %s3898_s25 = sand.u32 1, %s4668_s15  }
 0x4d6   : > { %s3899_s6 = scalar_lea.sflag [#allocation3], %s3898_s25 }
 0x4d7   : > { %p4457_p5 = pnand %p4460_p4, %p4788_p9 }
 0x4d9   : > { %p4458_p6 = pneg %p4457_p5 }
 0x4db   : > { %4663 = dma.done.wait (%p4458_p6), %s3899_s6, 4096  }
 0x4dc   : > { %4665 = vsyncadd (%p4458_p6), %s3899_s6, 4294963200  ;;  %s17_s22 = sadd.s32 1, %s4696_s22   ;;  %s7642_s18 = sld [smem:[#allocation5_spill]] }
 0x4dd   : > { %p14_p7 = scmp.ge.s32.totalorder %s17_s22, 6   ;;  %s7643_s19 = sld [smem:[#allocation6_spill]] }
 0x4de   : > { %s7644_s20 = sld [smem:[#allocation7_spill]]  ;;  %s7646_s15 = smov %s4672_s16 }
 0x4df   : > { %s7645_s21 = sld [smem:[#allocation8_spill]]  ;;  %s7647_s16 = smov %s4676_s17 }
 0x4e0   : > { %s7648_s17 = smov %s4796_s5  ;;  %16 = sbr.rel (!%p14_p7) target bundleno = 5 (0x5), region = 87 }
 0x4e5   :  { %3904 = vsyncpa [#allocation3], 1 }
 0x4e6   :  { %3906 = vsyncpa [#allocation3 + $0x1], 1 }

</bundles_post_ra>
